<compile_context>
chip_gen: v6e
topology: v6e:2x2x1
jax: 0.10.0
libtpu: 0.0.40
codegen_flags: <defaults>
</compile_context>

<pallas_src>
import numpy as np
import jax
import jax.numpy as jnp
from jax.experimental import pallas as pl
from jax.experimental.pallas import tpu as pltpu

# Static model dimensions (small, consistent with the module's forward).
T = 8    # max_len (sequence length)
B = 2    # batch
E = 16   # src feature == decoder embed_size == decoder output_size
H = 32   # hidden size


def _dot(a, b):
    return jnp.dot(a, b, preferred_element_type=jnp.float32)


def seq2seq_kernel(src_ref,                                     # (T*B, E)
                   w_ih_f_ref, b_ih_f_ref, w_hh_f_ref, b_hh_f_ref,
                   w_ih_b_ref, b_ih_b_ref, w_hh_b_ref, b_hh_b_ref,
                   attn_we_ref, attn_b_ref, v_col_ref,
                   big_hw_ref, big_hb_ref,
                   w_ih_d_ref, b_ih_d_ref,
                   out_w_ref, out_b_ref,
                   msk_ref, mskt_ref,
                   outputs_ref, enc_out_ref):
    f32 = jnp.float32
    src = src_ref[...]                                          # (T*B, E)

    def gru_gates(gi, gh, h):
        # gi, gh: (B, 3H) fused [r|z|n] pre-activations (biases included)
        r = jax.nn.sigmoid(gi[:, :H] + gh[:, :H])
        z = jax.nn.sigmoid(gi[:, H:2 * H] + gh[:, H:2 * H])
        n = jnp.tanh(gi[:, 2 * H:] + r * gh[:, 2 * H:])
        return (1.0 - z) * n + z * h

    # ---------------- Encoder: bidirectional GRU ----------------------------
    # Input projections hoisted out of the recurrence: ONE (T*B,E)@(E,3H)
    # matmul per direction; only h@W_hh (fused gates) stays on the serial chain.
    gi_f = _dot(src, w_ih_f_ref[...]) + b_ih_f_ref[...]         # (T*B, 3H)
    gi_b = _dot(src, w_ih_b_ref[...]) + b_ih_b_ref[...]         # (T*B, 3H)
    w_hh_f = w_hh_f_ref[...]
    b_hh_f = b_hh_f_ref[...]
    w_hh_b = w_hh_b_ref[...]
    b_hh_b = b_hh_b_ref[...]

    h_f = jnp.zeros((B, H), f32)
    h_b = jnp.zeros((B, H), f32)
    enc_f = [None] * T
    enc_b = [None] * T
    # Fully unrolled; fwd/bwd are independent chains that interleave on MXU/EUP.
    for t in range(T):
        tb = T - 1 - t
        gh_f = _dot(h_f, w_hh_f) + b_hh_f                       # (B, 3H)
        gh_b = _dot(h_b, w_hh_b) + b_hh_b                       # (B, 3H)
        h_f = gru_gates(gi_f[t * B:(t + 1) * B], gh_f, h_f)
        h_b = gru_gates(gi_b[tb * B:(tb + 1) * B], gh_b, h_b)
        enc_f[t] = h_f
        enc_b[tb] = h_b

    # Flat, t-major encoder output (row r = t*B + b); single bulk store.
    enc = jnp.concatenate([enc_f[t] + enc_b[t] for t in range(T)], axis=0)  # (T*B, H)
    enc_out_ref[...] = enc

    # ---------------- Decoder: attention + GRU cell + output Linear ---------
    # Loop-invariant pieces hoisted once.
    enc_proj = _dot(enc, attn_we_ref[...]) + attn_b_ref[...]    # (T*B, H)
    enc_aug = jnp.concatenate([enc, jnp.ones((T * B, 1), f32)], axis=1)  # (T*B, H+1)
    v_col = v_col_ref[...]                                      # (H, 1)
    big_hw = big_hw_ref[...]                                    # (H, H+3H): [attn_w_h | W_hh_dec]
    big_hb = big_hb_ref[...]                                    # (1, H+3H): [0 | b_hh_dec]
    w_ih_d = w_ih_d_ref[...]                                    # (E+H, 3H)
    b_ih_d = b_ih_d_ref[...]
    out_w = out_w_ref[...]                                      # (2H, E)
    out_b = out_b_ref[...]
    msk = msk_ref[...]                                          # (B, T*B): msk[b,r] = (r%B == b)
    msk_t = mskt_ref[...]                                       # (T*B, B)

    # eval mode: initial decoder input is zeros_like(src[0]); no teacher forcing.
    out_prev = jnp.zeros((B, E), f32)
    h = h_f                                                     # fwd-direction final hidden
    outs = [None] * T
    for t in range(T):
        # One matmul gives both the attention hidden-projection and the GRU
        # hidden-gate pre-activations for this step.
        hp = _dot(h, big_hw) + big_hb                           # (B, 4H)
        h_proj = hp[:, :H]                                      # (B, H)
        gh = hp[:, H:]                                          # (B, 3H)

        # Additive attention — every reduction/broadcast routed to the MXU.
        h_tiled = _dot(msk_t, h_proj)                           # (T*B, H): row r <- h_proj[r % B]
        energy = jax.nn.relu(enc_proj + h_tiled)                # (T*B, H)
        scores = _dot(energy, v_col)                            # (T*B, 1)
        mmax = jnp.max(scores, axis=0, keepdims=True)           # global max (softmax-invariant)
        es = jnp.exp(scores - mmax)                             # (T*B, 1)
        # cm[b] = [sum_t es[t,b]*enc[t,b,:] , sum_t es[t,b]]  (one matmul)
        cm = _dot(msk, es * enc_aug)                            # (B, H+1)
        ctx = cm[:, :H] * pl.reciprocal(cm[:, H:H + 1], approx=True)   # (B, H)

        # GRU step on [prev_output | context] as a single fused-gate matmul.
        rnn_in = jnp.concatenate([out_prev, ctx], axis=1)       # (B, E+H)
        gi = _dot(rnn_in, w_ih_d) + b_ih_d                      # (B, 3H)
        h = gru_gates(gi, gh, h)

        # Output Linear on [h | context] as a single matmul.
        out_prev = _dot(jnp.concatenate([h, ctx], axis=1), out_w) + out_b  # (B, E)
        outs[t] = out_prev

    outputs_ref[...] = jnp.concatenate(outs, axis=0)            # (T*B, E), single bulk store


def seq2seq_forward(src, trg, params, teacher_forcing_ratio=0.0):
    # trg is only consumed under stochastic teacher forcing; with ratio=0 it is unused.
    del trg, teacher_forcing_ratio
    (w_ih_f, w_hh_f, b_ih_f, b_hh_f,
     w_ih_b, w_hh_b, b_ih_b, b_hh_b,
     attn_w, attn_b, v,
     w_ih_d, w_hh_d, b_ih_d, b_hh_d,
     out_w, out_b) = params

    # Layout / fusion prep done at the XLA level (free): flat time-major src,
    # split attention weight halves, fused [attn_w_h | W_hh_dec] weight, and
    # constant batch-selection masks for the in-kernel broadcast/contraction
    # matmuls.
    src_flat = src.reshape(T * B, E)
    attn_w_h = attn_w[:H]                                       # hidden half
    attn_w_e = attn_w[H:]                                       # encoder half
    big_hw = jnp.concatenate([attn_w_h, w_hh_d], axis=1)        # (H, 4H) = (32, 128)
    big_hb = jnp.concatenate([jnp.zeros((1, H), jnp.float32), b_hh_d], axis=1)
    v_col = v.T                                                 # (H, 1)
    rows = np.arange(T * B) % B
    msk_np = (rows[None, :] == np.arange(B)[:, None]).astype(np.float32)  # (B, T*B)
    msk = jnp.asarray(msk_np)
    msk_t = jnp.asarray(np.ascontiguousarray(msk_np.T))         # (T*B, B)

    args = (src_flat,
            w_ih_f, b_ih_f, w_hh_f, b_hh_f,
            w_ih_b, b_ih_b, w_hh_b, b_hh_b,
            attn_w_e, attn_b, v_col,
            big_hw, big_hb,
            w_ih_d, b_ih_d,
            out_w, out_b,
            msk, msk_t)

    vmem = lambda: pl.BlockSpec(memory_space=pltpu.MemorySpace.VMEM)
    outputs_flat, enc_flat = pl.pallas_call(
        seq2seq_kernel,
        out_shape=(jax.ShapeDtypeStruct((T * B, E), jnp.float32),
                   jax.ShapeDtypeStruct((T * B, H), jnp.float32)),
        in_specs=[vmem() for _ in range(len(args))],
        out_specs=(vmem(), vmem()),
    )(*args)
    # Restore the (T, B, .) time-major API layout outside the kernel (free).
    return outputs_flat.reshape(T, B, E), enc_flat.reshape(T, B, H)


def init_params(key):
    """Deterministic params, PyTorch-style uniform(-1/sqrt(fan), 1/sqrt(fan)).
    All weight matrices are pre-transposed to (in_features, out_features)."""
    ks = jax.random.split(key, 17)

    def u(k, shape, fan):
        b = 1.0 / np.sqrt(fan)
        return jax.random.uniform(k, shape, jnp.float32, -b, b)

    return [
        u(ks[0], (E, 3 * H), H),       # encoder fwd W_ih
        u(ks[1], (H, 3 * H), H),       # encoder fwd W_hh
        u(ks[2], (1, 3 * H), H),       # encoder fwd b_ih
        u(ks[3], (1, 3 * H), H),       # encoder fwd b_hh
        u(ks[4], (E, 3 * H), H),       # encoder bwd W_ih
        u(ks[5], (H, 3 * H), H),       # encoder bwd W_hh
        u(ks[6], (1, 3 * H), H),       # encoder bwd b_ih
        u(ks[7], (1, 3 * H), H),       # encoder bwd b_hh
        u(ks[8], (2 * H, H), 2 * H),   # attention Linear weight (transposed)
        u(ks[9], (1, H), 2 * H),       # attention Linear bias
        u(ks[10], (1, H), H),          # attention v
        u(ks[11], (E + H, 3 * H), H),  # decoder GRU W_ih ([embed|context])
        u(ks[12], (H, 3 * H), H),      # decoder GRU W_hh
        u(ks[13], (1, 3 * H), H),      # decoder GRU b_ih
        u(ks[14], (1, 3 * H), H),      # decoder GRU b_hh
        u(ks[15], (2 * H, E), 2 * H),  # output Linear weight (transposed)
        u(ks[16], (1, E), 2 * H),      # output Linear bias
    ]


def ref_forward(src, params):
    """Pure numpy (float64) reference mirroring the PyTorch module in eval mode."""
    p = [np.asarray(x, np.float64) for x in params]
    (w_ih_f, w_hh_f, b_ih_f, b_hh_f,
     w_ih_b, w_hh_b, b_ih_b, b_hh_b,
     attn_w, attn_b, v,
     w_ih_d, w_hh_d, b_ih_d, b_hh_d,
     out_w, out_b) = p
    src = np.asarray(src, np.float64)

    def sigmoid(x):
        return 1.0 / (1.0 + np.exp(-x))

    def gru(x, h, wi, wh, bi, bh):
        gi = x @ wi + bi
        gh = h @ wh + bh
        r = sigmoid(gi[:, :H] + gh[:, :H])
        z = sigmoid(gi[:, H:2 * H] + gh[:, H:2 * H])
        n = np.tanh(gi[:, 2 * H:] + r * gh[:, 2 * H:])
        return (1.0 - z) * n + z * h

    enc = np.zeros((T, B, H))
    h = np.zeros((B, H))
    for t in range(T):
        h = gru(src[t], h, w_ih_f, w_hh_f, b_ih_f, b_hh_f)
        enc[t] += h
    h_fwd = h
    h = np.zeros((B, H))
    for t in range(T - 1, -1, -1):
        h = gru(src[t], h, w_ih_b, w_hh_b, b_ih_b, b_hh_b)
        enc[t] += h

    outputs = np.zeros((T, B, E))
    out = np.zeros((B, E))
    h = h_fwd
    for t in range(T):
        h_rep = np.broadcast_to(h[None], (T, B, H))
        cat_he = np.concatenate([h_rep, enc], axis=-1)
        energy = np.maximum(cat_he.reshape(T * B, 2 * H) @ attn_w + attn_b, 0.0)
        energy = energy.reshape(T, B, H)
        scores = np.sum(energy * v[None], axis=-1)
        scores = scores - scores.max(axis=0, keepdims=True)
        es = np.exp(scores)
        aw = es / es.sum(axis=0, keepdims=True)
        ctx = np.sum(aw[:, :, None] * enc, axis=0)
        rnn_in = np.concatenate([out, ctx], axis=-1)
        h = gru(rnn_in, h, w_ih_d, w_hh_d, b_ih_d, b_hh_d)
        out = np.concatenate([h, ctx], axis=-1) @ out_w + out_b
        outputs[t] = out
    return outputs, enc


if __name__ == "__main__":
    key = jax.random.PRNGKey(0)
    k_src, k_trg, k_par = jax.random.split(key, 3)
    src = jax.random.normal(k_src, (T, B, E), jnp.float32)
    trg = jax.random.normal(k_trg, (T, B, E), jnp.float32)  # unused (ratio=0.0)
    params = init_params(k_par)

    outputs, enc_out = seq2seq_forward(src, trg, params, teacher_forcing_ratio=0.0)
    jax.block_until_ready((outputs, enc_out))

    ref_outputs, ref_enc = ref_forward(src, params)
    err_o = float(np.max(np.abs(np.asarray(outputs) - ref_outputs)))
    err_e = float(np.max(np.abs(np.asarray(enc_out) - ref_enc)))
    assert outputs.shape == (T, B, E) and enc_out.shape == (T, B, H)
    assert err_o < 5e-2 and err_e < 5e-2, (err_o, err_e)
    print("KERNEL_OK")
</pallas_src>

<mosaic_0001>
module attributes {stable_mosaic.version = 11 : i64} {
  func.func @seq2seq_kernel(%arg0: memref<16x16xf32, #tpu.memory_space<vmem>>, %arg1: memref<16x96xf32, #tpu.memory_space<vmem>>, %arg2: memref<1x96xf32, #tpu.memory_space<vmem>>, %arg3: memref<32x96xf32, #tpu.memory_space<vmem>>, %arg4: memref<1x96xf32, #tpu.memory_space<vmem>>, %arg5: memref<16x96xf32, #tpu.memory_space<vmem>>, %arg6: memref<1x96xf32, #tpu.memory_space<vmem>>, %arg7: memref<32x96xf32, #tpu.memory_space<vmem>>, %arg8: memref<1x96xf32, #tpu.memory_space<vmem>>, %arg9: memref<32x32xf32, #tpu.memory_space<vmem>>, %arg10: memref<1x32xf32, #tpu.memory_space<vmem>>, %arg11: memref<32x1xf32, #tpu.memory_space<vmem>>, %arg12: memref<32x128xf32, #tpu.memory_space<vmem>>, %arg13: memref<1x128xf32, #tpu.memory_space<vmem>>, %arg14: memref<48x96xf32, #tpu.memory_space<vmem>>, %arg15: memref<1x96xf32, #tpu.memory_space<vmem>>, %arg16: memref<64x16xf32, #tpu.memory_space<vmem>>, %arg17: memref<1x16xf32, #tpu.memory_space<vmem>>, %arg18: memref<2x16xf32, #tpu.memory_space<vmem>>, %arg19: memref<16x2xf32, #tpu.memory_space<vmem>>, %arg20: memref<16x16xf32, #tpu.memory_space<vmem>>, %arg21: memref<16x32xf32, #tpu.memory_space<vmem>>) attributes {dimension_semantics = [], scalar_prefetch = 0 : i64, scratch_operands = 0 : i64, tpu.core_type = #tpu.core_type<tc>} {
    %c0 = arith.constant 0 : index
    %c0_0 = arith.constant 0 : index
    %0 = vector.load %arg0[%c0, %c0_0] : memref<16x16xf32, #tpu.memory_space<vmem>>, vector<16x16xf32>
    %c0_1 = arith.constant 0 : index
    %c0_2 = arith.constant 0 : index
    %1 = vector.load %arg1[%c0_1, %c0_2] : memref<16x96xf32, #tpu.memory_space<vmem>>, vector<16x96xf32>
    %cst = arith.constant dense<0.000000e+00> : vector<16x96xf32>
    %2 = tpu.matmul %0, %1, %cst {dimension_numbers = #tpu.dot_dimension_numbers<[1], [0], [0], [1], [0, 0, 1, 1], [], []>} : vector<16x16xf32>, vector<16x96xf32>, vector<16x96xf32> -> vector<16x96xf32>
    %c0_3 = arith.constant 0 : index
    %c0_4 = arith.constant 0 : index
    %3 = vector.load %arg2[%c0_3, %c0_4] : memref<1x96xf32, #tpu.memory_space<vmem>>, vector<1x96xf32>
    %4 = vector.broadcast %3 : vector<1x96xf32> to vector<16x96xf32>
    %5 = arith.addf %2, %4 : vector<16x96xf32>
    %c0_5 = arith.constant 0 : index
    %c0_6 = arith.constant 0 : index
    %6 = vector.load %arg5[%c0_5, %c0_6] : memref<16x96xf32, #tpu.memory_space<vmem>>, vector<16x96xf32>
    %cst_7 = arith.constant dense<0.000000e+00> : vector<16x96xf32>
    %7 = tpu.matmul %0, %6, %cst_7 {dimension_numbers = #tpu.dot_dimension_numbers<[1], [0], [0], [1], [0, 0, 1, 1], [], []>} : vector<16x16xf32>, vector<16x96xf32>, vector<16x96xf32> -> vector<16x96xf32>
    %c0_8 = arith.constant 0 : index
    %c0_9 = arith.constant 0 : index
    %8 = vector.load %arg6[%c0_8, %c0_9] : memref<1x96xf32, #tpu.memory_space<vmem>>, vector<1x96xf32>
    %9 = vector.broadcast %8 : vector<1x96xf32> to vector<16x96xf32>
    %10 = arith.addf %7, %9 : vector<16x96xf32>
    %c0_10 = arith.constant 0 : index
    %c0_11 = arith.constant 0 : index
    %11 = vector.load %arg3[%c0_10, %c0_11] : memref<32x96xf32, #tpu.memory_space<vmem>>, vector<32x96xf32>
    %c0_12 = arith.constant 0 : index
    %c0_13 = arith.constant 0 : index
    %12 = vector.load %arg4[%c0_12, %c0_13] : memref<1x96xf32, #tpu.memory_space<vmem>>, vector<1x96xf32>
    %c0_14 = arith.constant 0 : index
    %c0_15 = arith.constant 0 : index
    %13 = vector.load %arg7[%c0_14, %c0_15] : memref<32x96xf32, #tpu.memory_space<vmem>>, vector<32x96xf32>
    %c0_16 = arith.constant 0 : index
    %c0_17 = arith.constant 0 : index
    %14 = vector.load %arg8[%c0_16, %c0_17] : memref<1x96xf32, #tpu.memory_space<vmem>>, vector<1x96xf32>
    %cst_18 = arith.constant 0.000000e+00 : f32
    %15 = vector.broadcast %cst_18 : f32 to vector<2x32xf32>
    %cst_19 = arith.constant 0.000000e+00 : f32
    %16 = vector.broadcast %cst_19 : f32 to vector<2x32xf32>
    %cst_20 = arith.constant dense<0.000000e+00> : vector<2x96xf32>
    %17 = tpu.matmul %15, %11, %cst_20 {dimension_numbers = #tpu.dot_dimension_numbers<[1], [0], [0], [1], [0, 0, 1, 1], [], []>} : vector<2x32xf32>, vector<32x96xf32>, vector<2x96xf32> -> vector<2x96xf32>
    %18 = vector.broadcast %12 : vector<1x96xf32> to vector<2x96xf32>
    %19 = arith.addf %17, %18 : vector<2x96xf32>
    %cst_21 = arith.constant dense<0.000000e+00> : vector<2x96xf32>
    %20 = tpu.matmul %16, %13, %cst_21 {dimension_numbers = #tpu.dot_dimension_numbers<[1], [0], [0], [1], [0, 0, 1, 1], [], []>} : vector<2x32xf32>, vector<32x96xf32>, vector<2x96xf32> -> vector<2x96xf32>
    %21 = vector.broadcast %14 : vector<1x96xf32> to vector<2x96xf32>
    %22 = arith.addf %20, %21 : vector<2x96xf32>
    %23 = vector.extract_strided_slice %5 {offsets = [0, 0], sizes = [2, 96], strides = [1, 1]} : vector<16x96xf32> to vector<2x96xf32>
    %24 = vector.extract_strided_slice %23 {offsets = [0, 0], sizes = [2, 32], strides = [1, 1]} : vector<2x96xf32> to vector<2x32xf32>
    %25 = vector.extract_strided_slice %19 {offsets = [0, 0], sizes = [2, 32], strides = [1, 1]} : vector<2x96xf32> to vector<2x32xf32>
    %26 = arith.addf %24, %25 : vector<2x32xf32>
    %27 = arith.negf %26 : vector<2x32xf32>
    %28 = math.exp %27 : vector<2x32xf32>
    %cst_22 = arith.constant 1.000000e+00 : f32
    %29 = vector.broadcast %cst_22 : f32 to vector<2x32xf32>
    %30 = arith.addf %29, %28 : vector<2x32xf32>
    %31 = arith.divf %29, %30 : vector<2x32xf32>
    %32 = vector.extract_strided_slice %23 {offsets = [0, 32], sizes = [2, 32], strides = [1, 1]} : vector<2x96xf32> to vector<2x32xf32>
    %33 = vector.extract_strided_slice %19 {offsets = [0, 32], sizes = [2, 32], strides = [1, 1]} : vector<2x96xf32> to vector<2x32xf32>
    %34 = arith.addf %32, %33 : vector<2x32xf32>
    %35 = arith.negf %34 : vector<2x32xf32>
    %36 = math.exp %35 : vector<2x32xf32>
    %cst_23 = arith.constant 1.000000e+00 : f32
    %37 = vector.broadcast %cst_23 : f32 to vector<2x32xf32>
    %38 = arith.addf %37, %36 : vector<2x32xf32>
    %39 = arith.divf %37, %38 : vector<2x32xf32>
    %40 = vector.extract_strided_slice %23 {offsets = [0, 64], sizes = [2, 32], strides = [1, 1]} : vector<2x96xf32> to vector<2x32xf32>
    %41 = vector.extract_strided_slice %19 {offsets = [0, 64], sizes = [2, 32], strides = [1, 1]} : vector<2x96xf32> to vector<2x32xf32>
    %42 = arith.mulf %31, %41 : vector<2x32xf32>
    %43 = arith.addf %40, %42 : vector<2x32xf32>
    %44 = math.tanh %43 : vector<2x32xf32>
    %cst_24 = arith.constant 1.000000e+00 : f32
    %45 = vector.broadcast %cst_24 : f32 to vector<2x32xf32>
    %46 = arith.subf %45, %39 : vector<2x32xf32>
    %47 = arith.mulf %46, %44 : vector<2x32xf32>
    %48 = arith.mulf %39, %15 : vector<2x32xf32>
    %49 = arith.addf %47, %48 : vector<2x32xf32>
    %50 = vector.extract_strided_slice %10 {offsets = [14, 0], sizes = [2, 96], strides = [1, 1]} : vector<16x96xf32> to vector<2x96xf32>
    %51 = vector.extract_strided_slice %50 {offsets = [0, 0], sizes = [2, 32], strides = [1, 1]} : vector<2x96xf32> to vector<2x32xf32>
    %52 = vector.extract_strided_slice %22 {offsets = [0, 0], sizes = [2, 32], strides = [1, 1]} : vector<2x96xf32> to vector<2x32xf32>
    %53 = arith.addf %51, %52 : vector<2x32xf32>
    %54 = arith.negf %53 : vector<2x32xf32>
    %55 = math.exp %54 : vector<2x32xf32>
    %cst_25 = arith.constant 1.000000e+00 : f32
    %56 = vector.broadcast %cst_25 : f32 to vector<2x32xf32>
    %57 = arith.addf %56, %55 : vector<2x32xf32>
    %58 = arith.divf %56, %57 : vector<2x32xf32>
    %59 = vector.extract_strided_slice %50 {offsets = [0, 32], sizes = [2, 32], strides = [1, 1]} : vector<2x96xf32> to vector<2x32xf32>
    %60 = vector.extract_strided_slice %22 {offsets = [0, 32], sizes = [2, 32], strides = [1, 1]} : vector<2x96xf32> to vector<2x32xf32>
    %61 = arith.addf %59, %60 : vector<2x32xf32>
    %62 = arith.negf %61 : vector<2x32xf32>
    %63 = math.exp %62 : vector<2x32xf32>
    %cst_26 = arith.constant 1.000000e+00 : f32
    %64 = vector.broadcast %cst_26 : f32 to vector<2x32xf32>
    %65 = arith.addf %64, %63 : vector<2x32xf32>
    %66 = arith.divf %64, %65 : vector<2x32xf32>
    %67 = vector.extract_strided_slice %50 {offsets = [0, 64], sizes = [2, 32], strides = [1, 1]} : vector<2x96xf32> to vector<2x32xf32>
    %68 = vector.extract_strided_slice %22 {offsets = [0, 64], sizes = [2, 32], strides = [1, 1]} : vector<2x96xf32> to vector<2x32xf32>
    %69 = arith.mulf %58, %68 : vector<2x32xf32>
    %70 = arith.addf %67, %69 : vector<2x32xf32>
    %71 = math.tanh %70 : vector<2x32xf32>
    %cst_27 = arith.constant 1.000000e+00 : f32
    %72 = vector.broadcast %cst_27 : f32 to vector<2x32xf32>
    %73 = arith.subf %72, %66 : vector<2x32xf32>
    %74 = arith.mulf %73, %71 : vector<2x32xf32>
    %75 = arith.mulf %66, %16 : vector<2x32xf32>
    %76 = arith.addf %74, %75 : vector<2x32xf32>
    %cst_28 = arith.constant dense<0.000000e+00> : vector<2x96xf32>
    %77 = tpu.matmul %49, %11, %cst_28 {dimension_numbers = #tpu.dot_dimension_numbers<[1], [0], [0], [1], [0, 0, 1, 1], [], []>} : vector<2x32xf32>, vector<32x96xf32>, vector<2x96xf32> -> vector<2x96xf32>
    %78 = vector.broadcast %12 : vector<1x96xf32> to vector<2x96xf32>
    %79 = arith.addf %77, %78 : vector<2x96xf32>
    %cst_29 = arith.constant dense<0.000000e+00> : vector<2x96xf32>
    %80 = tpu.matmul %76, %13, %cst_29 {dimension_numbers = #tpu.dot_dimension_numbers<[1], [0], [0], [1], [0, 0, 1, 1], [], []>} : vector<2x32xf32>, vector<32x96xf32>, vector<2x96xf32> -> vector<2x96xf32>
    %81 = vector.broadcast %14 : vector<1x96xf32> to vector<2x96xf32>
    %82 = arith.addf %80, %81 : vector<2x96xf32>
    %83 = vector.extract_strided_slice %5 {offsets = [2, 0], sizes = [2, 96], strides = [1, 1]} : vector<16x96xf32> to vector<2x96xf32>
    %84 = vector.extract_strided_slice %83 {offsets = [0, 0], sizes = [2, 32], strides = [1, 1]} : vector<2x96xf32> to vector<2x32xf32>
    %85 = vector.extract_strided_slice %79 {offsets = [0, 0], sizes = [2, 32], strides = [1, 1]} : vector<2x96xf32> to vector<2x32xf32>
    %86 = arith.addf %84, %85 : vector<2x32xf32>
    %87 = arith.negf %86 : vector<2x32xf32>
    %88 = math.exp %87 : vector<2x32xf32>
    %cst_30 = arith.constant 1.000000e+00 : f32
    %89 = vector.broadcast %cst_30 : f32 to vector<2x32xf32>
    %90 = arith.addf %89, %88 : vector<2x32xf32>
    %91 = arith.divf %89, %90 : vector<2x32xf32>
    %92 = vector.extract_strided_slice %83 {offsets = [0, 32], sizes = [2, 32], strides = [1, 1]} : vector<2x96xf32> to vector<2x32xf32>
    %93 = vector.extract_strided_slice %79 {offsets = [0, 32], sizes = [2, 32], strides = [1, 1]} : vector<2x96xf32> to vector<2x32xf32>
    %94 = arith.addf %92, %93 : vector<2x32xf32>
    %95 = arith.negf %94 : vector<2x32xf32>
    %96 = math.exp %95 : vector<2x32xf32>
    %cst_31 = arith.constant 1.000000e+00 : f32
    %97 = vector.broadcast %cst_31 : f32 to vector<2x32xf32>
    %98 = arith.addf %97, %96 : vector<2x32xf32>
    %99 = arith.divf %97, %98 : vector<2x32xf32>
    %100 = vector.extract_strided_slice %83 {offsets = [0, 64], sizes = [2, 32], strides = [1, 1]} : vector<2x96xf32> to vector<2x32xf32>
    %101 = vector.extract_strided_slice %79 {offsets = [0, 64], sizes = [2, 32], strides = [1, 1]} : vector<2x96xf32> to vector<2x32xf32>
    %102 = arith.mulf %91, %101 : vector<2x32xf32>
    %103 = arith.addf %100, %102 : vector<2x32xf32>
    %104 = math.tanh %103 : vector<2x32xf32>
    %cst_32 = arith.constant 1.000000e+00 : f32
    %105 = vector.broadcast %cst_32 : f32 to vector<2x32xf32>
    %106 = arith.subf %105, %99 : vector<2x32xf32>
    %107 = arith.mulf %106, %104 : vector<2x32xf32>
    %108 = arith.mulf %99, %49 : vector<2x32xf32>
    %109 = arith.addf %107, %108 : vector<2x32xf32>
    %110 = vector.extract_strided_slice %10 {offsets = [12, 0], sizes = [2, 96], strides = [1, 1]} : vector<16x96xf32> to vector<2x96xf32>
    %111 = vector.extract_strided_slice %110 {offsets = [0, 0], sizes = [2, 32], strides = [1, 1]} : vector<2x96xf32> to vector<2x32xf32>
    %112 = vector.extract_strided_slice %82 {offsets = [0, 0], sizes = [2, 32], strides = [1, 1]} : vector<2x96xf32> to vector<2x32xf32>
    %113 = arith.addf %111, %112 : vector<2x32xf32>
    %114 = arith.negf %113 : vector<2x32xf32>
    %115 = math.exp %114 : vector<2x32xf32>
    %cst_33 = arith.constant 1.000000e+00 : f32
    %116 = vector.broadcast %cst_33 : f32 to vector<2x32xf32>
    %117 = arith.addf %116, %115 : vector<2x32xf32>
    %118 = arith.divf %116, %117 : vector<2x32xf32>
    %119 = vector.extract_strided_slice %110 {offsets = [0, 32], sizes = [2, 32], strides = [1, 1]} : vector<2x96xf32> to vector<2x32xf32>
    %120 = vector.extract_strided_slice %82 {offsets = [0, 32], sizes = [2, 32], strides = [1, 1]} : vector<2x96xf32> to vector<2x32xf32>
    %121 = arith.addf %119, %120 : vector<2x32xf32>
    %122 = arith.negf %121 : vector<2x32xf32>
    %123 = math.exp %122 : vector<2x32xf32>
    %cst_34 = arith.constant 1.000000e+00 : f32
    %124 = vector.broadcast %cst_34 : f32 to vector<2x32xf32>
    %125 = arith.addf %124, %123 : vector<2x32xf32>
    %126 = arith.divf %124, %125 : vector<2x32xf32>
    %127 = vector.extract_strided_slice %110 {offsets = [0, 64], sizes = [2, 32], strides = [1, 1]} : vector<2x96xf32> to vector<2x32xf32>
    %128 = vector.extract_strided_slice %82 {offsets = [0, 64], sizes = [2, 32], strides = [1, 1]} : vector<2x96xf32> to vector<2x32xf32>
    %129 = arith.mulf %118, %128 : vector<2x32xf32>
    %130 = arith.addf %127, %129 : vector<2x32xf32>
    %131 = math.tanh %130 : vector<2x32xf32>
    %cst_35 = arith.constant 1.000000e+00 : f32
    %132 = vector.broadcast %cst_35 : f32 to vector<2x32xf32>
    %133 = arith.subf %132, %126 : vector<2x32xf32>
    %134 = arith.mulf %133, %131 : vector<2x32xf32>
    %135 = arith.mulf %126, %76 : vector<2x32xf32>
    %136 = arith.addf %134, %135 : vector<2x32xf32>
    %cst_36 = arith.constant dense<0.000000e+00> : vector<2x96xf32>
    %137 = tpu.matmul %109, %11, %cst_36 {dimension_numbers = #tpu.dot_dimension_numbers<[1], [0], [0], [1], [0, 0, 1, 1], [], []>} : vector<2x32xf32>, vector<32x96xf32>, vector<2x96xf32> -> vector<2x96xf32>
    %138 = vector.broadcast %12 : vector<1x96xf32> to vector<2x96xf32>
    %139 = arith.addf %137, %138 : vector<2x96xf32>
    %cst_37 = arith.constant dense<0.000000e+00> : vector<2x96xf32>
    %140 = tpu.matmul %136, %13, %cst_37 {dimension_numbers = #tpu.dot_dimension_numbers<[1], [0], [0], [1], [0, 0, 1, 1], [], []>} : vector<2x32xf32>, vector<32x96xf32>, vector<2x96xf32> -> vector<2x96xf32>
    %141 = vector.broadcast %14 : vector<1x96xf32> to vector<2x96xf32>
    %142 = arith.addf %140, %141 : vector<2x96xf32>
    %143 = vector.extract_strided_slice %5 {offsets = [4, 0], sizes = [2, 96], strides = [1, 1]} : vector<16x96xf32> to vector<2x96xf32>
    %144 = vector.extract_strided_slice %143 {offsets = [0, 0], sizes = [2, 32], strides = [1, 1]} : vector<2x96xf32> to vector<2x32xf32>
    %145 = vector.extract_strided_slice %139 {offsets = [0, 0], sizes = [2, 32], strides = [1, 1]} : vector<2x96xf32> to vector<2x32xf32>
    %146 = arith.addf %144, %145 : vector<2x32xf32>
    %147 = arith.negf %146 : vector<2x32xf32>
    %148 = math.exp %147 : vector<2x32xf32>
    %cst_38 = arith.constant 1.000000e+00 : f32
    %149 = vector.broadcast %cst_38 : f32 to vector<2x32xf32>
    %150 = arith.addf %149, %148 : vector<2x32xf32>
    %151 = arith.divf %149, %150 : vector<2x32xf32>
    %152 = vector.extract_strided_slice %143 {offsets = [0, 32], sizes = [2, 32], strides = [1, 1]} : vector<2x96xf32> to vector<2x32xf32>
    %153 = vector.extract_strided_slice %139 {offsets = [0, 32], sizes = [2, 32], strides = [1, 1]} : vector<2x96xf32> to vector<2x32xf32>
    %154 = arith.addf %152, %153 : vector<2x32xf32>
    %155 = arith.negf %154 : vector<2x32xf32>
    %156 = math.exp %155 : vector<2x32xf32>
    %cst_39 = arith.constant 1.000000e+00 : f32
    %157 = vector.broadcast %cst_39 : f32 to vector<2x32xf32>
    %158 = arith.addf %157, %156 : vector<2x32xf32>
    %159 = arith.divf %157, %158 : vector<2x32xf32>
    %160 = vector.extract_strided_slice %143 {offsets = [0, 64], sizes = [2, 32], strides = [1, 1]} : vector<2x96xf32> to vector<2x32xf32>
    %161 = vector.extract_strided_slice %139 {offsets = [0, 64], sizes = [2, 32], strides = [1, 1]} : vector<2x96xf32> to vector<2x32xf32>
    %162 = arith.mulf %151, %161 : vector<2x32xf32>
    %163 = arith.addf %160, %162 : vector<2x32xf32>
    %164 = math.tanh %163 : vector<2x32xf32>
    %cst_40 = arith.constant 1.000000e+00 : f32
    %165 = vector.broadcast %cst_40 : f32 to vector<2x32xf32>
    %166 = arith.subf %165, %159 : vector<2x32xf32>
    %167 = arith.mulf %166, %164 : vector<2x32xf32>
    %168 = arith.mulf %159, %109 : vector<2x32xf32>
    %169 = arith.addf %167, %168 : vector<2x32xf32>
    %170 = vector.extract_strided_slice %10 {offsets = [10, 0], sizes = [2, 96], strides = [1, 1]} : vector<16x96xf32> to vector<2x96xf32>
    %171 = vector.extract_strided_slice %170 {offsets = [0, 0], sizes = [2, 32], strides = [1, 1]} : vector<2x96xf32> to vector<2x32xf32>
    %172 = vector.extract_strided_slice %142 {offsets = [0, 0], sizes = [2, 32], strides = [1, 1]} : vector<2x96xf32> to vector<2x32xf32>
    %173 = arith.addf %171, %172 : vector<2x32xf32>
    %174 = arith.negf %173 : vector<2x32xf32>
    %175 = math.exp %174 : vector<2x32xf32>
    %cst_41 = arith.constant 1.000000e+00 : f32
    %176 = vector.broadcast %cst_41 : f32 to vector<2x32xf32>
    %177 = arith.addf %176, %175 : vector<2x32xf32>
    %178 = arith.divf %176, %177 : vector<2x32xf32>
    %179 = vector.extract_strided_slice %170 {offsets = [0, 32], sizes = [2, 32], strides = [1, 1]} : vector<2x96xf32> to vector<2x32xf32>
    %180 = vector.extract_strided_slice %142 {offsets = [0, 32], sizes = [2, 32], strides = [1, 1]} : vector<2x96xf32> to vector<2x32xf32>
    %181 = arith.addf %179, %180 : vector<2x32xf32>
    %182 = arith.negf %181 : vector<2x32xf32>
    %183 = math.exp %182 : vector<2x32xf32>
    %cst_42 = arith.constant 1.000000e+00 : f32
    %184 = vector.broadcast %cst_42 : f32 to vector<2x32xf32>
    %185 = arith.addf %184, %183 : vector<2x32xf32>
    %186 = arith.divf %184, %185 : vector<2x32xf32>
    %187 = vector.extract_strided_slice %170 {offsets = [0, 64], sizes = [2, 32], strides = [1, 1]} : vector<2x96xf32> to vector<2x32xf32>
    %188 = vector.extract_strided_slice %142 {offsets = [0, 64], sizes = [2, 32], strides = [1, 1]} : vector<2x96xf32> to vector<2x32xf32>
    %189 = arith.mulf %178, %188 : vector<2x32xf32>
    %190 = arith.addf %187, %189 : vector<2x32xf32>
    %191 = math.tanh %190 : vector<2x32xf32>
    %cst_43 = arith.constant 1.000000e+00 : f32
    %192 = vector.broadcast %cst_43 : f32 to vector<2x32xf32>
    %193 = arith.subf %192, %186 : vector<2x32xf32>
    %194 = arith.mulf %193, %191 : vector<2x32xf32>
    %195 = arith.mulf %186, %136 : vector<2x32xf32>
    %196 = arith.addf %194, %195 : vector<2x32xf32>
    %cst_44 = arith.constant dense<0.000000e+00> : vector<2x96xf32>
    %197 = tpu.matmul %169, %11, %cst_44 {dimension_numbers = #tpu.dot_dimension_numbers<[1], [0], [0], [1], [0, 0, 1, 1], [], []>} : vector<2x32xf32>, vector<32x96xf32>, vector<2x96xf32> -> vector<2x96xf32>
    %198 = vector.broadcast %12 : vector<1x96xf32> to vector<2x96xf32>
    %199 = arith.addf %197, %198 : vector<2x96xf32>
    %cst_45 = arith.constant dense<0.000000e+00> : vector<2x96xf32>
    %200 = tpu.matmul %196, %13, %cst_45 {dimension_numbers = #tpu.dot_dimension_numbers<[1], [0], [0], [1], [0, 0, 1, 1], [], []>} : vector<2x32xf32>, vector<32x96xf32>, vector<2x96xf32> -> vector<2x96xf32>
    %201 = vector.broadcast %14 : vector<1x96xf32> to vector<2x96xf32>
    %202 = arith.addf %200, %201 : vector<2x96xf32>
    %203 = vector.extract_strided_slice %5 {offsets = [6, 0], sizes = [2, 96], strides = [1, 1]} : vector<16x96xf32> to vector<2x96xf32>
    %204 = vector.extract_strided_slice %203 {offsets = [0, 0], sizes = [2, 32], strides = [1, 1]} : vector<2x96xf32> to vector<2x32xf32>
    %205 = vector.extract_strided_slice %199 {offsets = [0, 0], sizes = [2, 32], strides = [1, 1]} : vector<2x96xf32> to vector<2x32xf32>
    %206 = arith.addf %204, %205 : vector<2x32xf32>
    %207 = arith.negf %206 : vector<2x32xf32>
    %208 = math.exp %207 : vector<2x32xf32>
    %cst_46 = arith.constant 1.000000e+00 : f32
    %209 = vector.broadcast %cst_46 : f32 to vector<2x32xf32>
    %210 = arith.addf %209, %208 : vector<2x32xf32>
    %211 = arith.divf %209, %210 : vector<2x32xf32>
    %212 = vector.extract_strided_slice %203 {offsets = [0, 32], sizes = [2, 32], strides = [1, 1]} : vector<2x96xf32> to vector<2x32xf32>
    %213 = vector.extract_strided_slice %199 {offsets = [0, 32], sizes = [2, 32], strides = [1, 1]} : vector<2x96xf32> to vector<2x32xf32>
    %214 = arith.addf %212, %213 : vector<2x32xf32>
    %215 = arith.negf %214 : vector<2x32xf32>
    %216 = math.exp %215 : vector<2x32xf32>
    %cst_47 = arith.constant 1.000000e+00 : f32
    %217 = vector.broadcast %cst_47 : f32 to vector<2x32xf32>
    %218 = arith.addf %217, %216 : vector<2x32xf32>
    %219 = arith.divf %217, %218 : vector<2x32xf32>
    %220 = vector.extract_strided_slice %203 {offsets = [0, 64], sizes = [2, 32], strides = [1, 1]} : vector<2x96xf32> to vector<2x32xf32>
    %221 = vector.extract_strided_slice %199 {offsets = [0, 64], sizes = [2, 32], strides = [1, 1]} : vector<2x96xf32> to vector<2x32xf32>
    %222 = arith.mulf %211, %221 : vector<2x32xf32>
    %223 = arith.addf %220, %222 : vector<2x32xf32>
    %224 = math.tanh %223 : vector<2x32xf32>
    %cst_48 = arith.constant 1.000000e+00 : f32
    %225 = vector.broadcast %cst_48 : f32 to vector<2x32xf32>
    %226 = arith.subf %225, %219 : vector<2x32xf32>
    %227 = arith.mulf %226, %224 : vector<2x32xf32>
    %228 = arith.mulf %219, %169 : vector<2x32xf32>
    %229 = arith.addf %227, %228 : vector<2x32xf32>
    %230 = vector.extract_strided_slice %10 {offsets = [8, 0], sizes = [2, 96], strides = [1, 1]} : vector<16x96xf32> to vector<2x96xf32>
    %231 = vector.extract_strided_slice %230 {offsets = [0, 0], sizes = [2, 32], strides = [1, 1]} : vector<2x96xf32> to vector<2x32xf32>
    %232 = vector.extract_strided_slice %202 {offsets = [0, 0], sizes = [2, 32], strides = [1, 1]} : vector<2x96xf32> to vector<2x32xf32>
    %233 = arith.addf %231, %232 : vector<2x32xf32>
    %234 = arith.negf %233 : vector<2x32xf32>
    %235 = math.exp %234 : vector<2x32xf32>
    %cst_49 = arith.constant 1.000000e+00 : f32
    %236 = vector.broadcast %cst_49 : f32 to vector<2x32xf32>
    %237 = arith.addf %236, %235 : vector<2x32xf32>
    %238 = arith.divf %236, %237 : vector<2x32xf32>
    %239 = vector.extract_strided_slice %230 {offsets = [0, 32], sizes = [2, 32], strides = [1, 1]} : vector<2x96xf32> to vector<2x32xf32>
    %240 = vector.extract_strided_slice %202 {offsets = [0, 32], sizes = [2, 32], strides = [1, 1]} : vector<2x96xf32> to vector<2x32xf32>
    %241 = arith.addf %239, %240 : vector<2x32xf32>
    %242 = arith.negf %241 : vector<2x32xf32>
    %243 = math.exp %242 : vector<2x32xf32>
    %cst_50 = arith.constant 1.000000e+00 : f32
    %244 = vector.broadcast %cst_50 : f32 to vector<2x32xf32>
    %245 = arith.addf %244, %243 : vector<2x32xf32>
    %246 = arith.divf %244, %245 : vector<2x32xf32>
    %247 = vector.extract_strided_slice %230 {offsets = [0, 64], sizes = [2, 32], strides = [1, 1]} : vector<2x96xf32> to vector<2x32xf32>
    %248 = vector.extract_strided_slice %202 {offsets = [0, 64], sizes = [2, 32], strides = [1, 1]} : vector<2x96xf32> to vector<2x32xf32>
    %249 = arith.mulf %238, %248 : vector<2x32xf32>
    %250 = arith.addf %247, %249 : vector<2x32xf32>
    %251 = math.tanh %250 : vector<2x32xf32>
    %cst_51 = arith.constant 1.000000e+00 : f32
    %252 = vector.broadcast %cst_51 : f32 to vector<2x32xf32>
    %253 = arith.subf %252, %246 : vector<2x32xf32>
    %254 = arith.mulf %253, %251 : vector<2x32xf32>
    %255 = arith.mulf %246, %196 : vector<2x32xf32>
    %256 = arith.addf %254, %255 : vector<2x32xf32>
    %cst_52 = arith.constant dense<0.000000e+00> : vector<2x96xf32>
    %257 = tpu.matmul %229, %11, %cst_52 {dimension_numbers = #tpu.dot_dimension_numbers<[1], [0], [0], [1], [0, 0, 1, 1], [], []>} : vector<2x32xf32>, vector<32x96xf32>, vector<2x96xf32> -> vector<2x96xf32>
    %258 = vector.broadcast %12 : vector<1x96xf32> to vector<2x96xf32>
    %259 = arith.addf %257, %258 : vector<2x96xf32>
    %cst_53 = arith.constant dense<0.000000e+00> : vector<2x96xf32>
    %260 = tpu.matmul %256, %13, %cst_53 {dimension_numbers = #tpu.dot_dimension_numbers<[1], [0], [0], [1], [0, 0, 1, 1], [], []>} : vector<2x32xf32>, vector<32x96xf32>, vector<2x96xf32> -> vector<2x96xf32>
    %261 = vector.broadcast %14 : vector<1x96xf32> to vector<2x96xf32>
    %262 = arith.addf %260, %261 : vector<2x96xf32>
    %263 = vector.extract_strided_slice %5 {offsets = [8, 0], sizes = [2, 96], strides = [1, 1]} : vector<16x96xf32> to vector<2x96xf32>
    %264 = vector.extract_strided_slice %263 {offsets = [0, 0], sizes = [2, 32], strides = [1, 1]} : vector<2x96xf32> to vector<2x32xf32>
    %265 = vector.extract_strided_slice %259 {offsets = [0, 0], sizes = [2, 32], strides = [1, 1]} : vector<2x96xf32> to vector<2x32xf32>
    %266 = arith.addf %264, %265 : vector<2x32xf32>
    %267 = arith.negf %266 : vector<2x32xf32>
    %268 = math.exp %267 : vector<2x32xf32>
    %cst_54 = arith.constant 1.000000e+00 : f32
    %269 = vector.broadcast %cst_54 : f32 to vector<2x32xf32>
    %270 = arith.addf %269, %268 : vector<2x32xf32>
    %271 = arith.divf %269, %270 : vector<2x32xf32>
    %272 = vector.extract_strided_slice %263 {offsets = [0, 32], sizes = [2, 32], strides = [1, 1]} : vector<2x96xf32> to vector<2x32xf32>
    %273 = vector.extract_strided_slice %259 {offsets = [0, 32], sizes = [2, 32], strides = [1, 1]} : vector<2x96xf32> to vector<2x32xf32>
    %274 = arith.addf %272, %273 : vector<2x32xf32>
    %275 = arith.negf %274 : vector<2x32xf32>
    %276 = math.exp %275 : vector<2x32xf32>
    %cst_55 = arith.constant 1.000000e+00 : f32
    %277 = vector.broadcast %cst_55 : f32 to vector<2x32xf32>
    %278 = arith.addf %277, %276 : vector<2x32xf32>
    %279 = arith.divf %277, %278 : vector<2x32xf32>
    %280 = vector.extract_strided_slice %263 {offsets = [0, 64], sizes = [2, 32], strides = [1, 1]} : vector<2x96xf32> to vector<2x32xf32>
    %281 = vector.extract_strided_slice %259 {offsets = [0, 64], sizes = [2, 32], strides = [1, 1]} : vector<2x96xf32> to vector<2x32xf32>
    %282 = arith.mulf %271, %281 : vector<2x32xf32>
    %283 = arith.addf %280, %282 : vector<2x32xf32>
    %284 = math.tanh %283 : vector<2x32xf32>
    %cst_56 = arith.constant 1.000000e+00 : f32
    %285 = vector.broadcast %cst_56 : f32 to vector<2x32xf32>
    %286 = arith.subf %285, %279 : vector<2x32xf32>
    %287 = arith.mulf %286, %284 : vector<2x32xf32>
    %288 = arith.mulf %279, %229 : vector<2x32xf32>
    %289 = arith.addf %287, %288 : vector<2x32xf32>
    %290 = vector.extract_strided_slice %10 {offsets = [6, 0], sizes = [2, 96], strides = [1, 1]} : vector<16x96xf32> to vector<2x96xf32>
    %291 = vector.extract_strided_slice %290 {offsets = [0, 0], sizes = [2, 32], strides = [1, 1]} : vector<2x96xf32> to vector<2x32xf32>
    %292 = vector.extract_strided_slice %262 {offsets = [0, 0], sizes = [2, 32], strides = [1, 1]} : vector<2x96xf32> to vector<2x32xf32>
    %293 = arith.addf %291, %292 : vector<2x32xf32>
    %294 = arith.negf %293 : vector<2x32xf32>
    %295 = math.exp %294 : vector<2x32xf32>
    %cst_57 = arith.constant 1.000000e+00 : f32
    %296 = vector.broadcast %cst_57 : f32 to vector<2x32xf32>
    %297 = arith.addf %296, %295 : vector<2x32xf32>
    %298 = arith.divf %296, %297 : vector<2x32xf32>
    %299 = vector.extract_strided_slice %290 {offsets = [0, 32], sizes = [2, 32], strides = [1, 1]} : vector<2x96xf32> to vector<2x32xf32>
    %300 = vector.extract_strided_slice %262 {offsets = [0, 32], sizes = [2, 32], strides = [1, 1]} : vector<2x96xf32> to vector<2x32xf32>
    %301 = arith.addf %299, %300 : vector<2x32xf32>
    %302 = arith.negf %301 : vector<2x32xf32>
    %303 = math.exp %302 : vector<2x32xf32>
    %cst_58 = arith.constant 1.000000e+00 : f32
    %304 = vector.broadcast %cst_58 : f32 to vector<2x32xf32>
    %305 = arith.addf %304, %303 : vector<2x32xf32>
    %306 = arith.divf %304, %305 : vector<2x32xf32>
    %307 = vector.extract_strided_slice %290 {offsets = [0, 64], sizes = [2, 32], strides = [1, 1]} : vector<2x96xf32> to vector<2x32xf32>
    %308 = vector.extract_strided_slice %262 {offsets = [0, 64], sizes = [2, 32], strides = [1, 1]} : vector<2x96xf32> to vector<2x32xf32>
    %309 = arith.mulf %298, %308 : vector<2x32xf32>
    %310 = arith.addf %307, %309 : vector<2x32xf32>
    %311 = math.tanh %310 : vector<2x32xf32>
    %cst_59 = arith.constant 1.000000e+00 : f32
    %312 = vector.broadcast %cst_59 : f32 to vector<2x32xf32>
    %313 = arith.subf %312, %306 : vector<2x32xf32>
    %314 = arith.mulf %313, %311 : vector<2x32xf32>
    %315 = arith.mulf %306, %256 : vector<2x32xf32>
    %316 = arith.addf %314, %315 : vector<2x32xf32>
    %cst_60 = arith.constant dense<0.000000e+00> : vector<2x96xf32>
    %317 = tpu.matmul %289, %11, %cst_60 {dimension_numbers = #tpu.dot_dimension_numbers<[1], [0], [0], [1], [0, 0, 1, 1], [], []>} : vector<2x32xf32>, vector<32x96xf32>, vector<2x96xf32> -> vector<2x96xf32>
    %318 = vector.broadcast %12 : vector<1x96xf32> to vector<2x96xf32>
    %319 = arith.addf %317, %318 : vector<2x96xf32>
    %cst_61 = arith.constant dense<0.000000e+00> : vector<2x96xf32>
    %320 = tpu.matmul %316, %13, %cst_61 {dimension_numbers = #tpu.dot_dimension_numbers<[1], [0], [0], [1], [0, 0, 1, 1], [], []>} : vector<2x32xf32>, vector<32x96xf32>, vector<2x96xf32> -> vector<2x96xf32>
    %321 = vector.broadcast %14 : vector<1x96xf32> to vector<2x96xf32>
    %322 = arith.addf %320, %321 : vector<2x96xf32>
    %323 = vector.extract_strided_slice %5 {offsets = [10, 0], sizes = [2, 96], strides = [1, 1]} : vector<16x96xf32> to vector<2x96xf32>
    %324 = vector.extract_strided_slice %323 {offsets = [0, 0], sizes = [2, 32], strides = [1, 1]} : vector<2x96xf32> to vector<2x32xf32>
    %325 = vector.extract_strided_slice %319 {offsets = [0, 0], sizes = [2, 32], strides = [1, 1]} : vector<2x96xf32> to vector<2x32xf32>
    %326 = arith.addf %324, %325 : vector<2x32xf32>
    %327 = arith.negf %326 : vector<2x32xf32>
    %328 = math.exp %327 : vector<2x32xf32>
    %cst_62 = arith.constant 1.000000e+00 : f32
    %329 = vector.broadcast %cst_62 : f32 to vector<2x32xf32>
    %330 = arith.addf %329, %328 : vector<2x32xf32>
    %331 = arith.divf %329, %330 : vector<2x32xf32>
    %332 = vector.extract_strided_slice %323 {offsets = [0, 32], sizes = [2, 32], strides = [1, 1]} : vector<2x96xf32> to vector<2x32xf32>
    %333 = vector.extract_strided_slice %319 {offsets = [0, 32], sizes = [2, 32], strides = [1, 1]} : vector<2x96xf32> to vector<2x32xf32>
    %334 = arith.addf %332, %333 : vector<2x32xf32>
    %335 = arith.negf %334 : vector<2x32xf32>
    %336 = math.exp %335 : vector<2x32xf32>
    %cst_63 = arith.constant 1.000000e+00 : f32
    %337 = vector.broadcast %cst_63 : f32 to vector<2x32xf32>
    %338 = arith.addf %337, %336 : vector<2x32xf32>
    %339 = arith.divf %337, %338 : vector<2x32xf32>
    %340 = vector.extract_strided_slice %323 {offsets = [0, 64], sizes = [2, 32], strides = [1, 1]} : vector<2x96xf32> to vector<2x32xf32>
    %341 = vector.extract_strided_slice %319 {offsets = [0, 64], sizes = [2, 32], strides = [1, 1]} : vector<2x96xf32> to vector<2x32xf32>
    %342 = arith.mulf %331, %341 : vector<2x32xf32>
    %343 = arith.addf %340, %342 : vector<2x32xf32>
    %344 = math.tanh %343 : vector<2x32xf32>
    %cst_64 = arith.constant 1.000000e+00 : f32
    %345 = vector.broadcast %cst_64 : f32 to vector<2x32xf32>
    %346 = arith.subf %345, %339 : vector<2x32xf32>
    %347 = arith.mulf %346, %344 : vector<2x32xf32>
    %348 = arith.mulf %339, %289 : vector<2x32xf32>
    %349 = arith.addf %347, %348 : vector<2x32xf32>
    %350 = vector.extract_strided_slice %10 {offsets = [4, 0], sizes = [2, 96], strides = [1, 1]} : vector<16x96xf32> to vector<2x96xf32>
    %351 = vector.extract_strided_slice %350 {offsets = [0, 0], sizes = [2, 32], strides = [1, 1]} : vector<2x96xf32> to vector<2x32xf32>
    %352 = vector.extract_strided_slice %322 {offsets = [0, 0], sizes = [2, 32], strides = [1, 1]} : vector<2x96xf32> to vector<2x32xf32>
    %353 = arith.addf %351, %352 : vector<2x32xf32>
    %354 = arith.negf %353 : vector<2x32xf32>
    %355 = math.exp %354 : vector<2x32xf32>
    %cst_65 = arith.constant 1.000000e+00 : f32
    %356 = vector.broadcast %cst_65 : f32 to vector<2x32xf32>
    %357 = arith.addf %356, %355 : vector<2x32xf32>
    %358 = arith.divf %356, %357 : vector<2x32xf32>
    %359 = vector.extract_strided_slice %350 {offsets = [0, 32], sizes = [2, 32], strides = [1, 1]} : vector<2x96xf32> to vector<2x32xf32>
    %360 = vector.extract_strided_slice %322 {offsets = [0, 32], sizes = [2, 32], strides = [1, 1]} : vector<2x96xf32> to vector<2x32xf32>
    %361 = arith.addf %359, %360 : vector<2x32xf32>
    %362 = arith.negf %361 : vector<2x32xf32>
    %363 = math.exp %362 : vector<2x32xf32>
    %cst_66 = arith.constant 1.000000e+00 : f32
    %364 = vector.broadcast %cst_66 : f32 to vector<2x32xf32>
    %365 = arith.addf %364, %363 : vector<2x32xf32>
    %366 = arith.divf %364, %365 : vector<2x32xf32>
    %367 = vector.extract_strided_slice %350 {offsets = [0, 64], sizes = [2, 32], strides = [1, 1]} : vector<2x96xf32> to vector<2x32xf32>
    %368 = vector.extract_strided_slice %322 {offsets = [0, 64], sizes = [2, 32], strides = [1, 1]} : vector<2x96xf32> to vector<2x32xf32>
    %369 = arith.mulf %358, %368 : vector<2x32xf32>
    %370 = arith.addf %367, %369 : vector<2x32xf32>
    %371 = math.tanh %370 : vector<2x32xf32>
    %cst_67 = arith.constant 1.000000e+00 : f32
    %372 = vector.broadcast %cst_67 : f32 to vector<2x32xf32>
    %373 = arith.subf %372, %366 : vector<2x32xf32>
    %374 = arith.mulf %373, %371 : vector<2x32xf32>
    %375 = arith.mulf %366, %316 : vector<2x32xf32>
    %376 = arith.addf %374, %375 : vector<2x32xf32>
    %cst_68 = arith.constant dense<0.000000e+00> : vector<2x96xf32>
    %377 = tpu.matmul %349, %11, %cst_68 {dimension_numbers = #tpu.dot_dimension_numbers<[1], [0], [0], [1], [0, 0, 1, 1], [], []>} : vector<2x32xf32>, vector<32x96xf32>, vector<2x96xf32> -> vector<2x96xf32>
    %378 = vector.broadcast %12 : vector<1x96xf32> to vector<2x96xf32>
    %379 = arith.addf %377, %378 : vector<2x96xf32>
    %cst_69 = arith.constant dense<0.000000e+00> : vector<2x96xf32>
    %380 = tpu.matmul %376, %13, %cst_69 {dimension_numbers = #tpu.dot_dimension_numbers<[1], [0], [0], [1], [0, 0, 1, 1], [], []>} : vector<2x32xf32>, vector<32x96xf32>, vector<2x96xf32> -> vector<2x96xf32>
    %381 = vector.broadcast %14 : vector<1x96xf32> to vector<2x96xf32>
    %382 = arith.addf %380, %381 : vector<2x96xf32>
    %383 = vector.extract_strided_slice %5 {offsets = [12, 0], sizes = [2, 96], strides = [1, 1]} : vector<16x96xf32> to vector<2x96xf32>
    %384 = vector.extract_strided_slice %383 {offsets = [0, 0], sizes = [2, 32], strides = [1, 1]} : vector<2x96xf32> to vector<2x32xf32>
    %385 = vector.extract_strided_slice %379 {offsets = [0, 0], sizes = [2, 32], strides = [1, 1]} : vector<2x96xf32> to vector<2x32xf32>
    %386 = arith.addf %384, %385 : vector<2x32xf32>
    %387 = arith.negf %386 : vector<2x32xf32>
    %388 = math.exp %387 : vector<2x32xf32>
    %cst_70 = arith.constant 1.000000e+00 : f32
    %389 = vector.broadcast %cst_70 : f32 to vector<2x32xf32>
    %390 = arith.addf %389, %388 : vector<2x32xf32>
    %391 = arith.divf %389, %390 : vector<2x32xf32>
    %392 = vector.extract_strided_slice %383 {offsets = [0, 32], sizes = [2, 32], strides = [1, 1]} : vector<2x96xf32> to vector<2x32xf32>
    %393 = vector.extract_strided_slice %379 {offsets = [0, 32], sizes = [2, 32], strides = [1, 1]} : vector<2x96xf32> to vector<2x32xf32>
    %394 = arith.addf %392, %393 : vector<2x32xf32>
    %395 = arith.negf %394 : vector<2x32xf32>
    %396 = math.exp %395 : vector<2x32xf32>
    %cst_71 = arith.constant 1.000000e+00 : f32
    %397 = vector.broadcast %cst_71 : f32 to vector<2x32xf32>
    %398 = arith.addf %397, %396 : vector<2x32xf32>
    %399 = arith.divf %397, %398 : vector<2x32xf32>
    %400 = vector.extract_strided_slice %383 {offsets = [0, 64], sizes = [2, 32], strides = [1, 1]} : vector<2x96xf32> to vector<2x32xf32>
    %401 = vector.extract_strided_slice %379 {offsets = [0, 64], sizes = [2, 32], strides = [1, 1]} : vector<2x96xf32> to vector<2x32xf32>
    %402 = arith.mulf %391, %401 : vector<2x32xf32>
    %403 = arith.addf %400, %402 : vector<2x32xf32>
    %404 = math.tanh %403 : vector<2x32xf32>
    %cst_72 = arith.constant 1.000000e+00 : f32
    %405 = vector.broadcast %cst_72 : f32 to vector<2x32xf32>
    %406 = arith.subf %405, %399 : vector<2x32xf32>
    %407 = arith.mulf %406, %404 : vector<2x32xf32>
    %408 = arith.mulf %399, %349 : vector<2x32xf32>
    %409 = arith.addf %407, %408 : vector<2x32xf32>
    %410 = vector.extract_strided_slice %10 {offsets = [2, 0], sizes = [2, 96], strides = [1, 1]} : vector<16x96xf32> to vector<2x96xf32>
    %411 = vector.extract_strided_slice %410 {offsets = [0, 0], sizes = [2, 32], strides = [1, 1]} : vector<2x96xf32> to vector<2x32xf32>
    %412 = vector.extract_strided_slice %382 {offsets = [0, 0], sizes = [2, 32], strides = [1, 1]} : vector<2x96xf32> to vector<2x32xf32>
    %413 = arith.addf %411, %412 : vector<2x32xf32>
    %414 = arith.negf %413 : vector<2x32xf32>
    %415 = math.exp %414 : vector<2x32xf32>
    %cst_73 = arith.constant 1.000000e+00 : f32
    %416 = vector.broadcast %cst_73 : f32 to vector<2x32xf32>
    %417 = arith.addf %416, %415 : vector<2x32xf32>
    %418 = arith.divf %416, %417 : vector<2x32xf32>
    %419 = vector.extract_strided_slice %410 {offsets = [0, 32], sizes = [2, 32], strides = [1, 1]} : vector<2x96xf32> to vector<2x32xf32>
    %420 = vector.extract_strided_slice %382 {offsets = [0, 32], sizes = [2, 32], strides = [1, 1]} : vector<2x96xf32> to vector<2x32xf32>
    %421 = arith.addf %419, %420 : vector<2x32xf32>
    %422 = arith.negf %421 : vector<2x32xf32>
    %423 = math.exp %422 : vector<2x32xf32>
    %cst_74 = arith.constant 1.000000e+00 : f32
    %424 = vector.broadcast %cst_74 : f32 to vector<2x32xf32>
    %425 = arith.addf %424, %423 : vector<2x32xf32>
    %426 = arith.divf %424, %425 : vector<2x32xf32>
    %427 = vector.extract_strided_slice %410 {offsets = [0, 64], sizes = [2, 32], strides = [1, 1]} : vector<2x96xf32> to vector<2x32xf32>
    %428 = vector.extract_strided_slice %382 {offsets = [0, 64], sizes = [2, 32], strides = [1, 1]} : vector<2x96xf32> to vector<2x32xf32>
    %429 = arith.mulf %418, %428 : vector<2x32xf32>
    %430 = arith.addf %427, %429 : vector<2x32xf32>
    %431 = math.tanh %430 : vector<2x32xf32>
    %cst_75 = arith.constant 1.000000e+00 : f32
    %432 = vector.broadcast %cst_75 : f32 to vector<2x32xf32>
    %433 = arith.subf %432, %426 : vector<2x32xf32>
    %434 = arith.mulf %433, %431 : vector<2x32xf32>
    %435 = arith.mulf %426, %376 : vector<2x32xf32>
    %436 = arith.addf %434, %435 : vector<2x32xf32>
    %cst_76 = arith.constant dense<0.000000e+00> : vector<2x96xf32>
    %437 = tpu.matmul %409, %11, %cst_76 {dimension_numbers = #tpu.dot_dimension_numbers<[1], [0], [0], [1], [0, 0, 1, 1], [], []>} : vector<2x32xf32>, vector<32x96xf32>, vector<2x96xf32> -> vector<2x96xf32>
    %438 = vector.broadcast %12 : vector<1x96xf32> to vector<2x96xf32>
    %439 = arith.addf %437, %438 : vector<2x96xf32>
    %cst_77 = arith.constant dense<0.000000e+00> : vector<2x96xf32>
    %440 = tpu.matmul %436, %13, %cst_77 {dimension_numbers = #tpu.dot_dimension_numbers<[1], [0], [0], [1], [0, 0, 1, 1], [], []>} : vector<2x32xf32>, vector<32x96xf32>, vector<2x96xf32> -> vector<2x96xf32>
    %441 = vector.broadcast %14 : vector<1x96xf32> to vector<2x96xf32>
    %442 = arith.addf %440, %441 : vector<2x96xf32>
    %443 = vector.extract_strided_slice %5 {offsets = [14, 0], sizes = [2, 96], strides = [1, 1]} : vector<16x96xf32> to vector<2x96xf32>
    %444 = vector.extract_strided_slice %443 {offsets = [0, 0], sizes = [2, 32], strides = [1, 1]} : vector<2x96xf32> to vector<2x32xf32>
    %445 = vector.extract_strided_slice %439 {offsets = [0, 0], sizes = [2, 32], strides = [1, 1]} : vector<2x96xf32> to vector<2x32xf32>
    %446 = arith.addf %444, %445 : vector<2x32xf32>
    %447 = arith.negf %446 : vector<2x32xf32>
    %448 = math.exp %447 : vector<2x32xf32>
    %cst_78 = arith.constant 1.000000e+00 : f32
    %449 = vector.broadcast %cst_78 : f32 to vector<2x32xf32>
    %450 = arith.addf %449, %448 : vector<2x32xf32>
    %451 = arith.divf %449, %450 : vector<2x32xf32>
    %452 = vector.extract_strided_slice %443 {offsets = [0, 32], sizes = [2, 32], strides = [1, 1]} : vector<2x96xf32> to vector<2x32xf32>
    %453 = vector.extract_strided_slice %439 {offsets = [0, 32], sizes = [2, 32], strides = [1, 1]} : vector<2x96xf32> to vector<2x32xf32>
    %454 = arith.addf %452, %453 : vector<2x32xf32>
    %455 = arith.negf %454 : vector<2x32xf32>
    %456 = math.exp %455 : vector<2x32xf32>
    %cst_79 = arith.constant 1.000000e+00 : f32
    %457 = vector.broadcast %cst_79 : f32 to vector<2x32xf32>
    %458 = arith.addf %457, %456 : vector<2x32xf32>
    %459 = arith.divf %457, %458 : vector<2x32xf32>
    %460 = vector.extract_strided_slice %443 {offsets = [0, 64], sizes = [2, 32], strides = [1, 1]} : vector<2x96xf32> to vector<2x32xf32>
    %461 = vector.extract_strided_slice %439 {offsets = [0, 64], sizes = [2, 32], strides = [1, 1]} : vector<2x96xf32> to vector<2x32xf32>
    %462 = arith.mulf %451, %461 : vector<2x32xf32>
    %463 = arith.addf %460, %462 : vector<2x32xf32>
    %464 = math.tanh %463 : vector<2x32xf32>
    %cst_80 = arith.constant 1.000000e+00 : f32
    %465 = vector.broadcast %cst_80 : f32 to vector<2x32xf32>
    %466 = arith.subf %465, %459 : vector<2x32xf32>
    %467 = arith.mulf %466, %464 : vector<2x32xf32>
    %468 = arith.mulf %459, %409 : vector<2x32xf32>
    %469 = arith.addf %467, %468 : vector<2x32xf32>
    %470 = vector.extract_strided_slice %10 {offsets = [0, 0], sizes = [2, 96], strides = [1, 1]} : vector<16x96xf32> to vector<2x96xf32>
    %471 = vector.extract_strided_slice %470 {offsets = [0, 0], sizes = [2, 32], strides = [1, 1]} : vector<2x96xf32> to vector<2x32xf32>
    %472 = vector.extract_strided_slice %442 {offsets = [0, 0], sizes = [2, 32], strides = [1, 1]} : vector<2x96xf32> to vector<2x32xf32>
    %473 = arith.addf %471, %472 : vector<2x32xf32>
    %474 = arith.negf %473 : vector<2x32xf32>
    %475 = math.exp %474 : vector<2x32xf32>
    %cst_81 = arith.constant 1.000000e+00 : f32
    %476 = vector.broadcast %cst_81 : f32 to vector<2x32xf32>
    %477 = arith.addf %476, %475 : vector<2x32xf32>
    %478 = arith.divf %476, %477 : vector<2x32xf32>
    %479 = vector.extract_strided_slice %470 {offsets = [0, 32], sizes = [2, 32], strides = [1, 1]} : vector<2x96xf32> to vector<2x32xf32>
    %480 = vector.extract_strided_slice %442 {offsets = [0, 32], sizes = [2, 32], strides = [1, 1]} : vector<2x96xf32> to vector<2x32xf32>
    %481 = arith.addf %479, %480 : vector<2x32xf32>
    %482 = arith.negf %481 : vector<2x32xf32>
    %483 = math.exp %482 : vector<2x32xf32>
    %cst_82 = arith.constant 1.000000e+00 : f32
    %484 = vector.broadcast %cst_82 : f32 to vector<2x32xf32>
    %485 = arith.addf %484, %483 : vector<2x32xf32>
    %486 = arith.divf %484, %485 : vector<2x32xf32>
    %487 = vector.extract_strided_slice %470 {offsets = [0, 64], sizes = [2, 32], strides = [1, 1]} : vector<2x96xf32> to vector<2x32xf32>
    %488 = vector.extract_strided_slice %442 {offsets = [0, 64], sizes = [2, 32], strides = [1, 1]} : vector<2x96xf32> to vector<2x32xf32>
    %489 = arith.mulf %478, %488 : vector<2x32xf32>
    %490 = arith.addf %487, %489 : vector<2x32xf32>
    %491 = math.tanh %490 : vector<2x32xf32>
    %cst_83 = arith.constant 1.000000e+00 : f32
    %492 = vector.broadcast %cst_83 : f32 to vector<2x32xf32>
    %493 = arith.subf %492, %486 : vector<2x32xf32>
    %494 = arith.mulf %493, %491 : vector<2x32xf32>
    %495 = arith.mulf %486, %436 : vector<2x32xf32>
    %496 = arith.addf %494, %495 : vector<2x32xf32>
    %497 = arith.addf %49, %496 : vector<2x32xf32>
    %498 = arith.addf %109, %436 : vector<2x32xf32>
    %499 = arith.addf %169, %376 : vector<2x32xf32>
    %500 = arith.addf %229, %316 : vector<2x32xf32>
    %501 = arith.addf %289, %256 : vector<2x32xf32>
    %502 = arith.addf %349, %196 : vector<2x32xf32>
    %503 = arith.addf %409, %136 : vector<2x32xf32>
    %504 = arith.addf %469, %76 : vector<2x32xf32>
    %505 = tpu.concatenate %497, %498, %499, %500, %501, %502, %503, %504 in 0 : vector<2x32xf32>, vector<2x32xf32>, vector<2x32xf32>, vector<2x32xf32>, vector<2x32xf32>, vector<2x32xf32>, vector<2x32xf32>, vector<2x32xf32> -> vector<16x32xf32>
    %c0_84 = arith.constant 0 : index
    %c0_85 = arith.constant 0 : index
    %506 = vector.load %arg21[%c0_84, %c0_85] : memref<16x32xf32, #tpu.memory_space<vmem>>, vector<16x32xf32>
    tpu.vector_store %arg21[%c0_84, %c0_85], %505 {strides = array<i32>} : memref<16x32xf32, #tpu.memory_space<vmem>>, vector<16x32xf32>,
    %c0_86 = arith.constant 0 : index
    %c0_87 = arith.constant 0 : index
    %507 = vector.load %arg9[%c0_86, %c0_87] : memref<32x32xf32, #tpu.memory_space<vmem>>, vector<32x32xf32>
    %cst_88 = arith.constant dense<0.000000e+00> : vector<16x32xf32>
    %508 = tpu.matmul %505, %507, %cst_88 {dimension_numbers = #tpu.dot_dimension_numbers<[1], [0], [0], [1], [0, 0, 1, 1], [], []>} : vector<16x32xf32>, vector<32x32xf32>, vector<16x32xf32> -> vector<16x32xf32>
    %c0_89 = arith.constant 0 : index
    %c0_90 = arith.constant 0 : index
    %509 = vector.load %arg10[%c0_89, %c0_90] : memref<1x32xf32, #tpu.memory_space<vmem>>, vector<1x32xf32>
    %510 = vector.broadcast %509 : vector<1x32xf32> to vector<16x32xf32>
    %511 = arith.addf %508, %510 : vector<16x32xf32>
    %cst_91 = arith.constant 1.000000e+00 : f32
    %512 = vector.broadcast %cst_91 : f32 to vector<16x1xf32>
    %513 = tpu.concatenate %505, %512 in 1 : vector<16x32xf32>, vector<16x1xf32> -> vector<16x33xf32>
    %c0_92 = arith.constant 0 : index
    %c0_93 = arith.constant 0 : index
    %514 = vector.load %arg11[%c0_92, %c0_93] : memref<32x1xf32, #tpu.memory_space<vmem>>, vector<32x1xf32>
    %c0_94 = arith.constant 0 : index
    %c0_95 = arith.constant 0 : index
    %515 = vector.load %arg12[%c0_94, %c0_95] : memref<32x128xf32, #tpu.memory_space<vmem>>, vector<32x128xf32>
    %c0_96 = arith.constant 0 : index
    %c0_97 = arith.constant 0 : index
    %516 = vector.load %arg13[%c0_96, %c0_97] : memref<1x128xf32, #tpu.memory_space<vmem>>, vector<1x128xf32>
    %c0_98 = arith.constant 0 : index
    %c0_99 = arith.constant 0 : index
    %517 = vector.load %arg14[%c0_98, %c0_99] : memref<48x96xf32, #tpu.memory_space<vmem>>, vector<48x96xf32>
    %c0_100 = arith.constant 0 : index
    %c0_101 = arith.constant 0 : index
    %518 = vector.load %arg15[%c0_100, %c0_101] : memref<1x96xf32, #tpu.memory_space<vmem>>, vector<1x96xf32>
    %c0_102 = arith.constant 0 : index
    %c0_103 = arith.constant 0 : index
    %519 = vector.load %arg16[%c0_102, %c0_103] : memref<64x16xf32, #tpu.memory_space<vmem>>, vector<64x16xf32>
    %c0_104 = arith.constant 0 : index
    %c0_105 = arith.constant 0 : index
    %520 = vector.load %arg17[%c0_104, %c0_105] : memref<1x16xf32, #tpu.memory_space<vmem>>, vector<1x16xf32>
    %c0_106 = arith.constant 0 : index
    %c0_107 = arith.constant 0 : index
    %521 = vector.load %arg18[%c0_106, %c0_107] : memref<2x16xf32, #tpu.memory_space<vmem>>, vector<2x16xf32>
    %c0_108 = arith.constant 0 : index
    %c0_109 = arith.constant 0 : index
    %522 = vector.load %arg19[%c0_108, %c0_109] : memref<16x2xf32, #tpu.memory_space<vmem>>, vector<16x2xf32>
    %cst_110 = arith.constant 0.000000e+00 : f32
    %523 = vector.broadcast %cst_110 : f32 to vector<2x16xf32>
    %cst_111 = arith.constant dense<0.000000e+00> : vector<2x128xf32>
    %524 = tpu.matmul %469, %515, %cst_111 {dimension_numbers = #tpu.dot_dimension_numbers<[1], [0], [0], [1], [0, 0, 1, 1], [], []>} : vector<2x32xf32>, vector<32x128xf32>, vector<2x128xf32> -> vector<2x128xf32>
    %525 = vector.broadcast %516 : vector<1x128xf32> to vector<2x128xf32>
    %526 = arith.addf %524, %525 : vector<2x128xf32>
    %527 = vector.extract_strided_slice %526 {offsets = [0, 0], sizes = [2, 32], strides = [1, 1]} : vector<2x128xf32> to vector<2x32xf32>
    %528 = vector.extract_strided_slice %526 {offsets = [0, 32], sizes = [2, 96], strides = [1, 1]} : vector<2x128xf32> to vector<2x96xf32>
    %cst_112 = arith.constant dense<0.000000e+00> : vector<16x32xf32>
    %529 = tpu.matmul %522, %527, %cst_112 {dimension_numbers = #tpu.dot_dimension_numbers<[1], [0], [0], [1], [0, 0, 1, 1], [], []>} : vector<16x2xf32>, vector<2x32xf32>, vector<16x32xf32> -> vector<16x32xf32>
    %530 = arith.addf %511, %529 : vector<16x32xf32>
    %cst_113 = arith.constant 0.000000e+00 : f32
    %531 = vector.broadcast %cst_113 : f32 to vector<16x32xf32>
    %532 = arith.maximumf %530, %531 : vector<16x32xf32>
    %cst_114 = arith.constant dense<0.000000e+00> : vector<16x1xf32>
    %533 = tpu.matmul %532, %514, %cst_114 {dimension_numbers = #tpu.dot_dimension_numbers<[1], [0], [0], [1], [0, 0, 1, 1], [], []>} : vector<16x32xf32>, vector<32x1xf32>, vector<16x1xf32> -> vector<16x1xf32>
    %cst_115 = arith.constant dense<0xFF800000> : vector<1xf32>
    %534 = vector.multi_reduction <maximumf>, %533, %cst_115 [0] : vector<16x1xf32> to vector<1xf32>
    %535 = vector.shape_cast %534 : vector<1xf32> to vector<1x1xf32>
    %536 = vector.broadcast %535 : vector<1x1xf32> to vector<16x1xf32>
    %537 = arith.subf %533, %536 : vector<16x1xf32>
    %538 = math.exp %537 : vector<16x1xf32>
    %539 = vector.broadcast %538 : vector<16x1xf32> to vector<16x33xf32>
    %540 = arith.mulf %539, %513 : vector<16x33xf32>
    %cst_116 = arith.constant dense<0.000000e+00> : vector<2x33xf32>
    %541 = tpu.matmul %521, %540, %cst_116 {dimension_numbers = #tpu.dot_dimension_numbers<[1], [0], [0], [1], [0, 0, 1, 1], [], []>} : vector<2x16xf32>, vector<16x33xf32>, vector<2x33xf32> -> vector<2x33xf32>
    %542 = vector.extract_strided_slice %541 {offsets = [0, 0], sizes = [2, 32], strides = [1, 1]} : vector<2x33xf32> to vector<2x32xf32>
    %543 = vector.extract_strided_slice %541 {offsets = [0, 32], sizes = [2, 1], strides = [1, 1]} : vector<2x33xf32> to vector<2x1xf32>
    %544 = tpu.reciprocal %543 {approx = true} : vector<2x1xf32> -> vector<2x1xf32>
    %545 = vector.broadcast %544 : vector<2x1xf32> to vector<2x32xf32>
    %546 = arith.mulf %542, %545 : vector<2x32xf32>
    %547 = tpu.concatenate %523, %546 in 1 : vector<2x16xf32>, vector<2x32xf32> -> vector<2x48xf32>
    %cst_117 = arith.constant dense<0.000000e+00> : vector<2x96xf32>
    %548 = tpu.matmul %547, %517, %cst_117 {dimension_numbers = #tpu.dot_dimension_numbers<[1], [0], [0], [1], [0, 0, 1, 1], [], []>} : vector<2x48xf32>, vector<48x96xf32>, vector<2x96xf32> -> vector<2x96xf32>
    %549 = vector.broadcast %518 : vector<1x96xf32> to vector<2x96xf32>
    %550 = arith.addf %548, %549 : vector<2x96xf32>
    %551 = vector.extract_strided_slice %550 {offsets = [0, 0], sizes = [2, 32], strides = [1, 1]} : vector<2x96xf32> to vector<2x32xf32>
    %552 = vector.extract_strided_slice %528 {offsets = [0, 0], sizes = [2, 32], strides = [1, 1]} : vector<2x96xf32> to vector<2x32xf32>
    %553 = arith.addf %551, %552 : vector<2x32xf32>
    %554 = arith.negf %553 : vector<2x32xf32>
    %555 = math.exp %554 : vector<2x32xf32>
    %cst_118 = arith.constant 1.000000e+00 : f32
    %556 = vector.broadcast %cst_118 : f32 to vector<2x32xf32>
    %557 = arith.addf %556, %555 : vector<2x32xf32>
    %558 = arith.divf %556, %557 : vector<2x32xf32>
    %559 = vector.extract_strided_slice %550 {offsets = [0, 32], sizes = [2, 32], strides = [1, 1]} : vector<2x96xf32> to vector<2x32xf32>
    %560 = vector.extract_strided_slice %528 {offsets = [0, 32], sizes = [2, 32], strides = [1, 1]} : vector<2x96xf32> to vector<2x32xf32>
    %561 = arith.addf %559, %560 : vector<2x32xf32>
    %562 = arith.negf %561 : vector<2x32xf32>
    %563 = math.exp %562 : vector<2x32xf32>
    %cst_119 = arith.constant 1.000000e+00 : f32
    %564 = vector.broadcast %cst_119 : f32 to vector<2x32xf32>
    %565 = arith.addf %564, %563 : vector<2x32xf32>
    %566 = arith.divf %564, %565 : vector<2x32xf32>
    %567 = vector.extract_strided_slice %550 {offsets = [0, 64], sizes = [2, 32], strides = [1, 1]} : vector<2x96xf32> to vector<2x32xf32>
    %568 = vector.extract_strided_slice %528 {offsets = [0, 64], sizes = [2, 32], strides = [1, 1]} : vector<2x96xf32> to vector<2x32xf32>
    %569 = arith.mulf %558, %568 : vector<2x32xf32>
    %570 = arith.addf %567, %569 : vector<2x32xf32>
    %571 = math.tanh %570 : vector<2x32xf32>
    %cst_120 = arith.constant 1.000000e+00 : f32
    %572 = vector.broadcast %cst_120 : f32 to vector<2x32xf32>
    %573 = arith.subf %572, %566 : vector<2x32xf32>
    %574 = arith.mulf %573, %571 : vector<2x32xf32>
    %575 = arith.mulf %566, %469 : vector<2x32xf32>
    %576 = arith.addf %574, %575 : vector<2x32xf32>
    %577 = tpu.concatenate %576, %546 in 1 : vector<2x32xf32>, vector<2x32xf32> -> vector<2x64xf32>
    %cst_121 = arith.constant dense<0.000000e+00> : vector<2x16xf32>
    %578 = tpu.matmul %577, %519, %cst_121 {dimension_numbers = #tpu.dot_dimension_numbers<[1], [0], [0], [1], [0, 0, 1, 1], [], []>} : vector<2x64xf32>, vector<64x16xf32>, vector<2x16xf32> -> vector<2x16xf32>
    %579 = vector.broadcast %520 : vector<1x16xf32> to vector<2x16xf32>
    %580 = arith.addf %578, %579 : vector<2x16xf32>
    %cst_122 = arith.constant dense<0.000000e+00> : vector<2x128xf32>
    %581 = tpu.matmul %576, %515, %cst_122 {dimension_numbers = #tpu.dot_dimension_numbers<[1], [0], [0], [1], [0, 0, 1, 1], [], []>} : vector<2x32xf32>, vector<32x128xf32>, vector<2x128xf32> -> vector<2x128xf32>
    %582 = vector.broadcast %516 : vector<1x128xf32> to vector<2x128xf32>
    %583 = arith.addf %581, %582 : vector<2x128xf32>
    %584 = vector.extract_strided_slice %583 {offsets = [0, 0], sizes = [2, 32], strides = [1, 1]} : vector<2x128xf32> to vector<2x32xf32>
    %585 = vector.extract_strided_slice %583 {offsets = [0, 32], sizes = [2, 96], strides = [1, 1]} : vector<2x128xf32> to vector<2x96xf32>
    %cst_123 = arith.constant dense<0.000000e+00> : vector<16x32xf32>
    %586 = tpu.matmul %522, %584, %cst_123 {dimension_numbers = #tpu.dot_dimension_numbers<[1], [0], [0], [1], [0, 0, 1, 1], [], []>} : vector<16x2xf32>, vector<2x32xf32>, vector<16x32xf32> -> vector<16x32xf32>
    %587 = arith.addf %511, %586 : vector<16x32xf32>
    %cst_124 = arith.constant 0.000000e+00 : f32
    %588 = vector.broadcast %cst_124 : f32 to vector<16x32xf32>
    %589 = arith.maximumf %587, %588 : vector<16x32xf32>
    %cst_125 = arith.constant dense<0.000000e+00> : vector<16x1xf32>
    %590 = tpu.matmul %589, %514, %cst_125 {dimension_numbers = #tpu.dot_dimension_numbers<[1], [0], [0], [1], [0, 0, 1, 1], [], []>} : vector<16x32xf32>, vector<32x1xf32>, vector<16x1xf32> -> vector<16x1xf32>
    %cst_126 = arith.constant dense<0xFF800000> : vector<1xf32>
    %591 = vector.multi_reduction <maximumf>, %590, %cst_126 [0] : vector<16x1xf32> to vector<1xf32>
    %592 = vector.shape_cast %591 : vector<1xf32> to vector<1x1xf32>
    %593 = vector.broadcast %592 : vector<1x1xf32> to vector<16x1xf32>
    %594 = arith.subf %590, %593 : vector<16x1xf32>
    %595 = math.exp %594 : vector<16x1xf32>
    %596 = vector.broadcast %595 : vector<16x1xf32> to vector<16x33xf32>
    %597 = arith.mulf %596, %513 : vector<16x33xf32>
    %cst_127 = arith.constant dense<0.000000e+00> : vector<2x33xf32>
    %598 = tpu.matmul %521, %597, %cst_127 {dimension_numbers = #tpu.dot_dimension_numbers<[1], [0], [0], [1], [0, 0, 1, 1], [], []>} : vector<2x16xf32>, vector<16x33xf32>, vector<2x33xf32> -> vector<2x33xf32>
    %599 = vector.extract_strided_slice %598 {offsets = [0, 0], sizes = [2, 32], strides = [1, 1]} : vector<2x33xf32> to vector<2x32xf32>
    %600 = vector.extract_strided_slice %598 {offsets = [0, 32], sizes = [2, 1], strides = [1, 1]} : vector<2x33xf32> to vector<2x1xf32>
    %601 = tpu.reciprocal %600 {approx = true} : vector<2x1xf32> -> vector<2x1xf32>
    %602 = vector.broadcast %601 : vector<2x1xf32> to vector<2x32xf32>
    %603 = arith.mulf %599, %602 : vector<2x32xf32>
    %604 = tpu.concatenate %580, %603 in 1 : vector<2x16xf32>, vector<2x32xf32> -> vector<2x48xf32>
    %cst_128 = arith.constant dense<0.000000e+00> : vector<2x96xf32>
    %605 = tpu.matmul %604, %517, %cst_128 {dimension_numbers = #tpu.dot_dimension_numbers<[1], [0], [0], [1], [0, 0, 1, 1], [], []>} : vector<2x48xf32>, vector<48x96xf32>, vector<2x96xf32> -> vector<2x96xf32>
    %606 = vector.broadcast %518 : vector<1x96xf32> to vector<2x96xf32>
    %607 = arith.addf %605, %606 : vector<2x96xf32>
    %608 = vector.extract_strided_slice %607 {offsets = [0, 0], sizes = [2, 32], strides = [1, 1]} : vector<2x96xf32> to vector<2x32xf32>
    %609 = vector.extract_strided_slice %585 {offsets = [0, 0], sizes = [2, 32], strides = [1, 1]} : vector<2x96xf32> to vector<2x32xf32>
    %610 = arith.addf %608, %609 : vector<2x32xf32>
    %611 = arith.negf %610 : vector<2x32xf32>
    %612 = math.exp %611 : vector<2x32xf32>
    %cst_129 = arith.constant 1.000000e+00 : f32
    %613 = vector.broadcast %cst_129 : f32 to vector<2x32xf32>
    %614 = arith.addf %613, %612 : vector<2x32xf32>
    %615 = arith.divf %613, %614 : vector<2x32xf32>
    %616 = vector.extract_strided_slice %607 {offsets = [0, 32], sizes = [2, 32], strides = [1, 1]} : vector<2x96xf32> to vector<2x32xf32>
    %617 = vector.extract_strided_slice %585 {offsets = [0, 32], sizes = [2, 32], strides = [1, 1]} : vector<2x96xf32> to vector<2x32xf32>
    %618 = arith.addf %616, %617 : vector<2x32xf32>
    %619 = arith.negf %618 : vector<2x32xf32>
    %620 = math.exp %619 : vector<2x32xf32>
    %cst_130 = arith.constant 1.000000e+00 : f32
    %621 = vector.broadcast %cst_130 : f32 to vector<2x32xf32>
    %622 = arith.addf %621, %620 : vector<2x32xf32>
    %623 = arith.divf %621, %622 : vector<2x32xf32>
    %624 = vector.extract_strided_slice %607 {offsets = [0, 64], sizes = [2, 32], strides = [1, 1]} : vector<2x96xf32> to vector<2x32xf32>
    %625 = vector.extract_strided_slice %585 {offsets = [0, 64], sizes = [2, 32], strides = [1, 1]} : vector<2x96xf32> to vector<2x32xf32>
    %626 = arith.mulf %615, %625 : vector<2x32xf32>
    %627 = arith.addf %624, %626 : vector<2x32xf32>
    %628 = math.tanh %627 : vector<2x32xf32>
    %cst_131 = arith.constant 1.000000e+00 : f32
    %629 = vector.broadcast %cst_131 : f32 to vector<2x32xf32>
    %630 = arith.subf %629, %623 : vector<2x32xf32>
    %631 = arith.mulf %630, %628 : vector<2x32xf32>
    %632 = arith.mulf %623, %576 : vector<2x32xf32>
    %633 = arith.addf %631, %632 : vector<2x32xf32>
    %634 = tpu.concatenate %633, %603 in 1 : vector<2x32xf32>, vector<2x32xf32> -> vector<2x64xf32>
    %cst_132 = arith.constant dense<0.000000e+00> : vector<2x16xf32>
    %635 = tpu.matmul %634, %519, %cst_132 {dimension_numbers = #tpu.dot_dimension_numbers<[1], [0], [0], [1], [0, 0, 1, 1], [], []>} : vector<2x64xf32>, vector<64x16xf32>, vector<2x16xf32> -> vector<2x16xf32>
    %636 = vector.broadcast %520 : vector<1x16xf32> to vector<2x16xf32>
    %637 = arith.addf %635, %636 : vector<2x16xf32>
    %cst_133 = arith.constant dense<0.000000e+00> : vector<2x128xf32>
    %638 = tpu.matmul %633, %515, %cst_133 {dimension_numbers = #tpu.dot_dimension_numbers<[1], [0], [0], [1], [0, 0, 1, 1], [], []>} : vector<2x32xf32>, vector<32x128xf32>, vector<2x128xf32> -> vector<2x128xf32>
    %639 = vector.broadcast %516 : vector<1x128xf32> to vector<2x128xf32>
    %640 = arith.addf %638, %639 : vector<2x128xf32>
    %641 = vector.extract_strided_slice %640 {offsets = [0, 0], sizes = [2, 32], strides = [1, 1]} : vector<2x128xf32> to vector<2x32xf32>
    %642 = vector.extract_strided_slice %640 {offsets = [0, 32], sizes = [2, 96], strides = [1, 1]} : vector<2x128xf32> to vector<2x96xf32>
    %cst_134 = arith.constant dense<0.000000e+00> : vector<16x32xf32>
    %643 = tpu.matmul %522, %641, %cst_134 {dimension_numbers = #tpu.dot_dimension_numbers<[1], [0], [0], [1], [0, 0, 1, 1], [], []>} : vector<16x2xf32>, vector<2x32xf32>, vector<16x32xf32> -> vector<16x32xf32>
    %644 = arith.addf %511, %643 : vector<16x32xf32>
    %cst_135 = arith.constant 0.000000e+00 : f32
    %645 = vector.broadcast %cst_135 : f32 to vector<16x32xf32>
    %646 = arith.maximumf %644, %645 : vector<16x32xf32>
    %cst_136 = arith.constant dense<0.000000e+00> : vector<16x1xf32>
    %647 = tpu.matmul %646, %514, %cst_136 {dimension_numbers = #tpu.dot_dimension_numbers<[1], [0], [0], [1], [0, 0, 1, 1], [], []>} : vector<16x32xf32>, vector<32x1xf32>, vector<16x1xf32> -> vector<16x1xf32>
    %cst_137 = arith.constant dense<0xFF800000> : vector<1xf32>
    %648 = vector.multi_reduction <maximumf>, %647, %cst_137 [0] : vector<16x1xf32> to vector<1xf32>
    %649 = vector.shape_cast %648 : vector<1xf32> to vector<1x1xf32>
    %650 = vector.broadcast %649 : vector<1x1xf32> to vector<16x1xf32>
    %651 = arith.subf %647, %650 : vector<16x1xf32>
    %652 = math.exp %651 : vector<16x1xf32>
    %653 = vector.broadcast %652 : vector<16x1xf32> to vector<16x33xf32>
    %654 = arith.mulf %653, %513 : vector<16x33xf32>
    %cst_138 = arith.constant dense<0.000000e+00> : vector<2x33xf32>
    %655 = tpu.matmul %521, %654, %cst_138 {dimension_numbers = #tpu.dot_dimension_numbers<[1], [0], [0], [1], [0, 0, 1, 1], [], []>} : vector<2x16xf32>, vector<16x33xf32>, vector<2x33xf32> -> vector<2x33xf32>
    %656 = vector.extract_strided_slice %655 {offsets = [0, 0], sizes = [2, 32], strides = [1, 1]} : vector<2x33xf32> to vector<2x32xf32>
    %657 = vector.extract_strided_slice %655 {offsets = [0, 32], sizes = [2, 1], strides = [1, 1]} : vector<2x33xf32> to vector<2x1xf32>
    %658 = tpu.reciprocal %657 {approx = true} : vector<2x1xf32> -> vector<2x1xf32>
    %659 = vector.broadcast %658 : vector<2x1xf32> to vector<2x32xf32>
    %660 = arith.mulf %656, %659 : vector<2x32xf32>
    %661 = tpu.concatenate %637, %660 in 1 : vector<2x16xf32>, vector<2x32xf32> -> vector<2x48xf32>
    %cst_139 = arith.constant dense<0.000000e+00> : vector<2x96xf32>
    %662 = tpu.matmul %661, %517, %cst_139 {dimension_numbers = #tpu.dot_dimension_numbers<[1], [0], [0], [1], [0, 0, 1, 1], [], []>} : vector<2x48xf32>, vector<48x96xf32>, vector<2x96xf32> -> vector<2x96xf32>
    %663 = vector.broadcast %518 : vector<1x96xf32> to vector<2x96xf32>
    %664 = arith.addf %662, %663 : vector<2x96xf32>
    %665 = vector.extract_strided_slice %664 {offsets = [0, 0], sizes = [2, 32], strides = [1, 1]} : vector<2x96xf32> to vector<2x32xf32>
    %666 = vector.extract_strided_slice %642 {offsets = [0, 0], sizes = [2, 32], strides = [1, 1]} : vector<2x96xf32> to vector<2x32xf32>
    %667 = arith.addf %665, %666 : vector<2x32xf32>
    %668 = arith.negf %667 : vector<2x32xf32>
    %669 = math.exp %668 : vector<2x32xf32>
    %cst_140 = arith.constant 1.000000e+00 : f32
    %670 = vector.broadcast %cst_140 : f32 to vector<2x32xf32>
    %671 = arith.addf %670, %669 : vector<2x32xf32>
    %672 = arith.divf %670, %671 : vector<2x32xf32>
    %673 = vector.extract_strided_slice %664 {offsets = [0, 32], sizes = [2, 32], strides = [1, 1]} : vector<2x96xf32> to vector<2x32xf32>
    %674 = vector.extract_strided_slice %642 {offsets = [0, 32], sizes = [2, 32], strides = [1, 1]} : vector<2x96xf32> to vector<2x32xf32>
    %675 = arith.addf %673, %674 : vector<2x32xf32>
    %676 = arith.negf %675 : vector<2x32xf32>
    %677 = math.exp %676 : vector<2x32xf32>
    %cst_141 = arith.constant 1.000000e+00 : f32
    %678 = vector.broadcast %cst_141 : f32 to vector<2x32xf32>
    %679 = arith.addf %678, %677 : vector<2x32xf32>
    %680 = arith.divf %678, %679 : vector<2x32xf32>
    %681 = vector.extract_strided_slice %664 {offsets = [0, 64], sizes = [2, 32], strides = [1, 1]} : vector<2x96xf32> to vector<2x32xf32>
    %682 = vector.extract_strided_slice %642 {offsets = [0, 64], sizes = [2, 32], strides = [1, 1]} : vector<2x96xf32> to vector<2x32xf32>
    %683 = arith.mulf %672, %682 : vector<2x32xf32>
    %684 = arith.addf %681, %683 : vector<2x32xf32>
    %685 = math.tanh %684 : vector<2x32xf32>
    %cst_142 = arith.constant 1.000000e+00 : f32
    %686 = vector.broadcast %cst_142 : f32 to vector<2x32xf32>
    %687 = arith.subf %686, %680 : vector<2x32xf32>
    %688 = arith.mulf %687, %685 : vector<2x32xf32>
    %689 = arith.mulf %680, %633 : vector<2x32xf32>
    %690 = arith.addf %688, %689 : vector<2x32xf32>
    %691 = tpu.concatenate %690, %660 in 1 : vector<2x32xf32>, vector<2x32xf32> -> vector<2x64xf32>
    %cst_143 = arith.constant dense<0.000000e+00> : vector<2x16xf32>
    %692 = tpu.matmul %691, %519, %cst_143 {dimension_numbers = #tpu.dot_dimension_numbers<[1], [0], [0], [1], [0, 0, 1, 1], [], []>} : vector<2x64xf32>, vector<64x16xf32>, vector<2x16xf32> -> vector<2x16xf32>
    %693 = vector.broadcast %520 : vector<1x16xf32> to vector<2x16xf32>
    %694 = arith.addf %692, %693 : vector<2x16xf32>
    %cst_144 = arith.constant dense<0.000000e+00> : vector<2x128xf32>
    %695 = tpu.matmul %690, %515, %cst_144 {dimension_numbers = #tpu.dot_dimension_numbers<[1], [0], [0], [1], [0, 0, 1, 1], [], []>} : vector<2x32xf32>, vector<32x128xf32>, vector<2x128xf32> -> vector<2x128xf32>
    %696 = vector.broadcast %516 : vector<1x128xf32> to vector<2x128xf32>
    %697 = arith.addf %695, %696 : vector<2x128xf32>
    %698 = vector.extract_strided_slice %697 {offsets = [0, 0], sizes = [2, 32], strides = [1, 1]} : vector<2x128xf32> to vector<2x32xf32>
    %699 = vector.extract_strided_slice %697 {offsets = [0, 32], sizes = [2, 96], strides = [1, 1]} : vector<2x128xf32> to vector<2x96xf32>
    %cst_145 = arith.constant dense<0.000000e+00> : vector<16x32xf32>
    %700 = tpu.matmul %522, %698, %cst_145 {dimension_numbers = #tpu.dot_dimension_numbers<[1], [0], [0], [1], [0, 0, 1, 1], [], []>} : vector<16x2xf32>, vector<2x32xf32>, vector<16x32xf32> -> vector<16x32xf32>
    %701 = arith.addf %511, %700 : vector<16x32xf32>
    %cst_146 = arith.constant 0.000000e+00 : f32
    %702 = vector.broadcast %cst_146 : f32 to vector<16x32xf32>
    %703 = arith.maximumf %701, %702 : vector<16x32xf32>
    %cst_147 = arith.constant dense<0.000000e+00> : vector<16x1xf32>
    %704 = tpu.matmul %703, %514, %cst_147 {dimension_numbers = #tpu.dot_dimension_numbers<[1], [0], [0], [1], [0, 0, 1, 1], [], []>} : vector<16x32xf32>, vector<32x1xf32>, vector<16x1xf32> -> vector<16x1xf32>
    %cst_148 = arith.constant dense<0xFF800000> : vector<1xf32>
    %705 = vector.multi_reduction <maximumf>, %704, %cst_148 [0] : vector<16x1xf32> to vector<1xf32>
    %706 = vector.shape_cast %705 : vector<1xf32> to vector<1x1xf32>
    %707 = vector.broadcast %706 : vector<1x1xf32> to vector<16x1xf32>
    %708 = arith.subf %704, %707 : vector<16x1xf32>
    %709 = math.exp %708 : vector<16x1xf32>
    %710 = vector.broadcast %709 : vector<16x1xf32> to vector<16x33xf32>
    %711 = arith.mulf %710, %513 : vector<16x33xf32>
    %cst_149 = arith.constant dense<0.000000e+00> : vector<2x33xf32>
    %712 = tpu.matmul %521, %711, %cst_149 {dimension_numbers = #tpu.dot_dimension_numbers<[1], [0], [0], [1], [0, 0, 1, 1], [], []>} : vector<2x16xf32>, vector<16x33xf32>, vector<2x33xf32> -> vector<2x33xf32>
    %713 = vector.extract_strided_slice %712 {offsets = [0, 0], sizes = [2, 32], strides = [1, 1]} : vector<2x33xf32> to vector<2x32xf32>
    %714 = vector.extract_strided_slice %712 {offsets = [0, 32], sizes = [2, 1], strides = [1, 1]} : vector<2x33xf32> to vector<2x1xf32>
    %715 = tpu.reciprocal %714 {approx = true} : vector<2x1xf32> -> vector<2x1xf32>
    %716 = vector.broadcast %715 : vector<2x1xf32> to vector<2x32xf32>
    %717 = arith.mulf %713, %716 : vector<2x32xf32>
    %718 = tpu.concatenate %694, %717 in 1 : vector<2x16xf32>, vector<2x32xf32> -> vector<2x48xf32>
    %cst_150 = arith.constant dense<0.000000e+00> : vector<2x96xf32>
    %719 = tpu.matmul %718, %517, %cst_150 {dimension_numbers = #tpu.dot_dimension_numbers<[1], [0], [0], [1], [0, 0, 1, 1], [], []>} : vector<2x48xf32>, vector<48x96xf32>, vector<2x96xf32> -> vector<2x96xf32>
    %720 = vector.broadcast %518 : vector<1x96xf32> to vector<2x96xf32>
    %721 = arith.addf %719, %720 : vector<2x96xf32>
    %722 = vector.extract_strided_slice %721 {offsets = [0, 0], sizes = [2, 32], strides = [1, 1]} : vector<2x96xf32> to vector<2x32xf32>
    %723 = vector.extract_strided_slice %699 {offsets = [0, 0], sizes = [2, 32], strides = [1, 1]} : vector<2x96xf32> to vector<2x32xf32>
    %724 = arith.addf %722, %723 : vector<2x32xf32>
    %725 = arith.negf %724 : vector<2x32xf32>
    %726 = math.exp %725 : vector<2x32xf32>
    %cst_151 = arith.constant 1.000000e+00 : f32
    %727 = vector.broadcast %cst_151 : f32 to vector<2x32xf32>
    %728 = arith.addf %727, %726 : vector<2x32xf32>
    %729 = arith.divf %727, %728 : vector<2x32xf32>
    %730 = vector.extract_strided_slice %721 {offsets = [0, 32], sizes = [2, 32], strides = [1, 1]} : vector<2x96xf32> to vector<2x32xf32>
    %731 = vector.extract_strided_slice %699 {offsets = [0, 32], sizes = [2, 32], strides = [1, 1]} : vector<2x96xf32> to vector<2x32xf32>
    %732 = arith.addf %730, %731 : vector<2x32xf32>
    %733 = arith.negf %732 : vector<2x32xf32>
    %734 = math.exp %733 : vector<2x32xf32>
    %cst_152 = arith.constant 1.000000e+00 : f32
    %735 = vector.broadcast %cst_152 : f32 to vector<2x32xf32>
    %736 = arith.addf %735, %734 : vector<2x32xf32>
    %737 = arith.divf %735, %736 : vector<2x32xf32>
    %738 = vector.extract_strided_slice %721 {offsets = [0, 64], sizes = [2, 32], strides = [1, 1]} : vector<2x96xf32> to vector<2x32xf32>
    %739 = vector.extract_strided_slice %699 {offsets = [0, 64], sizes = [2, 32], strides = [1, 1]} : vector<2x96xf32> to vector<2x32xf32>
    %740 = arith.mulf %729, %739 : vector<2x32xf32>
    %741 = arith.addf %738, %740 : vector<2x32xf32>
    %742 = math.tanh %741 : vector<2x32xf32>
    %cst_153 = arith.constant 1.000000e+00 : f32
    %743 = vector.broadcast %cst_153 : f32 to vector<2x32xf32>
    %744 = arith.subf %743, %737 : vector<2x32xf32>
    %745 = arith.mulf %744, %742 : vector<2x32xf32>
    %746 = arith.mulf %737, %690 : vector<2x32xf32>
    %747 = arith.addf %745, %746 : vector<2x32xf32>
    %748 = tpu.concatenate %747, %717 in 1 : vector<2x32xf32>, vector<2x32xf32> -> vector<2x64xf32>
    %cst_154 = arith.constant dense<0.000000e+00> : vector<2x16xf32>
    %749 = tpu.matmul %748, %519, %cst_154 {dimension_numbers = #tpu.dot_dimension_numbers<[1], [0], [0], [1], [0, 0, 1, 1], [], []>} : vector<2x64xf32>, vector<64x16xf32>, vector<2x16xf32> -> vector<2x16xf32>
    %750 = vector.broadcast %520 : vector<1x16xf32> to vector<2x16xf32>
    %751 = arith.addf %749, %750 : vector<2x16xf32>
    %cst_155 = arith.constant dense<0.000000e+00> : vector<2x128xf32>
    %752 = tpu.matmul %747, %515, %cst_155 {dimension_numbers = #tpu.dot_dimension_numbers<[1], [0], [0], [1], [0, 0, 1, 1], [], []>} : vector<2x32xf32>, vector<32x128xf32>, vector<2x128xf32> -> vector<2x128xf32>
    %753 = vector.broadcast %516 : vector<1x128xf32> to vector<2x128xf32>
    %754 = arith.addf %752, %753 : vector<2x128xf32>
    %755 = vector.extract_strided_slice %754 {offsets = [0, 0], sizes = [2, 32], strides = [1, 1]} : vector<2x128xf32> to vector<2x32xf32>
    %756 = vector.extract_strided_slice %754 {offsets = [0, 32], sizes = [2, 96], strides = [1, 1]} : vector<2x128xf32> to vector<2x96xf32>
    %cst_156 = arith.constant dense<0.000000e+00> : vector<16x32xf32>
    %757 = tpu.matmul %522, %755, %cst_156 {dimension_numbers = #tpu.dot_dimension_numbers<[1], [0], [0], [1], [0, 0, 1, 1], [], []>} : vector<16x2xf32>, vector<2x32xf32>, vector<16x32xf32> -> vector<16x32xf32>
    %758 = arith.addf %511, %757 : vector<16x32xf32>
    %cst_157 = arith.constant 0.000000e+00 : f32
    %759 = vector.broadcast %cst_157 : f32 to vector<16x32xf32>
    %760 = arith.maximumf %758, %759 : vector<16x32xf32>
    %cst_158 = arith.constant dense<0.000000e+00> : vector<16x1xf32>
    %761 = tpu.matmul %760, %514, %cst_158 {dimension_numbers = #tpu.dot_dimension_numbers<[1], [0], [0], [1], [0, 0, 1, 1], [], []>} : vector<16x32xf32>, vector<32x1xf32>, vector<16x1xf32> -> vector<16x1xf32>
    %cst_159 = arith.constant dense<0xFF800000> : vector<1xf32>
    %762 = vector.multi_reduction <maximumf>, %761, %cst_159 [0] : vector<16x1xf32> to vector<1xf32>
    %763 = vector.shape_cast %762 : vector<1xf32> to vector<1x1xf32>
    %764 = vector.broadcast %763 : vector<1x1xf32> to vector<16x1xf32>
    %765 = arith.subf %761, %764 : vector<16x1xf32>
    %766 = math.exp %765 : vector<16x1xf32>
    %767 = vector.broadcast %766 : vector<16x1xf32> to vector<16x33xf32>
    %768 = arith.mulf %767, %513 : vector<16x33xf32>
    %cst_160 = arith.constant dense<0.000000e+00> : vector<2x33xf32>
    %769 = tpu.matmul %521, %768, %cst_160 {dimension_numbers = #tpu.dot_dimension_numbers<[1], [0], [0], [1], [0, 0, 1, 1], [], []>} : vector<2x16xf32>, vector<16x33xf32>, vector<2x33xf32> -> vector<2x33xf32>
    %770 = vector.extract_strided_slice %769 {offsets = [0, 0], sizes = [2, 32], strides = [1, 1]} : vector<2x33xf32> to vector<2x32xf32>
    %771 = vector.extract_strided_slice %769 {offsets = [0, 32], sizes = [2, 1], strides = [1, 1]} : vector<2x33xf32> to vector<2x1xf32>
    %772 = tpu.reciprocal %771 {approx = true} : vector<2x1xf32> -> vector<2x1xf32>
    %773 = vector.broadcast %772 : vector<2x1xf32> to vector<2x32xf32>
    %774 = arith.mulf %770, %773 : vector<2x32xf32>
    %775 = tpu.concatenate %751, %774 in 1 : vector<2x16xf32>, vector<2x32xf32> -> vector<2x48xf32>
    %cst_161 = arith.constant dense<0.000000e+00> : vector<2x96xf32>
    %776 = tpu.matmul %775, %517, %cst_161 {dimension_numbers = #tpu.dot_dimension_numbers<[1], [0], [0], [1], [0, 0, 1, 1], [], []>} : vector<2x48xf32>, vector<48x96xf32>, vector<2x96xf32> -> vector<2x96xf32>
    %777 = vector.broadcast %518 : vector<1x96xf32> to vector<2x96xf32>
    %778 = arith.addf %776, %777 : vector<2x96xf32>
    %779 = vector.extract_strided_slice %778 {offsets = [0, 0], sizes = [2, 32], strides = [1, 1]} : vector<2x96xf32> to vector<2x32xf32>
    %780 = vector.extract_strided_slice %756 {offsets = [0, 0], sizes = [2, 32], strides = [1, 1]} : vector<2x96xf32> to vector<2x32xf32>
    %781 = arith.addf %779, %780 : vector<2x32xf32>
    %782 = arith.negf %781 : vector<2x32xf32>
    %783 = math.exp %782 : vector<2x32xf32>
    %cst_162 = arith.constant 1.000000e+00 : f32
    %784 = vector.broadcast %cst_162 : f32 to vector<2x32xf32>
    %785 = arith.addf %784, %783 : vector<2x32xf32>
    %786 = arith.divf %784, %785 : vector<2x32xf32>
    %787 = vector.extract_strided_slice %778 {offsets = [0, 32], sizes = [2, 32], strides = [1, 1]} : vector<2x96xf32> to vector<2x32xf32>
    %788 = vector.extract_strided_slice %756 {offsets = [0, 32], sizes = [2, 32], strides = [1, 1]} : vector<2x96xf32> to vector<2x32xf32>
    %789 = arith.addf %787, %788 : vector<2x32xf32>
    %790 = arith.negf %789 : vector<2x32xf32>
    %791 = math.exp %790 : vector<2x32xf32>
    %cst_163 = arith.constant 1.000000e+00 : f32
    %792 = vector.broadcast %cst_163 : f32 to vector<2x32xf32>
    %793 = arith.addf %792, %791 : vector<2x32xf32>
    %794 = arith.divf %792, %793 : vector<2x32xf32>
    %795 = vector.extract_strided_slice %778 {offsets = [0, 64], sizes = [2, 32], strides = [1, 1]} : vector<2x96xf32> to vector<2x32xf32>
    %796 = vector.extract_strided_slice %756 {offsets = [0, 64], sizes = [2, 32], strides = [1, 1]} : vector<2x96xf32> to vector<2x32xf32>
    %797 = arith.mulf %786, %796 : vector<2x32xf32>
    %798 = arith.addf %795, %797 : vector<2x32xf32>
    %799 = math.tanh %798 : vector<2x32xf32>
    %cst_164 = arith.constant 1.000000e+00 : f32
    %800 = vector.broadcast %cst_164 : f32 to vector<2x32xf32>
    %801 = arith.subf %800, %794 : vector<2x32xf32>
    %802 = arith.mulf %801, %799 : vector<2x32xf32>
    %803 = arith.mulf %794, %747 : vector<2x32xf32>
    %804 = arith.addf %802, %803 : vector<2x32xf32>
    %805 = tpu.concatenate %804, %774 in 1 : vector<2x32xf32>, vector<2x32xf32> -> vector<2x64xf32>
    %cst_165 = arith.constant dense<0.000000e+00> : vector<2x16xf32>
    %806 = tpu.matmul %805, %519, %cst_165 {dimension_numbers = #tpu.dot_dimension_numbers<[1], [0], [0], [1], [0, 0, 1, 1], [], []>} : vector<2x64xf32>, vector<64x16xf32>, vector<2x16xf32> -> vector<2x16xf32>
    %807 = vector.broadcast %520 : vector<1x16xf32> to vector<2x16xf32>
    %808 = arith.addf %806, %807 : vector<2x16xf32>
    %cst_166 = arith.constant dense<0.000000e+00> : vector<2x128xf32>
    %809 = tpu.matmul %804, %515, %cst_166 {dimension_numbers = #tpu.dot_dimension_numbers<[1], [0], [0], [1], [0, 0, 1, 1], [], []>} : vector<2x32xf32>, vector<32x128xf32>, vector<2x128xf32> -> vector<2x128xf32>
    %810 = vector.broadcast %516 : vector<1x128xf32> to vector<2x128xf32>
    %811 = arith.addf %809, %810 : vector<2x128xf32>
    %812 = vector.extract_strided_slice %811 {offsets = [0, 0], sizes = [2, 32], strides = [1, 1]} : vector<2x128xf32> to vector<2x32xf32>
    %813 = vector.extract_strided_slice %811 {offsets = [0, 32], sizes = [2, 96], strides = [1, 1]} : vector<2x128xf32> to vector<2x96xf32>
    %cst_167 = arith.constant dense<0.000000e+00> : vector<16x32xf32>
    %814 = tpu.matmul %522, %812, %cst_167 {dimension_numbers = #tpu.dot_dimension_numbers<[1], [0], [0], [1], [0, 0, 1, 1], [], []>} : vector<16x2xf32>, vector<2x32xf32>, vector<16x32xf32> -> vector<16x32xf32>
    %815 = arith.addf %511, %814 : vector<16x32xf32>
    %cst_168 = arith.constant 0.000000e+00 : f32
    %816 = vector.broadcast %cst_168 : f32 to vector<16x32xf32>
    %817 = arith.maximumf %815, %816 : vector<16x32xf32>
    %cst_169 = arith.constant dense<0.000000e+00> : vector<16x1xf32>
    %818 = tpu.matmul %817, %514, %cst_169 {dimension_numbers = #tpu.dot_dimension_numbers<[1], [0], [0], [1], [0, 0, 1, 1], [], []>} : vector<16x32xf32>, vector<32x1xf32>, vector<16x1xf32> -> vector<16x1xf32>
    %cst_170 = arith.constant dense<0xFF800000> : vector<1xf32>
    %819 = vector.multi_reduction <maximumf>, %818, %cst_170 [0] : vector<16x1xf32> to vector<1xf32>
    %820 = vector.shape_cast %819 : vector<1xf32> to vector<1x1xf32>
    %821 = vector.broadcast %820 : vector<1x1xf32> to vector<16x1xf32>
    %822 = arith.subf %818, %821 : vector<16x1xf32>
    %823 = math.exp %822 : vector<16x1xf32>
    %824 = vector.broadcast %823 : vector<16x1xf32> to vector<16x33xf32>
    %825 = arith.mulf %824, %513 : vector<16x33xf32>
    %cst_171 = arith.constant dense<0.000000e+00> : vector<2x33xf32>
    %826 = tpu.matmul %521, %825, %cst_171 {dimension_numbers = #tpu.dot_dimension_numbers<[1], [0], [0], [1], [0, 0, 1, 1], [], []>} : vector<2x16xf32>, vector<16x33xf32>, vector<2x33xf32> -> vector<2x33xf32>
    %827 = vector.extract_strided_slice %826 {offsets = [0, 0], sizes = [2, 32], strides = [1, 1]} : vector<2x33xf32> to vector<2x32xf32>
    %828 = vector.extract_strided_slice %826 {offsets = [0, 32], sizes = [2, 1], strides = [1, 1]} : vector<2x33xf32> to vector<2x1xf32>
    %829 = tpu.reciprocal %828 {approx = true} : vector<2x1xf32> -> vector<2x1xf32>
    %830 = vector.broadcast %829 : vector<2x1xf32> to vector<2x32xf32>
    %831 = arith.mulf %827, %830 : vector<2x32xf32>
    %832 = tpu.concatenate %808, %831 in 1 : vector<2x16xf32>, vector<2x32xf32> -> vector<2x48xf32>
    %cst_172 = arith.constant dense<0.000000e+00> : vector<2x96xf32>
    %833 = tpu.matmul %832, %517, %cst_172 {dimension_numbers = #tpu.dot_dimension_numbers<[1], [0], [0], [1], [0, 0, 1, 1], [], []>} : vector<2x48xf32>, vector<48x96xf32>, vector<2x96xf32> -> vector<2x96xf32>
    %834 = vector.broadcast %518 : vector<1x96xf32> to vector<2x96xf32>
    %835 = arith.addf %833, %834 : vector<2x96xf32>
    %836 = vector.extract_strided_slice %835 {offsets = [0, 0], sizes = [2, 32], strides = [1, 1]} : vector<2x96xf32> to vector<2x32xf32>
    %837 = vector.extract_strided_slice %813 {offsets = [0, 0], sizes = [2, 32], strides = [1, 1]} : vector<2x96xf32> to vector<2x32xf32>
    %838 = arith.addf %836, %837 : vector<2x32xf32>
    %839 = arith.negf %838 : vector<2x32xf32>
    %840 = math.exp %839 : vector<2x32xf32>
    %cst_173 = arith.constant 1.000000e+00 : f32
    %841 = vector.broadcast %cst_173 : f32 to vector<2x32xf32>
    %842 = arith.addf %841, %840 : vector<2x32xf32>
    %843 = arith.divf %841, %842 : vector<2x32xf32>
    %844 = vector.extract_strided_slice %835 {offsets = [0, 32], sizes = [2, 32], strides = [1, 1]} : vector<2x96xf32> to vector<2x32xf32>
    %845 = vector.extract_strided_slice %813 {offsets = [0, 32], sizes = [2, 32], strides = [1, 1]} : vector<2x96xf32> to vector<2x32xf32>
    %846 = arith.addf %844, %845 : vector<2x32xf32>
    %847 = arith.negf %846 : vector<2x32xf32>
    %848 = math.exp %847 : vector<2x32xf32>
    %cst_174 = arith.constant 1.000000e+00 : f32
    %849 = vector.broadcast %cst_174 : f32 to vector<2x32xf32>
    %850 = arith.addf %849, %848 : vector<2x32xf32>
    %851 = arith.divf %849, %850 : vector<2x32xf32>
    %852 = vector.extract_strided_slice %835 {offsets = [0, 64], sizes = [2, 32], strides = [1, 1]} : vector<2x96xf32> to vector<2x32xf32>
    %853 = vector.extract_strided_slice %813 {offsets = [0, 64], sizes = [2, 32], strides = [1, 1]} : vector<2x96xf32> to vector<2x32xf32>
    %854 = arith.mulf %843, %853 : vector<2x32xf32>
    %855 = arith.addf %852, %854 : vector<2x32xf32>
    %856 = math.tanh %855 : vector<2x32xf32>
    %cst_175 = arith.constant 1.000000e+00 : f32
    %857 = vector.broadcast %cst_175 : f32 to vector<2x32xf32>
    %858 = arith.subf %857, %851 : vector<2x32xf32>
    %859 = arith.mulf %858, %856 : vector<2x32xf32>
    %860 = arith.mulf %851, %804 : vector<2x32xf32>
    %861 = arith.addf %859, %860 : vector<2x32xf32>
    %862 = tpu.concatenate %861, %831 in 1 : vector<2x32xf32>, vector<2x32xf32> -> vector<2x64xf32>
    %cst_176 = arith.constant dense<0.000000e+00> : vector<2x16xf32>
    %863 = tpu.matmul %862, %519, %cst_176 {dimension_numbers = #tpu.dot_dimension_numbers<[1], [0], [0], [1], [0, 0, 1, 1], [], []>} : vector<2x64xf32>, vector<64x16xf32>, vector<2x16xf32> -> vector<2x16xf32>
    %864 = vector.broadcast %520 : vector<1x16xf32> to vector<2x16xf32>
    %865 = arith.addf %863, %864 : vector<2x16xf32>
    %cst_177 = arith.constant dense<0.000000e+00> : vector<2x128xf32>
    %866 = tpu.matmul %861, %515, %cst_177 {dimension_numbers = #tpu.dot_dimension_numbers<[1], [0], [0], [1], [0, 0, 1, 1], [], []>} : vector<2x32xf32>, vector<32x128xf32>, vector<2x128xf32> -> vector<2x128xf32>
    %867 = vector.broadcast %516 : vector<1x128xf32> to vector<2x128xf32>
    %868 = arith.addf %866, %867 : vector<2x128xf32>
    %869 = vector.extract_strided_slice %868 {offsets = [0, 0], sizes = [2, 32], strides = [1, 1]} : vector<2x128xf32> to vector<2x32xf32>
    %870 = vector.extract_strided_slice %868 {offsets = [0, 32], sizes = [2, 96], strides = [1, 1]} : vector<2x128xf32> to vector<2x96xf32>
    %cst_178 = arith.constant dense<0.000000e+00> : vector<16x32xf32>
    %871 = tpu.matmul %522, %869, %cst_178 {dimension_numbers = #tpu.dot_dimension_numbers<[1], [0], [0], [1], [0, 0, 1, 1], [], []>} : vector<16x2xf32>, vector<2x32xf32>, vector<16x32xf32> -> vector<16x32xf32>
    %872 = arith.addf %511, %871 : vector<16x32xf32>
    %cst_179 = arith.constant 0.000000e+00 : f32
    %873 = vector.broadcast %cst_179 : f32 to vector<16x32xf32>
    %874 = arith.maximumf %872, %873 : vector<16x32xf32>
    %cst_180 = arith.constant dense<0.000000e+00> : vector<16x1xf32>
    %875 = tpu.matmul %874, %514, %cst_180 {dimension_numbers = #tpu.dot_dimension_numbers<[1], [0], [0], [1], [0, 0, 1, 1], [], []>} : vector<16x32xf32>, vector<32x1xf32>, vector<16x1xf32> -> vector<16x1xf32>
    %cst_181 = arith.constant dense<0xFF800000> : vector<1xf32>
    %876 = vector.multi_reduction <maximumf>, %875, %cst_181 [0] : vector<16x1xf32> to vector<1xf32>
    %877 = vector.shape_cast %876 : vector<1xf32> to vector<1x1xf32>
    %878 = vector.broadcast %877 : vector<1x1xf32> to vector<16x1xf32>
    %879 = arith.subf %875, %878 : vector<16x1xf32>
    %880 = math.exp %879 : vector<16x1xf32>
    %881 = vector.broadcast %880 : vector<16x1xf32> to vector<16x33xf32>
    %882 = arith.mulf %881, %513 : vector<16x33xf32>
    %cst_182 = arith.constant dense<0.000000e+00> : vector<2x33xf32>
    %883 = tpu.matmul %521, %882, %cst_182 {dimension_numbers = #tpu.dot_dimension_numbers<[1], [0], [0], [1], [0, 0, 1, 1], [], []>} : vector<2x16xf32>, vector<16x33xf32>, vector<2x33xf32> -> vector<2x33xf32>
    %884 = vector.extract_strided_slice %883 {offsets = [0, 0], sizes = [2, 32], strides = [1, 1]} : vector<2x33xf32> to vector<2x32xf32>
    %885 = vector.extract_strided_slice %883 {offsets = [0, 32], sizes = [2, 1], strides = [1, 1]} : vector<2x33xf32> to vector<2x1xf32>
    %886 = tpu.reciprocal %885 {approx = true} : vector<2x1xf32> -> vector<2x1xf32>
    %887 = vector.broadcast %886 : vector<2x1xf32> to vector<2x32xf32>
    %888 = arith.mulf %884, %887 : vector<2x32xf32>
    %889 = tpu.concatenate %865, %888 in 1 : vector<2x16xf32>, vector<2x32xf32> -> vector<2x48xf32>
    %cst_183 = arith.constant dense<0.000000e+00> : vector<2x96xf32>
    %890 = tpu.matmul %889, %517, %cst_183 {dimension_numbers = #tpu.dot_dimension_numbers<[1], [0], [0], [1], [0, 0, 1, 1], [], []>} : vector<2x48xf32>, vector<48x96xf32>, vector<2x96xf32> -> vector<2x96xf32>
    %891 = vector.broadcast %518 : vector<1x96xf32> to vector<2x96xf32>
    %892 = arith.addf %890, %891 : vector<2x96xf32>
    %893 = vector.extract_strided_slice %892 {offsets = [0, 0], sizes = [2, 32], strides = [1, 1]} : vector<2x96xf32> to vector<2x32xf32>
    %894 = vector.extract_strided_slice %870 {offsets = [0, 0], sizes = [2, 32], strides = [1, 1]} : vector<2x96xf32> to vector<2x32xf32>
    %895 = arith.addf %893, %894 : vector<2x32xf32>
    %896 = arith.negf %895 : vector<2x32xf32>
    %897 = math.exp %896 : vector<2x32xf32>
    %cst_184 = arith.constant 1.000000e+00 : f32
    %898 = vector.broadcast %cst_184 : f32 to vector<2x32xf32>
    %899 = arith.addf %898, %897 : vector<2x32xf32>
    %900 = arith.divf %898, %899 : vector<2x32xf32>
    %901 = vector.extract_strided_slice %892 {offsets = [0, 32], sizes = [2, 32], strides = [1, 1]} : vector<2x96xf32> to vector<2x32xf32>
    %902 = vector.extract_strided_slice %870 {offsets = [0, 32], sizes = [2, 32], strides = [1, 1]} : vector<2x96xf32> to vector<2x32xf32>
    %903 = arith.addf %901, %902 : vector<2x32xf32>
    %904 = arith.negf %903 : vector<2x32xf32>
    %905 = math.exp %904 : vector<2x32xf32>
    %cst_185 = arith.constant 1.000000e+00 : f32
    %906 = vector.broadcast %cst_185 : f32 to vector<2x32xf32>
    %907 = arith.addf %906, %905 : vector<2x32xf32>
    %908 = arith.divf %906, %907 : vector<2x32xf32>
    %909 = vector.extract_strided_slice %892 {offsets = [0, 64], sizes = [2, 32], strides = [1, 1]} : vector<2x96xf32> to vector<2x32xf32>
    %910 = vector.extract_strided_slice %870 {offsets = [0, 64], sizes = [2, 32], strides = [1, 1]} : vector<2x96xf32> to vector<2x32xf32>
    %911 = arith.mulf %900, %910 : vector<2x32xf32>
    %912 = arith.addf %909, %911 : vector<2x32xf32>
    %913 = math.tanh %912 : vector<2x32xf32>
    %cst_186 = arith.constant 1.000000e+00 : f32
    %914 = vector.broadcast %cst_186 : f32 to vector<2x32xf32>
    %915 = arith.subf %914, %908 : vector<2x32xf32>
    %916 = arith.mulf %915, %913 : vector<2x32xf32>
    %917 = arith.mulf %908, %861 : vector<2x32xf32>
    %918 = arith.addf %916, %917 : vector<2x32xf32>
    %919 = tpu.concatenate %918, %888 in 1 : vector<2x32xf32>, vector<2x32xf32> -> vector<2x64xf32>
    %cst_187 = arith.constant dense<0.000000e+00> : vector<2x16xf32>
    %920 = tpu.matmul %919, %519, %cst_187 {dimension_numbers = #tpu.dot_dimension_numbers<[1], [0], [0], [1], [0, 0, 1, 1], [], []>} : vector<2x64xf32>, vector<64x16xf32>, vector<2x16xf32> -> vector<2x16xf32>
    %921 = vector.broadcast %520 : vector<1x16xf32> to vector<2x16xf32>
    %922 = arith.addf %920, %921 : vector<2x16xf32>
    %cst_188 = arith.constant dense<0.000000e+00> : vector<2x128xf32>
    %923 = tpu.matmul %918, %515, %cst_188 {dimension_numbers = #tpu.dot_dimension_numbers<[1], [0], [0], [1], [0, 0, 1, 1], [], []>} : vector<2x32xf32>, vector<32x128xf32>, vector<2x128xf32> -> vector<2x128xf32>
    %924 = vector.broadcast %516 : vector<1x128xf32> to vector<2x128xf32>
    %925 = arith.addf %923, %924 : vector<2x128xf32>
    %926 = vector.extract_strided_slice %925 {offsets = [0, 0], sizes = [2, 32], strides = [1, 1]} : vector<2x128xf32> to vector<2x32xf32>
    %927 = vector.extract_strided_slice %925 {offsets = [0, 32], sizes = [2, 96], strides = [1, 1]} : vector<2x128xf32> to vector<2x96xf32>
    %cst_189 = arith.constant dense<0.000000e+00> : vector<16x32xf32>
    %928 = tpu.matmul %522, %926, %cst_189 {dimension_numbers = #tpu.dot_dimension_numbers<[1], [0], [0], [1], [0, 0, 1, 1], [], []>} : vector<16x2xf32>, vector<2x32xf32>, vector<16x32xf32> -> vector<16x32xf32>
    %929 = arith.addf %511, %928 : vector<16x32xf32>
    %cst_190 = arith.constant 0.000000e+00 : f32
    %930 = vector.broadcast %cst_190 : f32 to vector<16x32xf32>
    %931 = arith.maximumf %929, %930 : vector<16x32xf32>
    %cst_191 = arith.constant dense<0.000000e+00> : vector<16x1xf32>
    %932 = tpu.matmul %931, %514, %cst_191 {dimension_numbers = #tpu.dot_dimension_numbers<[1], [0], [0], [1], [0, 0, 1, 1], [], []>} : vector<16x32xf32>, vector<32x1xf32>, vector<16x1xf32> -> vector<16x1xf32>
    %cst_192 = arith.constant dense<0xFF800000> : vector<1xf32>
    %933 = vector.multi_reduction <maximumf>, %932, %cst_192 [0] : vector<16x1xf32> to vector<1xf32>
    %934 = vector.shape_cast %933 : vector<1xf32> to vector<1x1xf32>
    %935 = vector.broadcast %934 : vector<1x1xf32> to vector<16x1xf32>
    %936 = arith.subf %932, %935 : vector<16x1xf32>
    %937 = math.exp %936 : vector<16x1xf32>
    %938 = vector.broadcast %937 : vector<16x1xf32> to vector<16x33xf32>
    %939 = arith.mulf %938, %513 : vector<16x33xf32>
    %cst_193 = arith.constant dense<0.000000e+00> : vector<2x33xf32>
    %940 = tpu.matmul %521, %939, %cst_193 {dimension_numbers = #tpu.dot_dimension_numbers<[1], [0], [0], [1], [0, 0, 1, 1], [], []>} : vector<2x16xf32>, vector<16x33xf32>, vector<2x33xf32> -> vector<2x33xf32>
    %941 = vector.extract_strided_slice %940 {offsets = [0, 0], sizes = [2, 32], strides = [1, 1]} : vector<2x33xf32> to vector<2x32xf32>
    %942 = vector.extract_strided_slice %940 {offsets = [0, 32], sizes = [2, 1], strides = [1, 1]} : vector<2x33xf32> to vector<2x1xf32>
    %943 = tpu.reciprocal %942 {approx = true} : vector<2x1xf32> -> vector<2x1xf32>
    %944 = vector.broadcast %943 : vector<2x1xf32> to vector<2x32xf32>
    %945 = arith.mulf %941, %944 : vector<2x32xf32>
    %946 = tpu.concatenate %922, %945 in 1 : vector<2x16xf32>, vector<2x32xf32> -> vector<2x48xf32>
    %cst_194 = arith.constant dense<0.000000e+00> : vector<2x96xf32>
    %947 = tpu.matmul %946, %517, %cst_194 {dimension_numbers = #tpu.dot_dimension_numbers<[1], [0], [0], [1], [0, 0, 1, 1], [], []>} : vector<2x48xf32>, vector<48x96xf32>, vector<2x96xf32> -> vector<2x96xf32>
    %948 = vector.broadcast %518 : vector<1x96xf32> to vector<2x96xf32>
    %949 = arith.addf %947, %948 : vector<2x96xf32>
    %950 = vector.extract_strided_slice %949 {offsets = [0, 0], sizes = [2, 32], strides = [1, 1]} : vector<2x96xf32> to vector<2x32xf32>
    %951 = vector.extract_strided_slice %927 {offsets = [0, 0], sizes = [2, 32], strides = [1, 1]} : vector<2x96xf32> to vector<2x32xf32>
    %952 = arith.addf %950, %951 : vector<2x32xf32>
    %953 = arith.negf %952 : vector<2x32xf32>
    %954 = math.exp %953 : vector<2x32xf32>
    %cst_195 = arith.constant 1.000000e+00 : f32
    %955 = vector.broadcast %cst_195 : f32 to vector<2x32xf32>
    %956 = arith.addf %955, %954 : vector<2x32xf32>
    %957 = arith.divf %955, %956 : vector<2x32xf32>
    %958 = vector.extract_strided_slice %949 {offsets = [0, 32], sizes = [2, 32], strides = [1, 1]} : vector<2x96xf32> to vector<2x32xf32>
    %959 = vector.extract_strided_slice %927 {offsets = [0, 32], sizes = [2, 32], strides = [1, 1]} : vector<2x96xf32> to vector<2x32xf32>
    %960 = arith.addf %958, %959 : vector<2x32xf32>
    %961 = arith.negf %960 : vector<2x32xf32>
    %962 = math.exp %961 : vector<2x32xf32>
    %cst_196 = arith.constant 1.000000e+00 : f32
    %963 = vector.broadcast %cst_196 : f32 to vector<2x32xf32>
    %964 = arith.addf %963, %962 : vector<2x32xf32>
    %965 = arith.divf %963, %964 : vector<2x32xf32>
    %966 = vector.extract_strided_slice %949 {offsets = [0, 64], sizes = [2, 32], strides = [1, 1]} : vector<2x96xf32> to vector<2x32xf32>
    %967 = vector.extract_strided_slice %927 {offsets = [0, 64], sizes = [2, 32], strides = [1, 1]} : vector<2x96xf32> to vector<2x32xf32>
    %968 = arith.mulf %957, %967 : vector<2x32xf32>
    %969 = arith.addf %966, %968 : vector<2x32xf32>
    %970 = math.tanh %969 : vector<2x32xf32>
    %cst_197 = arith.constant 1.000000e+00 : f32
    %971 = vector.broadcast %cst_197 : f32 to vector<2x32xf32>
    %972 = arith.subf %971, %965 : vector<2x32xf32>
    %973 = arith.mulf %972, %970 : vector<2x32xf32>
    %974 = arith.mulf %965, %918 : vector<2x32xf32>
    %975 = arith.addf %973, %974 : vector<2x32xf32>
    %976 = tpu.concatenate %975, %945 in 1 : vector<2x32xf32>, vector<2x32xf32> -> vector<2x64xf32>
    %cst_198 = arith.constant dense<0.000000e+00> : vector<2x16xf32>
    %977 = tpu.matmul %976, %519, %cst_198 {dimension_numbers = #tpu.dot_dimension_numbers<[1], [0], [0], [1], [0, 0, 1, 1], [], []>} : vector<2x64xf32>, vector<64x16xf32>, vector<2x16xf32> -> vector<2x16xf32>
    %978 = vector.broadcast %520 : vector<1x16xf32> to vector<2x16xf32>
    %979 = arith.addf %977, %978 : vector<2x16xf32>
    %980 = tpu.concatenate %580, %637, %694, %751, %808, %865, %922, %979 in 0 : vector<2x16xf32>, vector<2x16xf32>, vector<2x16xf32>, vector<2x16xf32>, vector<2x16xf32>, vector<2x16xf32>, vector<2x16xf32>, vector<2x16xf32> -> vector<16x16xf32>
    %c0_199 = arith.constant 0 : index
    %c0_200 = arith.constant 0 : index
    %981 = vector.load %arg20[%c0_199, %c0_200] : memref<16x16xf32, #tpu.memory_space<vmem>>, vector<16x16xf32>
    tpu.vector_store %arg20[%c0_199, %c0_200], %980 {strides = array<i32>} : memref<16x16xf32, #tpu.memory_space<vmem>>, vector<16x16xf32>,
    return
  }
}

</mosaic_0001>

<bundles_post_ra>
// kernel: tpu_custom_call.1
= control target key start
LH: loop header
LB: loop body
LE: loop exit
PB: predicated region body
PF: predicated region fallthrough
CT: control target
= control target key end

     0   :  { %s10095_s0 = inlined_call_operand.hbm [shape: f32[16,16], index: 0, kind: input, shape index: {}]   ;;  %s10096_s1 = inlined_call_operand.hbm [shape: f32[16,96], index: 1, kind: input, shape index: {}]   ;;  %s10097_s2 = inlined_call_operand.hbm [shape: f32[1,96], index: 2, kind: input, shape index: {}]   ;;  %s10098_s3 = inlined_call_operand.vmem [shape: f32[32,96], index: 3, kind: input, shape index: {}]   ;;  %s10099_s4 = inlined_call_operand.hbm [shape: f32[1,96], index: 4, kind: input, shape index: {}]   ;;  %s10100_s5 = inlined_call_operand.hbm [shape: f32[16,96], index: 5, kind: input, shape index: {}]   ;;  %s10101_s6 = inlined_call_operand.hbm [shape: f32[1,96], index: 6, kind: input, shape index: {}]   ;;  %s10102_s7 = inlined_call_operand.vmem [shape: f32[32,96], index: 7, kind: input, shape index: {}]   ;;  %s10103_s8 = inlined_call_operand.hbm [shape: f32[1,96], index: 8, kind: input, shape index: {}]   ;;  %s10104_s9 = inlined_call_operand.vmem [shape: f32[32,32], index: 9, kind: input, shape index: {}]   ;;  %s10105_s10 = inlined_call_operand.hbm [shape: f32[1,32], index: 10, kind: input, shape index: {}]   ;;  %s10106_s11 = inlined_call_operand.vmem [shape: f32[32,1], index: 11, kind: input, shape index: {}]   ;;  %s10107_s12 = inlined_call_operand.hbm [shape: f32[32,128], index: 12, kind: input, shape index: {}]   ;;  %s10108_s13 = inlined_call_operand.hbm [shape: f32[1,128], index: 13, kind: input, shape index: {}]   ;;  %s10109_s14 = inlined_call_operand.vmem [shape: f32[48,96], index: 14, kind: input, shape index: {}]   ;;  %s10110_s15 = inlined_call_operand.hbm [shape: f32[1,96], index: 15, kind: input, shape index: {}]   ;;  %s10111_s16 = inlined_call_operand.vmem [shape: f32[64,16], index: 16, kind: input, shape index: {}]   ;;  %s10112_s17 = inlined_call_operand.hbm [shape: f32[1,16], index: 17, kind: input, shape index: {}]   ;;  %s10113_s18 = inlined_call_operand.hbm [shape: f32[2,16], index: 18, kind: input, shape index: {}]   ;;  %s10114_s19 = inlined_call_operand.vmem [shape: f32[16,2], index: 19, kind: input, shape index: {}]   ;;  %s10115_s20 = inlined_call_operand.hbm [shape: f32[16,16], index: 20, kind: output, shape index: {0}]   ;;  %s10116_s21 = inlined_call_operand.hbm [shape: f32[16,32], index: 21, kind: output, shape index: {1}]  }
   0x1   :  { %10118 = sst [smem:[#allocation35_spill]] %s10095_s0 }
   0x2   :  { %10119 = sst [smem:[#allocation36_spill]] %s10096_s1 }
   0x3   :  { %10120 = sst [smem:[#allocation37_spill]] %s10097_s2 }
   0x4   :  { %10121 = sst [smem:[#allocation38_spill]] %s10098_s3 }
   0x5   :  { %10122 = sst [smem:[#allocation39_spill]] %s10099_s4 }
   0x6   :  { %10123 = sst [smem:[#allocation40_spill]] %s10100_s5 }
   0x7   :  { %10124 = sst [smem:[#allocation41_spill]] %s10115_s20 }
   0x8   :  { %27 = vsyncpa [#allocation3], 0 }
   0x9   :  { %28 = vsyncpa [#allocation6], 0 }
   0xa   :  { %29 = vsyncpa [#allocation9], 0 }
   0xb   :  { %30 = vsyncpa [#allocation12], 0 }
   0xc   :  { %31 = vsyncpa [#allocation15], 0 }
   0xd   :  { %32 = vsyncpa [#allocation18], 0 }
   0xe   :  { %33 = vsyncpa [#allocation21], 0 }
   0xf   :  { %34 = vsyncpa [#allocation4], 0 }
  0x10   :  { %35 = vsyncpa [#allocation25], 0  ;;  %s8362_s2 = smov [#allocation5]   ;;  %s8363_s26 = smov [#allocation8]  }
  0x11   :  { %s53_s25 = sshll.u32 %s8362_s2, 4  ;;  %s78_s27 = sshll.u32 %s8363_s26, 4  ;;  %s54_s25 = int_to_ptr.vmem [resolvable:$true] %s53_s25  ;;  %s79_s27 = int_to_ptr.vmem [resolvable:$true] %s78_s27 }
  0x12   :  { %s8052_s3 = scalar_lea.vmem %s54_s25, 256  ;;  %p8057_p1 = scmp.lt.s32.totalorder %s54_s25, %s54_s25 }
  0x13   :  { %p8053_p0 = scmp.ne.s32.totalorder %s54_s25, %s8052_s3  ;;  %p8058_p2 = scmp.lt.s32.totalorder %s8052_s3, %s8052_s3 }
  0x15   :  { %p8059_p3 = por %p8058_p2, %p8057_p1 }
  0x17   :  { %p8060_p4 = pnand %p8059_p3, %p8053_p0 }
  0x19   :  { %8063 = shalt.err (!%p8060_p4)
}
  0x1a   :  { %s8364_s28 = smov 128   ;;  %s8365_s29 = smov 8  }
  0x1b   :  { %s10125_s30 = sld [smem:[#allocation36_spill]]  ;;  %s8072_s5 = scalar_lea.vmem %s79_s27, 16 }
  0x1c   :  { %p8073_p5 = scmp.ne.s32.totalorder %s79_s27, %s8072_s5  ;;  %s8076_s22 = scalar_lea.vmem %s79_s27, 32 }
  0x1d   :  { %p8077_p6 = scmp.lt.s32.totalorder %s79_s27, %s79_s27  ;;  %p8078_p7 = scmp.lt.s32.totalorder %s8076_s22, %s8072_s5 }
  0x1f   :  { %p8079_p8 = por %p8078_p7, %p8077_p6 }
  0x21   :  { %59 = dma.hbm_to_vmem [thread:$0]  %s10125_s30, 256, %s54_s25, [#allocation6], %s8364_s28, %s8364_s28, %s8365_s29  }
  0x22   :  { %p8080_p9 = pnand %p8079_p8, %p8073_p5 }
  0x24   :  { %8083 = shalt.err (!%p8080_p9)
}
  0x25   :  { %s10126_s24 = sld [smem:[#allocation39_spill]]  ;;  %s8366_s2 = smov [#allocation11]  }
  0x26   :  { %s100_s26 = sshll.u32 %s8366_s2, 4  ;;  %s8367_s3 = smov [#allocation14]   ;;  %s101_s26 = int_to_ptr.vmem [resolvable:$true] %s100_s26 }
  0x27   :  { %s124_s20 = sshll.u32 %s8367_s3, 4  ;;  %s8092_s0 = scalar_lea.vmem %s101_s26, 16  ;;  %s125_s20 = int_to_ptr.vmem [resolvable:$true] %s124_s20 }
  0x28   :  { %p8093_p10 = scmp.ne.s32.totalorder %s101_s26, %s8092_s0  ;;  %s8096_s25 = scalar_lea.vmem %s101_s26, 32 }
  0x29   :  { %p8097_p11 = scmp.lt.s32.totalorder %s101_s26, %s101_s26  ;;  %p8098_p12 = scmp.lt.s32.totalorder %s8096_s25, %s8092_s0 }
  0x2b   :  { %81 = dma.hbm_to_vmem [thread:$0]  %s10126_s24, 16, %s79_s27, [#allocation9]  }
  0x2c   :  { %p8099_p13 = por %p8098_p12, %p8097_p11 }
  0x2e   :  { %p8100_p0 = pnand %p8099_p13, %p8093_p10 }
  0x30   :  { %8103 = shalt.err (!%p8100_p0)
}
  0x31   :  { %103 = dma.hbm_to_vmem [thread:$0]  %s10101_s6, 16, %s101_s26, [#allocation12]  }
  0x32   :  { %s8112_s5 = scalar_lea.vmem %s125_s20, 16  ;;  %s8116_s27 = scalar_lea.vmem %s125_s20, 32 }
  0x33   :  { %p8113_p1 = scmp.ne.s32.totalorder %s125_s20, %s8112_s5  ;;  %p8117_p2 = scmp.lt.s32.totalorder %s125_s20, %s125_s20 }
  0x34   :  { %p8118_p3 = scmp.lt.s32.totalorder %s8116_s27, %s8112_s5 }
  0x36   :  { %p8119_p4 = por %p8118_p3, %p8117_p2 }
  0x38   :  { %p8120_p5 = pnand %p8119_p4, %p8113_p1 }
  0x3a   :  { %8123 = shalt.err (!%p8120_p5)
}
  0x3b   :  { %127 = dma.hbm_to_vmem [thread:$0]  %s10105_s10, 16, %s125_s20, [#allocation15]  }
  0x3c   :  { %s8368_s1 = smov [#allocation17]   ;;  %s8369_s2 = smov [#allocation20]  }
  0x3d   :  { %s148_s24 = sshll.u32 %s8368_s1, 4  ;;  %s172_s3 = sshll.u32 %s8369_s2, 4  ;;  %s149_s24 = int_to_ptr.vmem [resolvable:$true] %s148_s24  ;;  %s173_s3 = int_to_ptr.vmem [resolvable:$true] %s172_s3 }
  0x3e   :  { %s8132_s0 = scalar_lea.vmem %s149_s24, 16  ;;  %s8136_s6 = scalar_lea.vmem %s149_s24, 32 }
  0x3f   :  { %p8133_p6 = scmp.ne.s32.totalorder %s149_s24, %s8132_s0  ;;  %p8137_p7 = scmp.lt.s32.totalorder %s149_s24, %s149_s24 }
  0x40   :  { %p8138_p8 = scmp.lt.s32.totalorder %s8136_s6, %s8132_s0 }
  0x42   :  { %p8139_p9 = por %p8138_p8, %p8137_p7 }
  0x44   :  { %p8140_p10 = pnand %p8139_p9, %p8133_p6 }
  0x46   :  { %8143 = shalt.err (!%p8140_p10)
}
  0x47   :  { %151 = dma.hbm_to_vmem [thread:$0]  %s10108_s13, 16, %s149_s24, [#allocation18]  }
  0x48   :  { %s8152_s4 = scalar_lea.vmem %s173_s3, 16  ;;  %s8156_s10 = scalar_lea.vmem %s173_s3, 32 }
  0x49   :  { %p8153_p11 = scmp.ne.s32.totalorder %s173_s3, %s8152_s4  ;;  %p8157_p12 = scmp.lt.s32.totalorder %s173_s3, %s173_s3 }
  0x4a   :  { %p8158_p13 = scmp.lt.s32.totalorder %s8156_s10, %s8152_s4 }
  0x4c   :  { %p8159_p0 = por %p8158_p13, %p8157_p12 }
  0x4e   :  { %p8160_p1 = pnand %p8159_p0, %p8153_p11 }
  0x50   :  { %8163 = shalt.err (!%p8160_p1)
}
  0x51   :  { %175 = dma.hbm_to_vmem [thread:$0]  %s10112_s17, 16, %s173_s3, [#allocation21]  }
  0x52   :  { %s8370_s5 = smov [#allocation2]   ;;  %s8371_s22 = smov [#allocation7]  }
  0x53   :  { %s41_s27 = sshll.u32 %s8370_s5, 4  ;;  %s66_s23 = sshll.u32 %s8371_s22, 4  ;;  %s42_s27 = int_to_ptr.vmem [resolvable:$true] %s41_s27  ;;  %s67_s23 = int_to_ptr.vmem [resolvable:$true] %s66_s23 }
  0x54   :  { %s8172_s1 = scalar_lea.vmem %s42_s27, 256  ;;  %p8177_p3 = scmp.lt.s32.totalorder %s42_s27, %s42_s27 }
  0x55   :  { %p8173_p2 = scmp.ne.s32.totalorder %s42_s27, %s8172_s1  ;;  %p8178_p4 = scmp.lt.s32.totalorder %s8172_s1, %s8172_s1 }
  0x57   :  { %p8179_p5 = por %p8178_p4, %p8177_p3 }
  0x59   :  { %p8180_p6 = pnand %p8179_p5, %p8173_p2 }
  0x5b   :  { %8183 = shalt.err (!%p8180_p6)
}
  0x5c   :  { %s10127_s2 = sld [smem:[#allocation35_spill]]  ;;  %s8192_s17 = scalar_lea.vmem %s67_s23, 16 }
  0x5d   :  { %p8193_p7 = scmp.ne.s32.totalorder %s67_s23, %s8192_s17  ;;  %s8196_s3 = scalar_lea.vmem %s67_s23, 32 }
  0x5e   :  { %p8197_p8 = scmp.lt.s32.totalorder %s67_s23, %s67_s23  ;;  %p8198_p9 = scmp.lt.s32.totalorder %s8196_s3, %s8192_s17 }
  0x60   :  { %p8199_p10 = por %p8198_p9, %p8197_p8 }
  0x62   :  { %47 = dma.hbm_to_vmem [thread:$0]  %s10127_s2, 256, %s42_s27, [#allocation3], %s8364_s28, %s8364_s28, %s8365_s29  }
  0x63   :  { %p8200_p11 = pnand %p8199_p10, %p8193_p7 }
  0x65   :  { %8203 = shalt.err (!%p8200_p11)
}
  0x66   :  { %s10128_s26 = sld [smem:[#allocation37_spill]]  ;;  %s8372_s25 = smov [#allocation10]  }
  0x67   :  { %s87_s4 = sshll.u32 %s8372_s25, 4  ;;  %s8373_s10 = smov [#allocation13]   ;;  %s88_s4 = int_to_ptr.vmem [resolvable:$true] %s87_s4 }
  0x68   :  { %s112_s20 = sshll.u32 %s8373_s10, 4  ;;  %s8212_s30 = scalar_lea.vmem %s88_s4, 256  ;;  %s113_s20 = int_to_ptr.vmem [resolvable:$true] %s112_s20 }
  0x69   :  { %p8213_p12 = scmp.ne.s32.totalorder %s88_s4, %s8212_s30  ;;  %p8217_p13 = scmp.lt.s32.totalorder %s88_s4, %s88_s4 }
  0x6a   :  { %p8218_p0 = scmp.lt.s32.totalorder %s8212_s30, %s8212_s30 }
  0x6c   :  { %69 = dma.hbm_to_vmem [thread:$0]  %s10128_s26, 16, %s67_s23, [#allocation6]  }
  0x6d   :  { %p8219_p1 = por %p8218_p0, %p8217_p13 }
  0x6f   :  { %p8220_p2 = pnand %p8219_p1, %p8213_p12 }
  0x71   :  { %8223 = shalt.err (!%p8220_p2)
}
  0x72   :  { %s10129_s22 = sld [smem:[#allocation40_spill]]  ;;  %s8232_s23 = scalar_lea.vmem %s113_s20, 16 }
  0x73   :  { %p8233_p3 = scmp.ne.s32.totalorder %s113_s20, %s8232_s23  ;;  %s8236_s1 = scalar_lea.vmem %s113_s20, 32 }
  0x74   :  { %p8237_p4 = scmp.lt.s32.totalorder %s113_s20, %s113_s20  ;;  %p8238_p5 = scmp.lt.s32.totalorder %s8236_s1, %s8232_s23 }
  0x76   :  { %p8239_p6 = por %p8238_p5, %p8237_p4 }
  0x78   :  { %93 = dma.hbm_to_vmem [thread:$0]  %s10129_s22, 256, %s88_s4, [#allocation9], %s8364_s28, %s8364_s28, %s8365_s29  }
  0x79   :  { %p8240_p7 = pnand %p8239_p6, %p8233_p3 }
  0x7b   :  { %8243 = shalt.err (!%p8240_p7)
}
  0x7c   :  { %115 = dma.hbm_to_vmem [thread:$0]  %s10103_s8, 16, %s113_s20, [#allocation12]  }
  0x7d   :  { %s8374_s2 = smov [#allocation16]   ;;  %s8375_s3 = smov [#allocation19]  }
  0x7e   :  { %s135_s17 = sshll.u32 %s8374_s2, 4  ;;  %s160_s0 = sshll.u32 %s8375_s3, 4  ;;  %s136_s17 = int_to_ptr.vmem [resolvable:$true] %s135_s17  ;;  %s161_s0 = int_to_ptr.vmem [resolvable:$true] %s160_s0 }
  0x7f   :  { %s8252_s6 = scalar_lea.vmem %s136_s17, 512  ;;  %p8257_p9 = scmp.lt.s32.totalorder %s136_s17, %s136_s17 }
  0x80   :  { %p8253_p8 = scmp.ne.s32.totalorder %s136_s17, %s8252_s6  ;;  %p8258_p10 = scmp.lt.s32.totalorder %s8252_s6, %s8252_s6 }
  0x82   :  { %p8259_p11 = por %p8258_p10, %p8257_p9 }
  0x84   :  { %p8260_p12 = pnand %p8259_p11, %p8253_p8 }
  0x86   :  { %8263 = shalt.err (!%p8260_p12)
}
  0x87   :  { %141 = dma.hbm_to_vmem [thread:$0]  %s10107_s12, 512, %s136_s17, [#allocation15], %s8364_s28, %s8364_s28, %s8365_s29  }
  0x88   :  { %s8272_s8 = scalar_lea.vmem %s161_s0, 16  ;;  %s8276_s4 = scalar_lea.vmem %s161_s0, 32 }
  0x89   :  { %p8273_p13 = scmp.ne.s32.totalorder %s161_s0, %s8272_s8  ;;  %p8277_p0 = scmp.lt.s32.totalorder %s161_s0, %s161_s0 }
  0x8a   :  { %p8278_p1 = scmp.lt.s32.totalorder %s8276_s4, %s8272_s8 }
  0x8c   :  { %p8279_p2 = por %p8278_p1, %p8277_p0 }
  0x8e   :  { %p8280_p3 = pnand %p8279_p2, %p8273_p13 }
  0x90   :  { %8283 = shalt.err (!%p8280_p3)
}
  0x91   :  { %163 = dma.hbm_to_vmem [thread:$0]  %s10110_s15, 16, %s161_s0, [#allocation18]  }
  0x92   :  { %s8376_s30 = smov [#allocation22]  }
  0x93   :  { %s182_s5 = sshll.u32 %s8376_s30, 4  ;;  %s183_s5 = int_to_ptr.vmem [resolvable:$true] %s182_s5 }
  0x94   :  { %s8292_s27 = scalar_lea.vmem %s183_s5, 32  ;;  %p8297_p5 = scmp.lt.s32.totalorder %s183_s5, %s183_s5 }
  0x95   :  { %p8293_p4 = scmp.ne.s32.totalorder %s183_s5, %s8292_s27  ;;  %p8298_p6 = scmp.lt.s32.totalorder %s8292_s27, %s8292_s27 }
  0x97   :  { %p8299_p7 = por %p8298_p6, %p8297_p5 }
  0x99   :  { %p8300_p8 = pnand %p8299_p7, %p8293_p4 }
  0x9b   :  { %8303 = shalt.err (!%p8300_p8)
}
  0x9c   :  { %185 = dma.hbm_to_vmem [thread:$0]  %s10113_s18, 32, %s183_s5, [#allocation21]  }
  0x9d   :  { %8344 = dma.done.wait [#allocation3], 256  }
  0x9e   :  { %8345 = vsyncadd [#allocation3], 4294967040 }
  0x9f   :  { %8346 = dma.done.wait [#allocation6], 272  }
  0xa0   :  { %8347 = vsyncadd [#allocation6], 4294967024 }
  0xa1   :  { %8348 = dma.done.wait [#allocation9], 272  }
  0xa2   :  { %8349 = vsyncadd [#allocation9], 4294967024 }
  0xa3   :  { %8350 = dma.done.wait [#allocation12], 32  }
  0xa4   :  { %8351 = vsyncadd [#allocation12], 4294967264 }
  0xa5   :  { %8352 = dma.done.wait [#allocation15], 528  }
  0xa6   :  { %8353 = vsyncadd [#allocation15], 4294966768 }
  0xa7   :  { %8354 = dma.done.wait [#allocation18], 32  }
  0xa8   :  { %8355 = vsyncadd [#allocation18], 4294967264 }
  0xa9   :  { %8356 = dma.done.wait [#allocation21], 48  }
  0xaa   :  { %8357 = vsyncadd [#allocation21], 4294967248  ;;  %v8377_v0 = vmov 0.0   ;;  %vm8378_vm0 = vmmov 0   ;;  %s10130_s23 = sld [smem:[#allocation38_spill]]  ;;  %v230_v2 = vld [vmem:[#allocation5 + $0x8] sm:$0xff] }
  0xab   :  { %7048 = vmatprep.subr.mxu0 %v8377_v0  ;;  %7056 = vmatprep.mubr.msk.f32.mxu0 %vm8378_vm0, %v8377_v0  ;;  %v229_v4 = vld [vmem:[#allocation5] sm:$0xff]  ;;  %v227_v5 = vld [vmem:[#allocation2] sm:$0xff]  ;;  %vm238_vm1 = vcmask 130048   ;;  %v228_v7 = vld [vmem:[#allocation2 + $0x8] sm:$0xff]  ;;  %s8380_s30 = smov 96   ;;  %vm420_vm2 = vcmask 261120  }
  0xac   :  { %7034 = vmatprep.subr.mxu1 %v230_v2  ;;  %7038 = vmatprep.mubr.msk.f32.mxu1 %vm238_vm1, %v227_v5  ;;  %v321_v9 = vld [vmem:[#allocation10 + $0x8] sm:$0xff]  ;;  %v320_v10 = vld [vmem:[#allocation10] sm:$0xff]  ;;  %v8596_v11 = vld [vmem:[%s10102_s7 + $0x18] sm:$0xff]  ;;  %vm2104_vm3 = vcmask 1041408   ;;  %vm2106_vm4 = vcmask 1043456   ;;  %vm2108_vm5 = vcmask 1045504  }
  0xad   :  { %7035 = vmatpush3.msra.mxu1 %v230_v2  ;;  %v8603_v12 = vld [vmem:[%s10102_s7 + $0x10] sm:$0xff]  ;;  %v8612_v13 = vld [vmem:[%s10102_s7 + $0x8] sm:$0xff]  ;;  %v8619_v14 = vld [vmem:[%s10102_s7] sm:$0xff]  ;;  %s8379_s7 = smov 64   ;;  %vm2325_vm6 = vcmask 15360   ;;  %vm2495_vm7 = vcmask 7168  }
  0xae   :  { %7036 = vmatprep.subr.mxu1 %v229_v4  ;;  %v6552_v16 = vld [vmem:[#allocation7] ss:$0 sm:$0xff]  ;;  %v8636_v17 = vld [vmem:[#allocation8] ss:$0 sm:$0xff]  ;;  %v6555_v29 = vld [vmem:[#allocation11] ss:$0 sm:$0xff] }
  0xaf   :  { %7037 = vmatpush3.msra.mxu1 %v229_v4  ;;  %v8649_v39 = vld [vmem:[#allocation13] ss:$0 sm:$0xff]  ;;  %s8383_s17 = smov 16   ;;  %s8384_s3 = smov 32   ;;  %vm2614_vm8 = vcmask 392192   ;;  %vm2731_vm9 = vcmask 523264  }
  0xb0   :  { %v8554_v1 = vld [vmem:[%s10130_s23 + $0x18] sm:$0xff]  ;;  %v8559_v3 = vld [vmem:[%s10130_s23 + $0x10] sm:$0xff]  ;;  %v8566_v6 = vld [vmem:[%s10130_s23 + $0x8] sm:$0xff]  ;;  %7039 = vmatmul.mubr.msk.f32.vlgmr.msra.gmra.mxu1 %vm238_vm1, %v228_v7  ;;  %7041 = vmatprep.subr.mxu1 %v321_v9 }
  0xb1   :  { %7049 = vmatpush3.msra.mxu0 %v8554_v1  ;;  %v8573_v8 = vld [vmem:[%s10130_s23] sm:$0xff]  ;;  %7045 = vmatprep.mubr.msk.f32.mxu1 %vm238_vm1, %v227_v5 }
  0xb2   :  { %7050 = vmatprep.subr.mxu0 %v8377_v0  ;;  %7042 = vmatpush3.msra.mxu1 %v321_v9 }
  0xb3   :  { %7051 = vmatpush3.msra.mxu0 %v8559_v3  ;;  %7043 = vmatprep.subr.mxu1 %v320_v10 }
  0xb4   :  { %7052 = vmatprep.subr.mxu0 %v8377_v0  ;;  %7044 = vmatpush3.msra.mxu1 %v320_v10 }
  0xb5   :  { %7053 = vmatpush3.msra.mxu0 %v8566_v6  ;;  %7059 = vmatprep.subr.mxu1 %v8377_v0 }
  0xb6   :  { %7054 = vmatprep.subr.mxu0 %v8377_v0  ;;  %7046 = vmatmul.mubr.msk.f32.vlgmr.msra.gmra.mxu1 %vm238_vm1, %v228_v7 }
  0xb7   :  { %7055 = vmatpush3.msra.mxu0 %v8573_v8  ;;  %7060 = vmatpush3.msra.mxu1 %v8596_v11 }
  0xb8   :  { %7057 = vmatmul.mubr.f32.vlgmr.msra.gmra.mxu0 %v8377_v0  ;;  %7070 = vmatprep.subr.mxu0 %v8377_v0 }
  0xb9   :  { %7071 = vmatpush3.msra.mxu0 %v8554_v1  ;;  %7078 = vmatprep.mubr.msk.f32.mxu0 %vm8378_vm0, %v8377_v0 }
  0xba   :  { %7072 = vmatprep.subr.mxu0 %v8377_v0  ;;  %7067 = vmatprep.mubr.msk.f32.mxu1 %vm8378_vm0, %v8377_v0 }
  0xbb   :  { %7073 = vmatpush3.msra.mxu0 %v8559_v3  ;;  %7061 = vmatprep.subr.mxu1 %v8377_v0 }
  0xbc   :  { %7074 = vmatprep.subr.mxu0 %v8377_v0  ;;  %7062 = vmatpush3.msra.mxu1 %v8603_v12 }
  0xbd   :  { %7075 = vmatpush3.msra.mxu0 %v8566_v6  ;;  %7063 = vmatprep.subr.mxu1 %v8377_v0 }
  0xbe   :  { %7076 = vmatprep.subr.mxu0 %v8377_v0  ;;  %7064 = vmatpush3.msra.mxu1 %v8612_v13 }
  0xbf   :  { %7077 = vmatpush3.msra.mxu0 %v8573_v8  ;;  %7065 = vmatprep.subr.mxu1 %v8377_v0 }
  0xc0   :  { %7092 = vmatprep.subr.mxu0 %v8377_v0  ;;  %7066 = vmatpush3.msra.mxu1 %v8619_v14 }
  0xc1   :  { %7068 = vmatmul.mubr.f32.vlgmr.msra.gmra.mxu1 %v8377_v0  ;;  %7081 = vmatprep.subr.mxu1 %v8377_v0 }
  0xc2   :  { %7082 = vmatpush3.msra.mxu1 %v8596_v11  ;;  %7089 = vmatprep.mubr.msk.f32.mxu1 %vm8378_vm0, %v8377_v0 }
  0xc3   :  { %7083 = vmatprep.subr.mxu1 %v8377_v0 }
  0xc4   :  { %7084 = vmatpush3.msra.mxu1 %v8603_v12 }
  0xc5   :  { %7085 = vmatprep.subr.mxu1 %v8377_v0 }
  0xc6   :  { %7086 = vmatpush3.msra.mxu1 %v8612_v13 }
  0xc7   :  { %7087 = vmatprep.subr.mxu1 %v8377_v0 }
  0xc8   :  { %7088 = vmatpush3.msra.mxu1 %v8619_v14 }
  0xc9   :  { %7103 = vmatprep.subr.mxu1 %v8377_v0 }
 0x170   :  { %v7040_v15 = vpop.f32.mrf.mxu1 }
 0x171   :  { %v8638_v18 = vadd.f32 %v7040_v15, %v6552_v16 }
 0x172   :  { %v311_v22 = vpop.f32.mrf.mxu1 }
 0x173   :  { %v8642_v23 = vadd.f32 %v6552_v16, %v311_v22 }
 0x176   :  { %v7047_v28 = vpop.f32.mrf.mxu1 }
 0x177   :  { %v8654_v43 = vadd.f32 %v7047_v28, %v6555_v29 }
 0x178   :  { %v490_v19 = vpop.f32.mrf.mxu0  ;;  %v395_v30 = vpop.f32.mrf.mxu1 }
 0x179   :  { %v491_v20 = vadd.f32 %v8636_v17, %v490_v19  ;;  %v8645_v31 = vadd.f32 %v6555_v29, %v395_v30 }
 0x17a   :  { %v7058_v21 = vpop.f32.mrf.mxu0 }
 0x17b   :  { %578 = vrot.lane.b32.xlu0 %v491_v20, %s8379_s7  ;;  %v570_v24 = vadd.f32 %v491_v20, %v8642_v23 }
 0x17d   :  { %v6560_v25 = vmul.f32 -1.442695, %v570_v24 }
 0x17f   :  { %7821 = vpow2.f32 %v6560_v25 }
 0x181   :  { %v566_v32 = vpop.f32.mrf.mxu1 }
 0x182   :  { %v567_v40 = vadd.f32 %v8649_v39, %v566_v32 }
 0x183   :  { %v7069_v33 = vpop.f32.mrf.mxu1 }
 0x184   :  { %v597_v42 = vrot.slane %v567_v40, 2 }
 0x186   :  { %v599_v44 = vadd.f32 %v597_v42, %v8654_v43 }
 0x188   :  { %v6561_v45 = vmul.f32 -1.442695, %v599_v44 }
 0x18c   :  { %v7822_v26 = vpop.eup %7821 }
 0x18d   :  { %v574_v27 = vadd.f32 1.0, %v7822_v26 }
 0x18f   :  { %7823 = vrcp.f32 %v574_v27 }
 0x19c   :  { %v7824_v34 = vpop.eup %7823 }
 0x19d   :  { %v588_v48 = vsub.f32 1.0, %v7824_v34  ;;  %v594_v50 = vmul.f32 0.0, %v7824_v34 }
 0x1ed   :  { %v579_v35 = vpop.permute.xlu0 %578 }
 0x1ee   :  { %v581_v36 = vmul.f32 %v7824_v34, %v579_v35 }
 0x1f0   :  { %583 = vrot.lane.b32.xlu0 %v581_v36, %s8379_s7 }
 0x262   :  { %v584_v37 = vpop.permute.xlu0 %583 }
 0x263   :  { %v586_v38 = vadd.f32 %v584_v37, %v8642_v23 }
 0x265   :  { %7825 = vtanh.f32 %v586_v38 }
 0x266   :  { %7827 = vpow2.f32 %v6561_v45 }
 0x272   :  { %v7826_v41 = vpop.eup %7825 }
 0x273   :  { %590 = vrot.lane.b32.xlu1 %v7826_v41, %s8380_s30  ;;  %v7828_v46 = vpop.eup %7827 }
 0x274   :  { %v603_v47 = vadd.f32 1.0, %v7828_v46 }
 0x276   :  { %7829 = vrcp.f32 %v603_v47 }
 0x277   :  { %606 = vrot.lane.b32.xlu1 %v597_v42, %s8379_s7 }
 0x283   :  { %v7830_v53 = vpop.eup %7829 }
 0x284   :  { %v616_v60 = vsub.f32 1.0, %v7830_v53  ;;  %v622_v62 = vmul.f32 0.0, %v7830_v53 }
 0x2e5   :  { %v591_v49 = vpop.permute.xlu1 %590 }
 0x2e6   :  { %v593_v51 = vmul.f32 %v591_v49, %v588_v48 }
 0x2e8   :  { %v8657_v52 = vadd.f32 %v594_v50, %v593_v51 }
 0x2e9   :  { %v607_v54 = vpop.permute.xlu1 %606 }
 0x2ea   :  { %v609_v55 = vmul.f32 %v7830_v53, %v607_v54  ;;  %625 = vrot.lane.b32.xlu0 %v8657_v52, %s8380_s30  ;;  %v801_v40 = vrot.slane %v8657_v52, 6 }
 0x2ec   :  { %611 = vrot.lane.b32.xlu1 %v609_v55, %s8379_s7 }
 0x35c   :  { %v626_v56 = vpop.permute.xlu0 %625 }
 0x35d   :  { %7079 = vmatmul.mubr.msk.f32.vlgmr.msra.gmra.mxu0 %vm420_vm2, %v626_v56 }
 0x35e   :  { %v612_v57 = vpop.permute.xlu1 %611  ;;  %7093 = vmatpush3.msra.mxu0 %v8554_v1  ;;  %7100 = vmatprep.mubr.msk.f32.mxu0 %vm8378_vm0, %v8377_v0 }
 0x35f   :  { %v614_v58 = vadd.f32 %v612_v57, %v8654_v43  ;;  %7094 = vmatprep.subr.mxu0 %v8377_v0 }
 0x360   :  { %7095 = vmatpush3.msra.mxu0 %v8559_v3 }
 0x361   :  { %7831 = vtanh.f32 %v614_v58  ;;  %7096 = vmatprep.subr.mxu0 %v8377_v0 }
 0x362   :  { %7097 = vmatpush3.msra.mxu0 %v8566_v6 }
 0x363   :  { %7098 = vmatprep.subr.mxu0 %v8377_v0 }
 0x364   :  { %7099 = vmatpush3.msra.mxu0 %v8573_v8 }
 0x365   :  { %7114 = vmatprep.subr.mxu0 %v8377_v0 }
 0x36e   :  { %v7832_v59 = vpop.eup %7831 }
 0x36f   :  { %618 = vrot.lane.b32.xlu0 %v7832_v59, %s8380_s30 }
 0x3e1   :  { %v619_v61 = vpop.permute.xlu0 %618 }
 0x3e2   :  { %v621_v63 = vmul.f32 %v619_v61, %v616_v60 }
 0x3e4   :  { %v8675_v2 = vadd.f32 %v622_v62, %v621_v63 }
 0x3e6   :  { %v700_v4 = vrot.slane %v8675_v2, 6  ;;  %v831_v56 = vrot.slane %v8675_v2, 2 }
 0x3e8   :  { %701 = vrot.lane.b32.xlu1 %v700_v4, %s8380_s30 }
 0x41d   :  { %v695_v5 = vpop.f32.mrf.mxu0 }
 0x41e   :  { %v696_v7 = vadd.f32 %v8636_v17, %v695_v5 }
 0x41f   :  { %v7080_v9 = vpop.f32.mrf.mxu0 }
 0x420   :  { %v776_v10 = vrot.slane %v696_v7, 6 }
 0x422   :  { %785 = vrot.lane.b32.xlu0 %v776_v10, %s8379_s7  ;;  %v778_v16 = vadd.f32 %v776_v10, %v8642_v23 }
 0x424   :  { %v6564_v19 = vmul.f32 -1.442695, %v778_v16 }
 0x426   :  { %7833 = vpow2.f32 %v6564_v19 }
 0x433   :  { %v7834_v20 = vpop.eup %7833 }
 0x434   :  { %v782_v21 = vadd.f32 1.0, %v7834_v20 }
 0x436   :  { %7835 = vrcp.f32 %v782_v21 }
 0x443   :  { %v7836_v22 = vpop.eup %7835 }
 0x444   :  { %v795_v38 = vsub.f32 1.0, %v7836_v22  ;;  %v803_v42 = vmul.f32 %v7836_v22, %v801_v40 }
 0x45a   :  { %v702_v15 = vpop.permute.xlu1 %701 }
 0x45b   :  { %7090 = vmatmul.mubr.msk.f32.vlgmr.msra.gmra.mxu1 %vm420_vm2, %v702_v15 }
 0x45c   :  { %7104 = vmatpush3.msra.mxu1 %v8596_v11  ;;  %7111 = vmatprep.mubr.msk.f32.mxu1 %vm8378_vm0, %v8377_v0 }
 0x45d   :  { %7105 = vmatprep.subr.mxu1 %v8377_v0 }
 0x45e   :  { %7106 = vmatpush3.msra.mxu1 %v8603_v12 }
 0x45f   :  { %7107 = vmatprep.subr.mxu1 %v8377_v0 }
 0x460   :  { %7108 = vmatpush3.msra.mxu1 %v8612_v13 }
 0x461   :  { %7109 = vmatprep.subr.mxu1 %v8377_v0 }
 0x462   :  { %7110 = vmatpush3.msra.mxu1 %v8619_v14 }
 0x463   :  { %7125 = vmatprep.subr.mxu1 %v8377_v0 }
 0x494   :  { %v786_v24 = vpop.permute.xlu0 %785 }
 0x495   :  { %v788_v25 = vmul.f32 %v7836_v22, %v786_v24 }
 0x497   :  { %790 = vrot.lane.b32.xlu1 %v788_v25, %s8379_s7 }
 0x509   :  { %v791_v26 = vpop.permute.xlu1 %790 }
 0x50a   :  { %v793_v27 = vadd.f32 %v791_v26, %v8642_v23 }
 0x50c   :  { %7837 = vtanh.f32 %v793_v27 }
 0x519   :  { %v7838_v28 = vpop.eup %7837 }
 0x51a   :  { %797 = vrot.lane.b32.xlu0 %v7838_v28, %s8380_s30 }
 0x51b   :  { %v771_v29 = vpop.f32.mrf.mxu1 }
 0x51c   :  { %v772_v30 = vadd.f32 %v8649_v39, %v771_v29 }
 0x51d   :  { %v7091_v32 = vpop.f32.mrf.mxu1 }
 0x51e   :  { %v806_v33 = vrot.slane %v772_v30, 4 }
 0x520   :  { %815 = vrot.lane.b32.xlu1 %v806_v33, %s8379_s7  ;;  %v808_v34 = vadd.f32 %v806_v33, %v8654_v43 }
 0x522   :  { %v6565_v35 = vmul.f32 -1.442695, %v808_v34 }
 0x524   :  { %7839 = vpow2.f32 %v6565_v35 }
 0x531   :  { %v7840_v36 = vpop.eup %7839 }
 0x532   :  { %v812_v37 = vadd.f32 1.0, %v7840_v36 }
 0x534   :  { %7841 = vrcp.f32 %v812_v37 }
 0x541   :  { %v7842_v47 = vpop.eup %7841 }
 0x542   :  { %v825_v55 = vsub.f32 1.0, %v7842_v47  ;;  %v833_v58 = vmul.f32 %v7842_v47, %v831_v56 }
 0x58c   :  { %v798_v41 = vpop.permute.xlu0 %797 }
 0x58d   :  { %v800_v44 = vmul.f32 %v798_v41, %v795_v38 }
 0x58f   :  { %v8700_v45 = vadd.f32 %v803_v42, %v800_v44 }
 0x591   :  { %v836_v46 = vrot.slane %v8700_v45, 2  ;;  %v1013_v36 = vrot.slane %v8700_v45, 6 }
 0x592   :  { %v816_v48 = vpop.permute.xlu1 %815 }
 0x593   :  { %v818_v49 = vmul.f32 %v7842_v47, %v816_v48  ;;  %837 = vrot.lane.b32.xlu0 %v836_v46, %s8380_s30 }
 0x595   :  { %820 = vrot.lane.b32.xlu1 %v818_v49, %s8379_s7 }
 0x605   :  { %v838_v50 = vpop.permute.xlu0 %837 }
 0x606   :  { %7101 = vmatmul.mubr.msk.f32.vlgmr.msra.gmra.mxu0 %vm420_vm2, %v838_v50 }
 0x607   :  { %v821_v51 = vpop.permute.xlu1 %820  ;;  %7115 = vmatpush3.msra.mxu0 %v8554_v1  ;;  %7122 = vmatprep.mubr.msk.f32.mxu0 %vm8378_vm0, %v8377_v0 }
 0x608   :  { %v823_v53 = vadd.f32 %v821_v51, %v8654_v43  ;;  %7116 = vmatprep.subr.mxu0 %v8377_v0 }
 0x609   :  { %7117 = vmatpush3.msra.mxu0 %v8559_v3 }
 0x60a   :  { %7843 = vtanh.f32 %v823_v53  ;;  %7118 = vmatprep.subr.mxu0 %v8377_v0 }
 0x60b   :  { %7119 = vmatpush3.msra.mxu0 %v8566_v6 }
 0x60c   :  { %7120 = vmatprep.subr.mxu0 %v8377_v0 }
 0x60d   :  { %7121 = vmatpush3.msra.mxu0 %v8573_v8 }
 0x60e   :  { %7136 = vmatprep.subr.mxu0 %v8377_v0 }
 0x617   :  { %v7844_v54 = vpop.eup %7843 }
 0x618   :  { %827 = vrot.lane.b32.xlu0 %v7844_v54, %s8380_s30 }
 0x68a   :  { %v828_v57 = vpop.permute.xlu0 %827 }
 0x68b   :  { %v830_v59 = vmul.f32 %v828_v57, %v825_v55 }
 0x68d   :  { %v8719_v60 = vadd.f32 %v833_v58, %v830_v59 }
 0x68f   :  { %v912_v61 = vrot.slane %v8719_v60, 4  ;;  %v1043_v54 = vrot.slane %v8719_v60, 2 }
 0x691   :  { %913 = vrot.lane.b32.xlu1 %v912_v61, %s8380_s30 }
 0x6c6   :  { %v907_v62 = vpop.f32.mrf.mxu0 }
 0x6c7   :  { %v908_v63 = vadd.f32 %v8636_v17, %v907_v62 }
 0x6c8   :  { %v7102_v4 = vpop.f32.mrf.mxu0 }
 0x6c9   :  { %v988_v5 = vrot.slane %v908_v63, 4 }
 0x6cb   :  { %997 = vrot.lane.b32.xlu0 %v988_v5, %s8379_s7  ;;  %v990_v9 = vadd.f32 %v988_v5, %v8642_v23 }
 0x6cd   :  { %v6568_v10 = vmul.f32 -1.442695, %v990_v9 }
 0x6cf   :  { %7845 = vpow2.f32 %v6568_v10 }
 0x6dc   :  { %v7846_v15 = vpop.eup %7845 }
 0x6dd   :  { %v994_v16 = vadd.f32 1.0, %v7846_v15 }
 0x6df   :  { %7847 = vrcp.f32 %v994_v16 }
 0x6ec   :  { %v7848_v19 = vpop.eup %7847 }
 0x6ed   :  { %v1007_v35 = vsub.f32 1.0, %v7848_v19  ;;  %v1015_v38 = vmul.f32 %v7848_v19, %v1013_v36 }
 0x703   :  { %v914_v7 = vpop.permute.xlu1 %913 }
 0x704   :  { %7112 = vmatmul.mubr.msk.f32.vlgmr.msra.gmra.mxu1 %vm420_vm2, %v914_v7 }
 0x705   :  { %7126 = vmatpush3.msra.mxu1 %v8596_v11  ;;  %7133 = vmatprep.mubr.msk.f32.mxu1 %vm8378_vm0, %v8377_v0 }
 0x706   :  { %7127 = vmatprep.subr.mxu1 %v8377_v0 }
 0x707   :  { %7128 = vmatpush3.msra.mxu1 %v8603_v12 }
 0x708   :  { %7129 = vmatprep.subr.mxu1 %v8377_v0 }
 0x709   :  { %7130 = vmatpush3.msra.mxu1 %v8612_v13 }
 0x70a   :  { %7131 = vmatprep.subr.mxu1 %v8377_v0 }
 0x70b   :  { %7132 = vmatpush3.msra.mxu1 %v8619_v14 }
 0x70c   :  { %7147 = vmatprep.subr.mxu1 %v8377_v0 }
 0x73d   :  { %v998_v20 = vpop.permute.xlu0 %997 }
 0x73e   :  { %v1000_v21 = vmul.f32 %v7848_v19, %v998_v20 }
 0x740   :  { %1002 = vrot.lane.b32.xlu1 %v1000_v21, %s8379_s7 }
 0x7b2   :  { %v1003_v22 = vpop.permute.xlu1 %1002 }
 0x7b3   :  { %v1005_v24 = vadd.f32 %v1003_v22, %v8642_v23 }
 0x7b5   :  { %7849 = vtanh.f32 %v1005_v24 }
 0x7c2   :  { %v7850_v25 = vpop.eup %7849 }
 0x7c3   :  { %1009 = vrot.lane.b32.xlu0 %v7850_v25, %s8380_s30 }
 0x7c4   :  { %v983_v26 = vpop.f32.mrf.mxu1 }
 0x7c5   :  { %v984_v27 = vadd.f32 %v8649_v39, %v983_v26 }
 0x7c6   :  { %v7113_v28 = vpop.f32.mrf.mxu1 }
 0x7c7   :  { %v1018_v29 = vrot.slane %v984_v27, 6 }
 0x7c9   :  { %1027 = vrot.lane.b32.xlu1 %v1018_v29, %s8379_s7  ;;  %v1020_v30 = vadd.f32 %v1018_v29, %v8654_v43 }
 0x7cb   :  { %v6569_v32 = vmul.f32 -1.442695, %v1020_v30 }
 0x7cd   :  { %7851 = vpow2.f32 %v6569_v32 }
 0x7da   :  { %v7852_v33 = vpop.eup %7851 }
 0x7db   :  { %v1024_v34 = vadd.f32 1.0, %v7852_v33 }
 0x7dd   :  { %7853 = vrcp.f32 %v1024_v34 }
 0x7ea   :  { %v7854_v44 = vpop.eup %7853 }
 0x7eb   :  { %v1037_v53 = vsub.f32 1.0, %v7854_v44  ;;  %v1045_v56 = vmul.f32 %v7854_v44, %v1043_v54 }
 0x835   :  { %v1010_v37 = vpop.permute.xlu0 %1009 }
 0x836   :  { %v1012_v40 = vmul.f32 %v1010_v37, %v1007_v35 }
 0x838   :  { %v8744_v41 = vadd.f32 %v1015_v38, %v1012_v40 }
 0x83a   :  { %v1048_v42 = vrot.slane %v8744_v41, 4 }
 0x83b   :  { %v1028_v46 = vpop.permute.xlu1 %1027 }
 0x83c   :  { %v1030_v47 = vmul.f32 %v7854_v44, %v1028_v46  ;;  %1049 = vrot.lane.b32.xlu0 %v1048_v42, %s8380_s30 }
 0x83e   :  { %1032 = vrot.lane.b32.xlu1 %v1030_v47, %s8379_s7 }
 0x8ae   :  { %v1050_v48 = vpop.permute.xlu0 %1049 }
 0x8af   :  { %7123 = vmatmul.mubr.msk.f32.vlgmr.msra.gmra.mxu0 %vm420_vm2, %v1050_v48 }
 0x8b0   :  { %v1033_v49 = vpop.permute.xlu1 %1032  ;;  %7137 = vmatpush3.msra.mxu0 %v8554_v1  ;;  %7144 = vmatprep.mubr.msk.f32.mxu0 %vm8378_vm0, %v8377_v0 }
 0x8b1   :  { %v1035_v50 = vadd.f32 %v1033_v49, %v8654_v43  ;;  %7138 = vmatprep.subr.mxu0 %v8377_v0 }
 0x8b2   :  { %7139 = vmatpush3.msra.mxu0 %v8559_v3 }
 0x8b3   :  { %7855 = vtanh.f32 %v1035_v50  ;;  %7140 = vmatprep.subr.mxu0 %v8377_v0 }
 0x8b4   :  { %7141 = vmatpush3.msra.mxu0 %v8566_v6 }
 0x8b5   :  { %7142 = vmatprep.subr.mxu0 %v8377_v0 }
 0x8b6   :  { %7143 = vmatpush3.msra.mxu0 %v8573_v8 }
 0x8b7   :  { %7158 = vmatprep.subr.mxu0 %v8377_v0 }
 0x8c0   :  { %v7856_v51 = vpop.eup %7855 }
 0x8c1   :  { %1039 = vrot.lane.b32.xlu0 %v7856_v51, %s8380_s30 }
 0x933   :  { %v1040_v55 = vpop.permute.xlu0 %1039 }
 0x934   :  { %v1042_v57 = vmul.f32 %v1040_v55, %v1037_v53 }
 0x936   :  { %v8763_v58 = vadd.f32 %v1045_v56, %v1042_v57 }
 0x938   :  { %v1124_v59 = vrot.slane %v8763_v58, 2 }
 0x93a   :  { %1125 = vrot.lane.b32.xlu1 %v1124_v59, %s8380_s30 }
 0x96f   :  { %v1119_v61 = vpop.f32.mrf.mxu0 }
 0x970   :  { %v1120_v62 = vadd.f32 %v8636_v17, %v1119_v61 }
 0x971   :  { %v7124_v63 = vpop.f32.mrf.mxu0 }
 0x972   :  { %v1200_v4 = vrot.slane %v1120_v62, 2 }
 0x974   :  { %1209 = vrot.lane.b32.xlu0 %v1200_v4, %s8379_s7  ;;  %v1202_v7 = vadd.f32 %v1200_v4, %v8642_v23 }
 0x976   :  { %v6572_v9 = vmul.f32 -1.442695, %v1202_v7 }
 0x978   :  { %7857 = vpow2.f32 %v6572_v9 }
 0x985   :  { %v7858_v10 = vpop.eup %7857 }
 0x986   :  { %v1206_v15 = vadd.f32 1.0, %v7858_v10 }
 0x988   :  { %7859 = vrcp.f32 %v1206_v15 }
 0x995   :  { %v7860_v16 = vpop.eup %7859 }
 0x996   :  { %v1219_v33 = vsub.f32 1.0, %v7860_v16 }
 0x9ac   :  { %v1126_v5 = vpop.permute.xlu1 %1125 }
 0x9ad   :  { %7134 = vmatmul.mubr.msk.f32.vlgmr.msra.gmra.mxu1 %vm420_vm2, %v1126_v5 }
 0x9ae   :  { %7148 = vmatpush3.msra.mxu1 %v8596_v11  ;;  %7155 = vmatprep.mubr.msk.f32.mxu1 %vm8378_vm0, %v8377_v0 }
 0x9af   :  { %7149 = vmatprep.subr.mxu1 %v8377_v0 }
 0x9b0   :  { %7150 = vmatpush3.msra.mxu1 %v8603_v12 }
 0x9b1   :  { %7151 = vmatprep.subr.mxu1 %v8377_v0 }
 0x9b2   :  { %7152 = vmatpush3.msra.mxu1 %v8612_v13 }
 0x9b3   :  { %7153 = vmatprep.subr.mxu1 %v8377_v0 }
 0x9b4   :  { %7154 = vmatpush3.msra.mxu1 %v8619_v14 }
 0x9b5   :  { %7169 = vmatprep.subr.mxu1 %v8377_v0 }
 0x9e6   :  { %v1210_v19 = vpop.permute.xlu0 %1209 }
 0x9e7   :  { %v1212_v20 = vmul.f32 %v7860_v16, %v1210_v19 }
 0x9e9   :  { %1214 = vrot.lane.b32.xlu1 %v1212_v20, %s8379_s7 }
 0xa5b   :  { %v1215_v21 = vpop.permute.xlu1 %1214 }
 0xa5c   :  { %v1217_v22 = vadd.f32 %v1215_v21, %v8642_v23  ;;  %v1225_v23 = vrot.slane %v8744_v41, 6 }
 0xa5e   :  { %7861 = vtanh.f32 %v1217_v22  ;;  %v1227_v35 = vmul.f32 %v7860_v16, %v1225_v23 }
 0xa6b   :  { %v7862_v24 = vpop.eup %7861 }
 0xa6c   :  { %1221 = vrot.lane.b32.xlu0 %v7862_v24, %s8380_s30 }
 0xa6d   :  { %v1195_v25 = vpop.f32.mrf.mxu1 }
 0xa6e   :  { %v1196_v26 = vadd.f32 %v8649_v39, %v1195_v25 }
 0xa6f   :  { %v7135_v27 = vpop.f32.mrf.mxu1 }
 0xa70   :  { %1237 = vrot.lane.b32.xlu1 %v1196_v26, %s8379_s7  ;;  %v1229_v28 = vadd.f32 %v1196_v26, %v8654_v43 }
 0xa72   :  { %v6573_v29 = vmul.f32 -1.442695, %v1229_v28 }
 0xa74   :  { %7863 = vpow2.f32 %v6573_v29 }
 0xa81   :  { %v7864_v30 = vpop.eup %7863 }
 0xa82   :  { %v1233_v32 = vadd.f32 1.0, %v7864_v30 }
 0xa84   :  { %7865 = vrcp.f32 %v1233_v32 }
 0xa91   :  { %v7866_v38 = vpop.eup %7865 }
 0xa92   :  { %v1247_v49 = vsub.f32 1.0, %v7866_v38  ;;  %v1254_v51 = vmul.f32 %v7866_v38, %v1124_v59 }
 0xade   :  { %v1222_v34 = vpop.permute.xlu0 %1221 }
 0xadf   :  { %v1224_v36 = vmul.f32 %v1222_v34, %v1219_v33 }
 0xae1   :  { %v8790_v37 = vadd.f32 %v1227_v35, %v1224_v36 }
 0xae2   :  { %v1238_v40 = vpop.permute.xlu1 %1237 }
 0xae3   :  { %v1240_v42 = vmul.f32 %v7866_v38, %v1238_v40  ;;  %v1257_v44 = vrot.slane %v8790_v37, 6 }
 0xae5   :  { %1258 = vrot.lane.b32.xlu0 %v1257_v44, %s8380_s30  ;;  %1242 = vrot.lane.b32.xlu1 %v1240_v42, %s8379_s7 }
 0xb57   :  { %v1259_v46 = vpop.permute.xlu0 %1258  ;;  %v1243_v47 = vpop.permute.xlu1 %1242 }
 0xb58   :  { %v1245_v48 = vadd.f32 %v1243_v47, %v8654_v43  ;;  %7145 = vmatmul.mubr.msk.f32.vlgmr.msra.gmra.mxu0 %vm420_vm2, %v1259_v46 }
 0xb59   :  { %7159 = vmatpush3.msra.mxu0 %v8554_v1  ;;  %7166 = vmatprep.mubr.msk.f32.mxu0 %vm8378_vm0, %v8377_v0 }
 0xb5a   :  { %7867 = vtanh.f32 %v1245_v48  ;;  %7160 = vmatprep.subr.mxu0 %v8377_v0 }
 0xb5b   :  { %7161 = vmatpush3.msra.mxu0 %v8559_v3 }
 0xb5c   :  { %7162 = vmatprep.subr.mxu0 %v8377_v0 }
 0xb5d   :  { %7163 = vmatpush3.msra.mxu0 %v8566_v6 }
 0xb5e   :  { %7164 = vmatprep.subr.mxu0 %v8377_v0 }
 0xb5f   :  { %7165 = vmatpush3.msra.mxu0 %v8573_v8 }
 0xb60   :  { %7180 = vmatprep.subr.mxu0 %v8377_v0 }
 0xb67   :  { %v7868_v43 = vpop.eup %7867 }
 0xb68   :  { %1249 = vrot.lane.b32.xlu0 %v7868_v43, %s8380_s30 }
 0xbda   :  { %v1250_v50 = vpop.permute.xlu0 %1249 }
 0xbdb   :  { %v1252_v53 = vmul.f32 %v1250_v50, %v1247_v49 }
 0xbdd   :  { %v8812_v54 = vadd.f32 %v1254_v51, %v1252_v53 }
 0xbdf   :  { %1333 = vrot.lane.b32.xlu1 %v8812_v54, %s8380_s30  ;;  %v1460_v46 = vrot.slane %v8812_v54, 2 }
 0xc18   :  { %v1328_v55 = vpop.f32.mrf.mxu0 }
 0xc19   :  { %v1329_v56 = vadd.f32 %v8636_v17, %v1328_v55 }
 0xc1a   :  { %v7146_v57 = vpop.f32.mrf.mxu0 }
 0xc1b   :  { %1415 = vrot.lane.b32.xlu0 %v1329_v56, %s8379_s7  ;;  %v1407_v59 = vadd.f32 %v1329_v56, %v8638_v18 }
 0xc1d   :  { %v6576_v62 = vmul.f32 -1.442695, %v1407_v59 }
 0xc1f   :  { %7869 = vpow2.f32 %v6576_v62 }
 0xc2c   :  { %v7870_v63 = vpop.eup %7869 }
 0xc2d   :  { %v1411_v4 = vadd.f32 1.0, %v7870_v63 }
 0xc2f   :  { %7871 = vrcp.f32 %v1411_v4 }
 0xc3c   :  { %v7872_v5 = vpop.eup %7871 }
 0xc3d   :  { %v1425_v28 = vsub.f32 1.0, %v7872_v5  ;;  %v1432_v30 = vmul.f32 %v7872_v5, %v1257_v44 }
 0xc51   :  { %v1334_v61 = vpop.permute.xlu1 %1333 }
 0xc52   :  { %7156 = vmatmul.mubr.msk.f32.vlgmr.msra.gmra.mxu1 %vm420_vm2, %v1334_v61 }
 0xc53   :  { %7170 = vmatpush3.msra.mxu1 %v8596_v11  ;;  %7177 = vmatprep.mubr.msk.f32.mxu1 %vm8378_vm0, %v8377_v0 }
 0xc54   :  { %7171 = vmatprep.subr.mxu1 %v8377_v0 }
 0xc55   :  { %7172 = vmatpush3.msra.mxu1 %v8603_v12 }
 0xc56   :  { %7173 = vmatprep.subr.mxu1 %v8377_v0 }
 0xc57   :  { %7174 = vmatpush3.msra.mxu1 %v8612_v13 }
 0xc58   :  { %7175 = vmatprep.subr.mxu1 %v8377_v0 }
 0xc59   :  { %7176 = vmatpush3.msra.mxu1 %v8619_v14 }
 0xc5a   :  { %7191 = vmatprep.subr.mxu1 %v8377_v0 }
 0xc8d   :  { %v1416_v7 = vpop.permute.xlu0 %1415 }
 0xc8e   :  { %v1418_v9 = vmul.f32 %v7872_v5, %v1416_v7 }
 0xc90   :  { %1420 = vrot.lane.b32.xlu1 %v1418_v9, %s8379_s7 }
 0xd02   :  { %v1421_v10 = vpop.permute.xlu1 %1420 }
 0xd03   :  { %v1423_v15 = vadd.f32 %v1421_v10, %v8638_v18 }
 0xd05   :  { %7873 = vtanh.f32 %v1423_v15 }
 0xd12   :  { %v7874_v16 = vpop.eup %7873  ;;  %v1403_v19 = vpop.f32.mrf.mxu1 }
 0xd13   :  { %v1404_v20 = vadd.f32 %v8649_v39, %v1403_v19  ;;  %1427 = vrot.lane.b32.xlu0 %v7874_v16, %s8380_s30 }
 0xd14   :  { %v7157_v21 = vpop.f32.mrf.mxu1 }
 0xd15   :  { %v1435_v22 = vrot.slane %v1404_v20, 2 }
 0xd17   :  { %1444 = vrot.lane.b32.xlu1 %v1435_v22, %s8379_s7  ;;  %v1437_v24 = vadd.f32 %v1435_v22, %v8645_v31 }
 0xd19   :  { %v6577_v25 = vmul.f32 -1.442695, %v1437_v24 }
 0xd1b   :  { %7875 = vpow2.f32 %v6577_v25 }
 0xd28   :  { %v7876_v26 = vpop.eup %7875 }
 0xd29   :  { %v1441_v27 = vadd.f32 1.0, %v7876_v26 }
 0xd2b   :  { %7877 = vrcp.f32 %v1441_v27 }
 0xd38   :  { %v7878_v23 = vpop.eup %7877 }
 0xd39   :  { %v1454_v44 = vsub.f32 1.0, %v7878_v23  ;;  %v1462_v48 = vmul.f32 %v7878_v23, %v1460_v46 }
 0xd85   :  { %v1428_v29 = vpop.permute.xlu0 %1427 }
 0xd86   :  { %v1430_v32 = vmul.f32 %v1428_v29, %v1425_v28 }
 0xd88   :  { %v8838_v33 = vadd.f32 %v1432_v30, %v1430_v32 }
 0xd89   :  { %v1445_v34 = vpop.permute.xlu1 %1444 }
 0xd8a   :  { %v1447_v35 = vmul.f32 %v7878_v23, %v1445_v34  ;;  %1465 = vrot.lane.b32.xlu0 %v8838_v33, %s8380_s30  ;;  %v1641_v27 = vrot.slane %v8838_v33, 6  ;;  %v2100_v23 = vadd.f32 %v8838_v33, %v8812_v54  ;;  %v8013_v54 = vld [vmem:[%s10130_s23 + $0x10] sm:$0xff] }
 0xd8c   :  { %1449 = vrot.lane.b32.xlu1 %v1447_v35, %s8379_s7 }
 0xdfc   :  { %v1466_v36 = vpop.permute.xlu0 %1465 }
 0xdfd   :  { %7167 = vmatmul.mubr.msk.f32.vlgmr.msra.gmra.mxu0 %vm420_vm2, %v1466_v36 }
 0xdfe   :  { %v1450_v38 = vpop.permute.xlu1 %1449  ;;  %7181 = vmatpush3.msra.mxu0 %v8554_v1  ;;  %7188 = vmatprep.mubr.msk.f32.mxu0 %vm8378_vm0, %v8377_v0 }
 0xdff   :  { %v1452_v40 = vadd.f32 %v1450_v38, %v8645_v31  ;;  %7182 = vmatprep.subr.mxu0 %v8377_v0 }
 0xe00   :  { %7183 = vmatpush3.msra.mxu0 %v8559_v3 }
 0xe01   :  { %7879 = vtanh.f32 %v1452_v40  ;;  %7184 = vmatprep.subr.mxu0 %v8377_v0 }
 0xe02   :  { %7185 = vmatpush3.msra.mxu0 %v8566_v6 }
 0xe03   :  { %7186 = vmatprep.subr.mxu0 %v8377_v0 }
 0xe04   :  { %7187 = vmatpush3.msra.mxu0 %v8573_v8 }
 0xe05   :  { %7202 = vmatprep.subr.mxu0 %v8377_v0 }
 0xe0e   :  { %v7880_v42 = vpop.eup %7879 }
 0xe0f   :  { %1456 = vrot.lane.b32.xlu0 %v7880_v42, %s8380_s30 }
 0xe81   :  { %v1457_v47 = vpop.permute.xlu0 %1456 }
 0xe82   :  { %v1459_v3 = vmul.f32 %v1457_v47, %v1454_v44 }
 0xe84   :  { %v8857_v43 = vadd.f32 %v1462_v48, %v1459_v3 }
 0xe86   :  { %v1540_v49 = vrot.slane %v8857_v43, 6  ;;  %v1671_v47 = vrot.slane %v8857_v43, 2 }
 0xe88   :  { %1541 = vrot.lane.b32.xlu1 %v1540_v49, %s8380_s30 }
 0xebd   :  { %v1535_v50 = vpop.f32.mrf.mxu0 }
 0xebe   :  { %v1536_v51 = vadd.f32 %v8636_v17, %v1535_v50 }
 0xebf   :  { %v7168_v53 = vpop.f32.mrf.mxu0 }
 0xec0   :  { %v1616_v55 = vrot.slane %v1536_v51, 6 }
 0xec2   :  { %1625 = vrot.lane.b32.xlu0 %v1616_v55, %s8379_s7  ;;  %v1618_v57 = vadd.f32 %v1616_v55, %v8638_v18 }
 0xec4   :  { %v6580_v61 = vmul.f32 -1.442695, %v1618_v57 }
 0xec6   :  { %7881 = vpow2.f32 %v6580_v61 }
 0xed3   :  { %v7882_v59 = vpop.eup %7881 }
 0xed4   :  { %v1622_v62 = vadd.f32 1.0, %v7882_v59 }
 0xed6   :  { %7883 = vrcp.f32 %v1622_v62 }
 0xee3   :  { %v7884_v63 = vpop.eup %7883 }
 0xee4   :  { %v1635_v26 = vsub.f32 1.0, %v7884_v63  ;;  %v1643_v29 = vmul.f32 %v7884_v63, %v1641_v27 }
 0xefa   :  { %v1542_v56 = vpop.permute.xlu1 %1541 }
 0xefb   :  { %7178 = vmatmul.mubr.msk.f32.vlgmr.msra.gmra.mxu1 %vm420_vm2, %v1542_v56 }
 0xefc   :  { %7192 = vmatpush3.msra.mxu1 %v8596_v11  ;;  %7199 = vmatprep.mubr.msk.f32.mxu1 %vm8378_vm0, %v8377_v0 }
 0xefd   :  { %7193 = vmatprep.subr.mxu1 %v8377_v0 }
 0xefe   :  { %7194 = vmatpush3.msra.mxu1 %v8603_v12 }
 0xeff   :  { %7195 = vmatprep.subr.mxu1 %v8377_v0 }
 0xf00   :  { %7196 = vmatpush3.msra.mxu1 %v8612_v13 }
 0xf01   :  { %7197 = vmatprep.subr.mxu1 %v8377_v0 }
 0xf02   :  { %7198 = vmatpush3.msra.mxu1 %v8619_v14 }
 0xf03   :  { %7213 = vmatprep.subr.mxu1 %v8377_v0 }
 0xf34   :  { %v1626_v4 = vpop.permute.xlu0 %1625 }
 0xf35   :  { %v1628_v5 = vmul.f32 %v7884_v63, %v1626_v4 }
 0xf37   :  { %1630 = vrot.lane.b32.xlu1 %v1628_v5, %s8379_s7 }
 0xfa9   :  { %v1631_v7 = vpop.permute.xlu1 %1630 }
 0xfaa   :  { %v1633_v9 = vadd.f32 %v1631_v7, %v8638_v18 }
 0xfac   :  { %7885 = vtanh.f32 %v1633_v9 }
 0xfb9   :  { %v7886_v10 = vpop.eup %7885 }
 0xfba   :  { %1637 = vrot.lane.b32.xlu0 %v7886_v10, %s8380_s30 }
 0xfbb   :  { %v1611_v15 = vpop.f32.mrf.mxu1 }
 0xfbc   :  { %v1612_v16 = vadd.f32 %v8649_v39, %v1611_v15 }
 0xfbd   :  { %v7179_v19 = vpop.f32.mrf.mxu1 }
 0xfbe   :  { %v1646_v20 = vrot.slane %v1612_v16, 4 }
 0xfc0   :  { %1655 = vrot.lane.b32.xlu1 %v1646_v20, %s8379_s7  ;;  %v1648_v21 = vadd.f32 %v1646_v20, %v8645_v31 }
 0xfc2   :  { %v6581_v22 = vmul.f32 -1.442695, %v1648_v21 }
 0xfc4   :  { %7887 = vpow2.f32 %v6581_v22 }
 0xfd1   :  { %v7888_v24 = vpop.eup %7887 }
 0xfd2   :  { %v1652_v25 = vadd.f32 1.0, %v7888_v24 }
 0xfd4   :  { %7889 = vrcp.f32 %v1652_v25 }
 0xfe1   :  { %v7890_v36 = vpop.eup %7889 }
 0xfe2   :  { %v1665_v33 = vsub.f32 1.0, %v7890_v36  ;;  %v1673_v3 = vmul.f32 %v7890_v36, %v1671_v47 }
0x102c   :  { %v1638_v28 = vpop.permute.xlu0 %1637 }
0x102d   :  { %v1640_v30 = vmul.f32 %v1638_v28, %v1635_v26 }
0x102f   :  { %v8882_v32 = vadd.f32 %v1643_v29, %v1640_v30 }
0x1031   :  { %v2101_v34 = vadd.f32 %v8882_v32, %v8763_v58  ;;  %v1676_v35 = vrot.slane %v8882_v32, 2  ;;  %v1853_v21 = vrot.slane %v8882_v32, 6 }
0x1032   :  { %v1656_v38 = vpop.permute.xlu1 %1655 }
0x1033   :  { %v1658_v40 = vmul.f32 %v7890_v36, %v1656_v38  ;;  %1677 = vrot.lane.b32.xlu0 %v1676_v35, %s8380_s30  ;;  %v8891_v42 = vsel %vm2104_vm3, %v2100_v23, %v2101_v34 }
0x1035   :  { %1660 = vrot.lane.b32.xlu1 %v1658_v40, %s8379_s7 }
0x10a5   :  { %v1678_v44 = vpop.permute.xlu0 %1677 }
0x10a6   :  { %7189 = vmatmul.mubr.msk.f32.vlgmr.msra.gmra.mxu0 %vm420_vm2, %v1678_v44 }
0x10a7   :  { %v1661_v46 = vpop.permute.xlu1 %1660  ;;  %7203 = vmatpush3.msra.mxu0 %v8554_v1  ;;  %7210 = vmatprep.mubr.msk.f32.mxu0 %vm8378_vm0, %v8377_v0 }
0x10a8   :  { %v1663_v58 = vadd.f32 %v1661_v46, %v8645_v31  ;;  %7204 = vmatprep.subr.mxu0 %v8377_v0 }
0x10a9   :  { %7205 = vmatpush3.msra.mxu0 %v8013_v54 }
0x10aa   :  { %7891 = vtanh.f32 %v1663_v58  ;;  %7206 = vmatprep.subr.mxu0 %v8377_v0 }
0x10ab   :  { %7207 = vmatpush3.msra.mxu0 %v8566_v6 }
0x10ac   :  { %7208 = vmatprep.subr.mxu0 %v8377_v0 }
0x10ad   :  { %7209 = vmatpush3.msra.mxu0 %v8573_v8 }
0x10b7   :  { %v7892_v1 = vpop.eup %7891 }
0x10b8   :  { %1667 = vrot.lane.b32.xlu0 %v7892_v1, %s8380_s30  ;;  %v8014_v1 = vld [vmem:[#allocation8] ss:$0 sm:$0xff] }
0x112a   :  { %v1668_v48 = vpop.permute.xlu0 %1667 }
0x112b   :  { %v1670_v49 = vmul.f32 %v1668_v48, %v1665_v33 }
0x112d   :  { %v8909_v50 = vadd.f32 %v1673_v3, %v1670_v49 }
0x112f   :  { %v1752_v51 = vrot.slane %v8909_v50, 4  ;;  %v1883_v38 = vrot.slane %v8909_v50, 2 }
0x1131   :  { %1753 = vrot.lane.b32.xlu1 %v1752_v51, %s8380_s30 }
0x1166   :  { %v1747_v6 = vpop.f32.mrf.mxu0 }
0x1167   :  { %v1748_v53 = vadd.f32 %v8636_v17, %v1747_v6 }
0x1168   :  { %v7190_v55 = vpop.f32.mrf.mxu0 }
0x1169   :  { %v1828_v8 = vrot.slane %v1748_v53, 4 }
0x116b   :  { %1837 = vrot.lane.b32.xlu0 %v1828_v8, %s8379_s7  ;;  %v1830_v17 = vadd.f32 %v1828_v8, %v8638_v18 }
0x11a3   :  { %v1754_v56 = vpop.permute.xlu1 %1753 }
0x11a4   :  { %7200 = vmatmul.mubr.msk.f32.vlgmr.msra.gmra.mxu1 %vm420_vm2, %v1754_v56 }
0x11a5   :  { %7214 = vmatpush3.msra.mxu1 %v8596_v11  ;;  %7221 = vmatprep.mubr.msk.f32.mxu1 %vm8378_vm0, %v8377_v0  ;;  %v6584_v11 = vmul.f32 -1.442695, %v1830_v17 }
0x11a6   :  { %7215 = vmatprep.subr.mxu1 %v8377_v0 }
0x11a7   :  { %7216 = vmatpush3.msra.mxu1 %v8603_v12  ;;  %7893 = vpow2.f32 %v6584_v11 }
0x11a8   :  { %7217 = vmatprep.subr.mxu1 %v8377_v0 }
0x11a9   :  { %7218 = vmatpush3.msra.mxu1 %v8612_v13 }
0x11aa   :  { %7219 = vmatprep.subr.mxu1 %v8377_v0 }
0x11ab   :  { %7220 = vmatpush3.msra.mxu1 %v8619_v14 }
0x11ac   :  { %7235 = vmatprep.subr.mxu1 %v8377_v0 }
0x11b4   :  { %v7894_v57 = vpop.eup %7893 }
0x11b5   :  { %v1834_v61 = vadd.f32 1.0, %v7894_v57  ;;  %v8962_v57 = vld [vmem:[#allocation16 + $0x18] sm:$0xff] }
0x11b7   :  { %7895 = vrcp.f32 %v1834_v61  ;;  %v8964_v61 = vld [vmem:[#allocation16 + $0x10] sm:$0xff] }
0x11c4   :  { %v7896_v59 = vpop.eup %7895 }
0x11c5   :  { %v1847_v20 = vsub.f32 1.0, %v7896_v59  ;;  %v1855_v24 = vmul.f32 %v7896_v59, %v1853_v21 }
0x11dd   :  { %v1838_v62 = vpop.permute.xlu0 %1837 }
0x11de   :  { %v1840_v12 = vmul.f32 %v7896_v59, %v1838_v62  ;;  %v8968_v59 = vld [vmem:[#allocation16 + $0x8] sm:$0xff]  ;;  %v8972_v62 = vld [vmem:[#allocation16] sm:$0xff] }
0x11e0   :  { %1842 = vrot.lane.b32.xlu1 %v1840_v12, %s8379_s7 }
0x1252   :  { %v1843_v63 = vpop.permute.xlu1 %1842 }
0x1253   :  { %v1845_v13 = vadd.f32 %v1843_v63, %v8638_v18  ;;  %v8015_v63 = vld [vmem:[#allocation13] ss:$0 sm:$0xff] }
0x1255   :  { %7897 = vtanh.f32 %v1845_v13 }
0x1262   :  { %v7898_v4 = vpop.eup %7897 }
0x1263   :  { %1849 = vrot.lane.b32.xlu0 %v7898_v4, %s8380_s30 }
0x1264   :  { %v1823_v14 = vpop.f32.mrf.mxu1 }
0x1265   :  { %v1824_v5 = vadd.f32 %v8649_v39, %v1823_v14 }
0x1266   :  { %v7201_v7 = vpop.f32.mrf.mxu1 }
0x1267   :  { %v1858_v9 = vrot.slane %v1824_v5, 6 }
0x1269   :  { %1867 = vrot.lane.b32.xlu1 %v1858_v9, %s8379_s7  ;;  %v1860_v10 = vadd.f32 %v1858_v9, %v8645_v31 }
0x126b   :  { %v6585_v15 = vmul.f32 -1.442695, %v1860_v10 }
0x126d   :  { %7899 = vpow2.f32 %v6585_v15 }
0x127a   :  { %v7900_v16 = vpop.eup %7899 }
0x127b   :  { %v1864_v19 = vadd.f32 1.0, %v7900_v16 }
0x127d   :  { %7901 = vrcp.f32 %v1864_v19 }
0x128a   :  { %v7902_v28 = vpop.eup %7901 }
0x128b   :  { %v1877_v36 = vsub.f32 1.0, %v7902_v28  ;;  %v1885_v44 = vmul.f32 %v7902_v28, %v1883_v38 }
0x12d5   :  { %v1850_v22 = vpop.permute.xlu0 %1849 }
0x12d6   :  { %v1852_v25 = vmul.f32 %v1850_v22, %v1847_v20 }
0x12d8   :  { %v8934_v26 = vadd.f32 %v1855_v24, %v1852_v25 }
0x12da   :  { %v2102_v39 = vadd.f32 %v8934_v26, %v8719_v60  ;;  %v1888_v27 = vrot.slane %v8934_v26, 4  ;;  %v2065_v15 = vrot.slane %v8934_v26, 6 }
0x12db   :  { %v1868_v29 = vpop.permute.xlu1 %1867 }
0x12dc   :  { %v1870_v30 = vmul.f32 %v7902_v28, %v1868_v29  ;;  %1889 = vrot.lane.b32.xlu0 %v1888_v27, %s8380_s30  ;;  %v8942_v23 = vsel %vm2106_vm4, %v8891_v42, %v2102_v39 }
0x12de   :  { %1872 = vrot.lane.b32.xlu1 %v1870_v30, %s8379_s7 }
0x134e   :  { %v1890_v32 = vpop.permute.xlu0 %1889 }
0x134f   :  { %7211 = vmatmul.mubr.msk.f32.vlgmr.msra.gmra.mxu0 %vm420_vm2, %v1890_v32  ;;  %v2125_v32 = vld [vmem:[%s10104_s9 + $0x10] sm:$0xff] }
0x1350   :  { %v1873_v34 = vpop.permute.xlu1 %1872 }
0x1351   :  { %v1875_v35 = vadd.f32 %v1873_v34, %v8645_v31 }
0x1353   :  { %7903 = vtanh.f32 %v1875_v35 }
0x1360   :  { %v7904_v60 = vpop.eup %7903 }
0x1361   :  { %1879 = vrot.lane.b32.xlu0 %v7904_v60, %s8380_s30 }
0x13d3   :  { %v1880_v40 = vpop.permute.xlu0 %1879 }
0x13d4   :  { %v1882_v46 = vmul.f32 %v1880_v40, %v1877_v36 }
0x13d6   :  { %v8949_v42 = vadd.f32 %v1885_v44, %v1882_v46 }
0x13d8   :  { %v1964_v58 = vrot.slane %v8949_v42, 2  ;;  %v2097_v46 = vadd.f32 %v8949_v42, %v8700_v45  ;;  %v9025_v45 = vld [vmem:[#allocation17] ss:$0 sm:$0xff] }
0x13da   :  { %1965 = vrot.lane.b32.xlu1 %v1964_v58, %s8380_s30 }
0x140f   :  { %v1959_v54 = vpop.f32.mrf.mxu0 }
0x1410   :  { %v1960_v33 = vadd.f32 %v8014_v1, %v1959_v54  ;;  %v2098_v1 = vadd.f32 %v8909_v50, %v8744_v41  ;;  %v9062_v50 = vld [vmem:[%s10106_s11 + $0x18] sm:$0xff] }
0x1411   :  { %v7212_v47 = vpop.f32.mrf.mxu0 }
0x1412   :  { %v2040_v48 = vrot.slane %v1960_v33, 2  ;;  %v2099_v33 = vadd.f32 %v8857_v43, %v8790_v37  ;;  %v9037_v37 = vld [vmem:[%s10114_s19] sm:$0xff]  ;;  %v9052_v43 = vld [vmem:[%s10114_s19 + $0x8] sm:$0xff] }
0x1414   :  { %2049 = vrot.lane.b32.xlu0 %v2040_v48, %s8379_s7  ;;  %v2042_v49 = vadd.f32 %v2040_v48, %v8638_v18 }
0x1416   :  { %v6588_v51 = vmul.f32 -1.442695, %v2042_v49  ;;  %v9069_v49 = vld [vmem:[%s10106_s11 + $0x10] sm:$0xff] }
0x1418   :  { %7905 = vpow2.f32 %v6588_v51  ;;  %v9076_v51 = vld [vmem:[%s10106_s11 + $0x8] sm:$0xff] }
0x1425   :  { %v7906_v6 = vpop.eup %7905 }
0x1426   :  { %v2046_v53 = vadd.f32 1.0, %v7906_v6  ;;  %v9082_v6 = vld [vmem:[%s10106_s11] sm:$0xff] }
0x1428   :  { %7907 = vrcp.f32 %v2046_v53 }
0x1435   :  { %v7908_v55 = vpop.eup %7907 }
0x1436   :  { %v2059_v10 = vsub.f32 1.0, %v7908_v55  ;;  %v2067_v19 = vmul.f32 %v7908_v55, %v2065_v15 }
0x144c   :  { %v1966_v3 = vpop.permute.xlu1 %1965 }
0x144d   :  { %7222 = vmatmul.mubr.msk.f32.vlgmr.msra.gmra.mxu1 %vm420_vm2, %v1966_v3 }
0x144e   :  { %7243 = vmatprep.mubr.msk.f32.mxu1 %vm8378_vm0, %v8377_v0  ;;  %7236 = vmatpush3.msra.mxu1 %v8962_v57 }
0x144f   :  { %7237 = vmatprep.subr.mxu1 %v8377_v0 }
0x1450   :  { %7238 = vmatpush3.msra.mxu1 %v8964_v61 }
0x1451   :  { %7239 = vmatprep.subr.mxu1 %v8377_v0 }
0x1452   :  { %7240 = vmatpush3.msra.mxu1 %v8968_v59 }
0x1453   :  { %7241 = vmatprep.subr.mxu1 %v8377_v0 }
0x1454   :  { %7242 = vmatpush3.msra.mxu1 %v8972_v62 }
0x1455   :  { %7251 = vmatprep.subr.mxu1 %v9062_v50 }
0x1486   :  { %v2050_v8 = vpop.permute.xlu0 %2049 }
0x1487   :  { %v2052_v56 = vmul.f32 %v7908_v55, %v2050_v8  ;;  %v6590_v55 = vld [vmem:[#allocation14] ss:$0 sm:$0xff] }
0x1489   :  { %2054 = vrot.lane.b32.xlu1 %v2052_v56, %s8379_s7 }
0x14fb   :  { %v2055_v17 = vpop.permute.xlu1 %2054 }
0x14fc   :  { %v2057_v11 = vadd.f32 %v2055_v17, %v8638_v18 }
0x14fe   :  { %7909 = vtanh.f32 %v2057_v11 }
0x150b   :  { %v7910_v18 = vpop.eup %7909 }
0x150c   :  { %2061 = vrot.lane.b32.xlu0 %v7910_v18, %s8380_s30 }
0x150d   :  { %v2035_v12 = vpop.f32.mrf.mxu1 }
0x150e   :  { %v2036_v13 = vadd.f32 %v8015_v63, %v2035_v12 }
0x150f   :  { %v7223_v4 = vpop.f32.mrf.mxu1 }
0x1510   :  { %2077 = vrot.lane.b32.xlu1 %v2036_v13, %s8379_s7  ;;  %v2069_v14 = vadd.f32 %v2036_v13, %v8645_v31 }
0x1512   :  { %v6589_v5 = vmul.f32 -1.442695, %v2069_v14  ;;  %v8381_v14 = vmov 0  }
0x1513   :  { %7805 = vset.pattern.permute.xlu0 %v8381_v14  ;;  %7804 = vset.pattern.permute.xlu1 %v8381_v14 }
0x1514   :  { %7911 = vpow2.f32 %v6589_v5 }
0x1521   :  { %v7912_v7 = vpop.eup %7911 }
0x1522   :  { %v2073_v9 = vadd.f32 1.0, %v7912_v7 }
0x1524   :  { %7913 = vrcp.f32 %v2073_v9 }
0x1531   :  { %v7914_v22 = vpop.eup %7913 }
0x1532   :  { %v2087_v35 = vsub.f32 1.0, %v7914_v22  ;;  %v2094_v36 = vmul.f32 %v7914_v22, %v1964_v58 }
0x157e   :  { %v2062_v16 = vpop.permute.xlu0 %2061 }
0x157f   :  { %v2064_v20 = vmul.f32 %v2062_v16, %v2059_v10 }
0x1581   :  { %v8981_v21 = vadd.f32 %v2067_v19, %v2064_v20 }
0x1582   :  { %v2078_v24 = vpop.permute.xlu1 %2077 }
0x1583   :  { %v2103_v25 = vadd.f32 %v8981_v21, %v8675_v2  ;;  %v2080_v39 = vmul.f32 %v7914_v22, %v2078_v24  ;;  %v2250_v27 = vrot.slane %v8981_v21, 6  ;;  %v2126_v2 = vld [vmem:[%s10104_s9 + $0x18] sm:$0xff] }
0x1584   :  { %7224 = vmatprep.subr.mxu0 %v2126_v2 }
0x1585   :  { %2251 = vrot.lane.b32.xlu0 %v2250_v27, %s8380_s30  ;;  %2082 = vrot.lane.b32.xlu1 %v2080_v39, %s8379_s7  ;;  %v2112_v26 = vsel %vm2108_vm5, %v8942_v23, %v2103_v25  ;;  %v2124_v23 = vld [vmem:[%s10104_s9 + $0x8] sm:$0xff] }
0x1586   :  { %7225 = vmatpush3.msra.mxu0 %v2126_v2 }
0x1587   :  { %7226 = vmatprep.subr.mxu0 %v2125_v32 }
0x1588   :  { %7227 = vmatpush3.msra.mxu0 %v2125_v32 }
0x1589   :  { %7228 = vmatprep.subr.mxu0 %v2124_v23 }
0x158a   :  { %7229 = vmatpush3.msra.mxu0 %v2124_v23 }
0x15f7   :  { %v2252_v28 = vpop.permute.xlu0 %2251  ;;  %v2083_v29 = vpop.permute.xlu1 %2082 }
0x15f8   :  { %v2085_v30 = vadd.f32 %v2083_v29, %v8645_v31  ;;  %7244 = vmatmul.mubr.msk.f32.vlgmr.msra.gmra.mxu1 %vm420_vm2, %v2252_v28  ;;  %v2123_v31 = vld [vmem:[%s10104_s9] sm:$0xff] }
0x15f9   :  { %7230 = vmatprep.subr.mxu0 %v2123_v31  ;;  %7252 = vmatpush3.msra.mxu1 %v9062_v50 }
0x15fa   :  { %7915 = vtanh.f32 %v2085_v30  ;;  %7231 = vmatpush3.msra.mxu0 %v2123_v31  ;;  %7253 = vmatprep.subr.mxu1 %v9069_v49 }
0x15fb   :  { %7254 = vmatpush3.msra.mxu1 %v9069_v49 }
0x15fc   :  { %7255 = vmatprep.subr.mxu1 %v9076_v51 }
0x15fd   :  { %7256 = vmatpush3.msra.mxu1 %v9076_v51 }
0x15fe   :  { %7257 = vmatprep.subr.mxu1 %v9082_v6 }
0x15ff   :  { %7258 = vmatpush3.msra.mxu1 %v9082_v6 }
0x1600   :  { %7284 = vmatprep.subr.mxu1 %v8377_v0 }
0x1607   :  { %v7916_v34 = vpop.eup %7915 }
0x1608   :  { %2089 = vrot.lane.b32.xlu0 %v7916_v34, %s8380_s30 }
0x160c   :  { %2117 = vrot.lane.b32.xlu0 %v2112_v26, %s8380_s30 }
0x167a   :  { %v2090_v60 = vpop.permute.xlu0 %2089 }
0x167b   :  { %v2092_v38 = vmul.f32 %v2090_v60, %v2087_v35 }
0x167d   :  { %v2095_v40 = vadd.f32 %v2094_v36, %v2092_v38  ;;  %v9114_v36 = vld [vmem:[#allocation22] sm:$0x3]  ;;  %v8382_v38 = vmov 32  }
0x167e   :  { %v9010_v44 = vpop.permute.xlu0 %2117 }
0x167f   :  { %v2096_v54 = vadd.f32 %v2095_v40, %v8657_v52  ;;  %2122 = vst.msk [vmem:[#allocation24 + $0x8] sm:$0xff] %vm420_vm2, %v9010_v44  ;;  %v9106_v32 = vsel %vm420_vm2, %v9010_v44, 1.0 }
0x1681   :  { %v2105_v58 = vsel %vm2104_vm3, %v2096_v54, %v2097_v46  ;;  %v9126_v54 = vld [vmem:[%s10109_s14 + $0x28] sm:$0xff] }
0x1682   :  { %v2107_v47 = vsel %vm2106_vm4, %v2105_v58, %v2098_v1  ;;  %v9131_v1 = vld [vmem:[%s10109_s14 + $0x20] sm:$0xff]  ;;  %v9146_v58 = vld [vmem:[%s10109_s14 + $0x10] sm:$0xff] }
0x1683   :  { %v2109_v48 = vsel %vm2108_vm5, %v2107_v47, %v2099_v33  ;;  %v9138_v33 = vld [vmem:[%s10109_s14 + $0x18] sm:$0xff]  ;;  %v9153_v47 = vld [vmem:[%s10109_s14 + $0x8] sm:$0xff] }
0x1684   :  { %2115 = vrot.lane.b32.xlu1 %v2109_v48, %s8380_s30  ;;  %v9162_v48 = vld [vmem:[%s10109_s14] sm:$0xff] }
0x16b8   :  { %v2321_v52 = vpop.f32.mrf.mxu1 }
0x16b9   :  { %v9028_v42 = vadd.f32 %v9025_v45, %v2321_v52 }
0x16ba   :  { %v7245_v3 = vpop.f32.mrf.mxu1 }
0x16bb   :  { %7246 = vmatprep.subr.msk.mxu0 %vm2104_vm3, %v9028_v42 }
0x16f6   :  { %v9032_v41 = vpop.permute.xlu1 %2115 }
0x16f7   :  { %2121 = vst.msk [vmem:[#allocation24] sm:$0xff] %vm420_vm2, %v9032_v41  ;;  %7232 = vmatprep.mubr.msk.f32.mxu0 %vm420_vm2, %v9032_v41  ;;  %v9111_v35 = vsel %vm420_vm2, %v9032_v41, 1.0 }
0x16f8   :  { %7233 = vmatmul.mubr.msk.f32.vlgmr.msra.gmra.mxu0 %vm420_vm2, %v9010_v44 }
0x16f9   :  { %7247 = vmatpush3.msk.msra.mxu0 %vm2104_vm3, %v9028_v42  ;;  %7248 = vmatprep.mubr.msk.f32.mxu0 %vm2325_vm6, %v9037_v37 }
0x16fa   :  { %7262 = vmatprep.subr.mxu0 %v8377_v0 }
0x16fc   :  { %7249 = vmatmul.mubr.msk.f32.vlgmr.msra.gmra.mxu0 %vm2325_vm6, %v9052_v43 }
0x16fd   :  { %7266 = vmatprep.mubr.msk.f32.mxu0 %vm8378_vm0, %v8377_v0 }
0x17b8   :  { %v7234_v53 = vpop.f32.mrf.mxu0 }
0x17b9   :  { %v9088_v56 = vadd.f32 %v7234_v53, %v6590_v55 }
0x17ba   :  { %v2204_v8 = vpop.f32.mrf.mxu0 }
0x17bb   :  { %v9090_v11 = vadd.f32 %v6590_v55, %v2204_v8 }
0x17bc   :  { %v7250_v17 = vpop.f32.mrf.mxu0 }
0x17bd   :  { %v2411_v18 = vadd.f32 %v7250_v17, %v9088_v56 }
0x17be   :  { %v2401_v12 = vpop.f32.mrf.mxu0 }
0x17bf   :  { %v2410_v63 = vadd.f32 %v2401_v12, %v9090_v11  ;;  %v2413_v4 = vmax.f32 %v2411_v18, 0.0 }
0x17c1   :  { %v2412_v13 = vmax.f32 %v2410_v63, 0.0 }
0x17c3   :  { %7259 = vmatprep.mubr.msk.f32.mxu1 %vm420_vm2, %v2412_v13 }
0x17c4   :  { %7260 = vmatmul.mubr.msk.f32.vlgmr.msra.gmra.mxu1 %vm420_vm2, %v2413_v4 }
0x17c5   :  { %7300 = vmatprep.mubr.msk.f32.mxu1 %vm8378_vm0, %v8377_v0 }
0x1884   :  { %v7261_v5 = vpop.f32.mrf.mxu1 }
0x1885   :  { %v2497_v9 = vsel %vm2495_vm7, %v7261_v5, -inf }
0x1886   :  { %v2486_v7 = vpop.f32.mrf.mxu1 }
0x1887   :  { %v2496_v10 = vsel %vm2495_vm7, %v2486_v7, -inf }
0x1888   :  { %v2498_v15 = vmax.f32 %v2496_v10, %v2497_v9 }
0x188a   :  { %v2499_v16 = vrot.slane %v2498_v15, 4 }
0x188c   :  { %v2500_v19 = vmax.f32 %v2498_v15, %v2499_v16  ;;  %v9188_v16 = vld [vmem:[%s10111_s16 + $0x38] sm:$0xff] }
0x188d   :  { %7285 = vmatpush3.msra.mxu1 %v9188_v16 }
0x188e   :  { %v2501_v20 = vrot.slane %v2500_v19, 2  ;;  %7286 = vmatprep.subr.mxu1 %v8377_v0 }
0x1890   :  { %v2502_v22 = vmax.f32 %v2500_v19, %v2501_v20  ;;  %v9193_v19 = vld [vmem:[%s10111_s16 + $0x30] sm:$0xff]  ;;  %v9200_v20 = vld [vmem:[%s10111_s16 + $0x28] sm:$0xff] }
0x1891   :  { %7287 = vmatpush3.msra.mxu1 %v9193_v19 }
0x1892   :  { %v2503_v24 = vrot.slane %v2502_v22, 1  ;;  %7288 = vmatprep.subr.mxu1 %v8377_v0 }
0x1893   :  { %7289 = vmatpush3.msra.mxu1 %v9200_v20 }
0x1894   :  { %v2504_v25 = vmax.f32 %v2502_v22, %v2503_v24  ;;  %v9207_v22 = vld [vmem:[%s10111_s16 + $0x20] sm:$0xff]  ;;  %7290 = vmatprep.subr.mxu1 %v8377_v0  ;;  %v9214_v24 = vld [vmem:[%s10111_s16 + $0x18] sm:$0xff] }
0x1895   :  { %7291 = vmatpush3.msra.mxu1 %v9207_v22 }
0x1896   :  { %v2505_v39 = vsub.f32 %v2486_v7, %v2504_v25  ;;  %v2506_v26 = vsub.f32 %v7261_v5, %v2504_v25  ;;  %7292 = vmatprep.subr.mxu1 %v8377_v0 }
0x1897   :  { %7293 = vmatpush3.msra.mxu1 %v9214_v24 }
0x1898   :  { %v2507_v28 = vmul.f32 1.442695, %v2505_v39  ;;  %v2509_v29 = vmul.f32 1.442695, %v2506_v26  ;;  %v9221_v39 = vld [vmem:[%s10111_s16 + $0x10] sm:$0xff]  ;;  %7294 = vmatprep.subr.mxu1 %v8377_v0  ;;  %v9229_v26 = vld [vmem:[%s10111_s16 + $0x8] sm:$0xff] }
0x1899   :  { %7295 = vmatpush3.msra.mxu1 %v9221_v39 }
0x189a   :  { %7917 = vpow2.f32 %v2507_v28  ;;  %7296 = vmatprep.subr.mxu1 %v8377_v0  ;;  %v9239_v28 = vld [vmem:[%s10111_s16] sm:$0xff] }
0x189b   :  { %7919 = vpow2.f32 %v2509_v29  ;;  %7297 = vmatpush3.msra.mxu1 %v9229_v26 }
0x189c   :  { %7298 = vmatprep.subr.mxu1 %v8377_v0 }
0x189d   :  { %7299 = vmatpush3.msra.mxu1 %v9239_v28 }
0x18a7   :  { %v7918_v30 = vpop.eup %7917 }
0x18a8   :  { %v7920_v2 = vpop.eup %7919  ;;  %2513 = vperm.xlu0 %7805, %v7918_v30  }
0x18a9   :  { %2518 = vperm.xlu1 %7804, %v7920_v2  }
0x18ac   :  { %2688 = vrot.lane.b32.xlu0 %v9028_v42, %s8380_s30 }
0x18ad   :  { %7806 = vset.pattern.permute.xlu1 %v8382_v38 }
0x1923   :  { %v2514_v34 = vpop.permute.xlu0 %2513 }
0x1924   :  { %v2519_v23 = vpop.permute.xlu1 %2518  ;;  %v2521_v60 = vmul.f32 %v2514_v34, %v9111_v35 }
0x1925   :  { %v2522_v31 = vmul.f32 %v2519_v23, %v9106_v32 }
0x1927   :  { %7263 = vmatpush3.msra.mxu0 %v2522_v31  ;;  %v2689_v17 = vpop.permute.xlu0 %2688 }
0x1928   :  { %7264 = vmatprep.subr.mxu0 %v8377_v0 }
0x1929   :  { %7265 = vmatpush3.msra.mxu0 %v2521_v60 }
0x192a   :  { %7267 = vmatmul.mubr.msk.f32.vlgmr.msra.gmra.mxu0 %vm238_vm1, %v9114_v36  ;;  %7269 = vmatprep.subr.mxu0 %v8377_v0 }
0x192b   :  { %7281 = vmatprep.mubr.msk.f32.mxu0 %vm8378_vm0, %v8377_v0  ;;  %7270 = vmatpush3.msra.mxu0 %v9126_v54 }
0x192c   :  { %7271 = vmatprep.subr.mxu0 %v8377_v0 }
0x192d   :  { %7272 = vmatpush3.msra.mxu0 %v9131_v1 }
0x192e   :  { %7273 = vmatprep.subr.mxu0 %v8377_v0 }
0x192f   :  { %7274 = vmatpush3.msra.mxu0 %v9138_v33 }
0x1930   :  { %7275 = vmatprep.subr.mxu0 %v8377_v0 }
0x1931   :  { %7276 = vmatpush3.msra.mxu0 %v9146_v58 }
0x1932   :  { %7277 = vmatprep.subr.mxu0 %v8377_v0 }
0x1933   :  { %7278 = vmatpush3.msra.mxu0 %v9153_v47 }
0x1934   :  { %7279 = vmatprep.subr.mxu0 %v8377_v0 }
0x1935   :  { %7280 = vmatpush3.msra.mxu0 %v9162_v48 }
0x1936   :  { %7303 = vmatprep.subr.mxu0 %v8377_v0 }
0x19ea   :  { %v2592_v40 = vpop.f32.mrf.mxu0 }
0x19eb   :  { %7921 = vrcp.f32 %v2592_v40 }
0x19ec   :  { %v7268_v44 = vpop.f32.mrf.mxu0 }
0x19f8   :  { %v7922_v46 = vpop.eup %7921 }
0x19f9   :  { %2599 = vperm.xlu1 %7806, %v7922_v46  }
0x19fd   :  { %7807 = vset.pattern.permute.xlu1 %v8381_v14 }
0x1a74   :  { %v2600_v52 = vpop.permute.xlu1 %2599 }
0x1a75   :  { %v2602_v3 = vmul.f32 %v2600_v52, %v2592_v40 }
0x1a77   :  { %2604 = vrot.lane.b32.xlu1 %v2602_v3, %s8383_s17 }
0x1a7b   :  { %2698 = vrot.lane.b32.xlu1 %v9028_v42, %s8384_s3  ;;  %v9181_v42 = vld [vmem:[#allocation19] ss:$0 sm:$0xff] }
0x1ae9   :  { %v2605_v41 = vpop.permute.xlu1 %2604 }
0x1aea   :  { %v2607_v53 = vsel %vm238_vm1, 0.0, %v2605_v41 }
0x1aeb   :  { %7282 = vmatmul.mubr.msk.f32.vlgmr.msra.gmra.mxu0 %vm2614_vm8, %v2607_v53 }
0x1aec   :  { %7304 = vmatpush3.msra.mxu0 %v8962_v57  ;;  %7311 = vmatprep.mubr.msk.f32.mxu0 %vm8378_vm0, %v8377_v0 }
0x1aed   :  { %7305 = vmatprep.subr.mxu0 %v8377_v0  ;;  %v2699_v7 = vpop.permute.xlu1 %2698 }
0x1aee   :  { %7306 = vmatpush3.msra.mxu0 %v8964_v61 }
0x1aef   :  { %7307 = vmatprep.subr.mxu0 %v8377_v0 }
0x1af0   :  { %7308 = vmatpush3.msra.mxu0 %v8968_v59 }
0x1af1   :  { %7309 = vmatprep.subr.mxu0 %v8377_v0 }
0x1af2   :  { %7310 = vmatpush3.msra.mxu0 %v8972_v62 }
0x1af3   :  { %7319 = vmatprep.subr.mxu0 %v9062_v50 }
0x1bab   :  { %v2684_v55 = vpop.f32.mrf.mxu0 }
0x1bac   :  { %v2685_v8 = vadd.f32 %v9181_v42, %v2684_v55 }
0x1bad   :  { %v7283_v18 = vpop.f32.mrf.mxu0 }
0x1bae   :  { %v2691_v12 = vadd.f32 %v2689_v17, %v2685_v8 }
0x1bb0   :  { %v6603_v63 = vmul.f32 -1.442695, %v2691_v12 }
0x1bb2   :  { %7923 = vpow2.f32 %v6603_v63 }
0x1bbf   :  { %v7924_v13 = vpop.eup %7923 }
0x1bc0   :  { %v2695_v4 = vadd.f32 1.0, %v7924_v13 }
0x1bc2   :  { %7925 = vrcp.f32 %v2695_v4 }
0x1bcf   :  { %v7926_v5 = vpop.eup %7925 }
0x1bd0   :  { %v2701_v9 = vmul.f32 %v7926_v5, %v2699_v7  ;;  %v2708_v29 = vsub.f32 1.0, %v7926_v5  ;;  %v2715_v2 = vmul.f32 %v7926_v5, %v2250_v27 }
0x1bd2   :  { %2703 = vrot.lane.b32.xlu0 %v2701_v9, %s8379_s7 }
0x1c44   :  { %v2704_v10 = vpop.permute.xlu0 %2703 }
0x1c45   :  { %v2706_v15 = vadd.f32 %v2704_v10, %v2685_v8 }
0x1c47   :  { %7927 = vtanh.f32 %v2706_v15 }
0x1c54   :  { %v7928_v25 = vpop.eup %7927 }
0x1c55   :  { %2710 = vrot.lane.b32.xlu1 %v7928_v25, %s8380_s30 }
0x1c59   :  { %2721 = vrot.lane.b32.xlu1 %v2602_v3, %s8384_s3 }
0x1cc7   :  { %v2711_v30 = vpop.permute.xlu1 %2710 }
0x1cc8   :  { %v2713_v23 = vmul.f32 %v2711_v30, %v2708_v29 }
0x1cca   :  { %v9244_v34 = vadd.f32 %v2715_v2, %v2713_v23 }
0x1ccb   :  { %v2722_v31 = vpop.permute.xlu1 %2721 }
0x1ccc   :  { %2718 = vrot.lane.b32.xlu0 %v9244_v34, %s8380_s30 }
0x1d3e   :  { %v2719_v60 = vpop.permute.xlu0 %2718 }
0x1d3f   :  { %v2724_v40 = vsel %vm420_vm2, %v2719_v60, %v2722_v31  ;;  %7312 = vmatmul.mubr.msk.f32.vlgmr.msra.gmra.mxu0 %vm420_vm2, %v2719_v60 }
0x1d40   :  { %7301 = vmatmul.mubr.msk.f32.vlgmr.msra.gmra.mxu1 %vm2731_vm9, %v2724_v40  ;;  %7320 = vmatpush3.msra.mxu0 %v9062_v50 }
0x1d41   :  { %7316 = vmatprep.mubr.msk.f32.mxu1 %vm2325_vm6, %v9037_v37  ;;  %7321 = vmatprep.subr.mxu0 %v9069_v49 }
0x1d42   :  { %7322 = vmatpush3.msra.mxu0 %v9069_v49 }
0x1d43   :  { %7323 = vmatprep.subr.mxu0 %v9076_v51 }
0x1d44   :  { %7324 = vmatpush3.msra.mxu0 %v9076_v51 }
0x1d45   :  { %7325 = vmatprep.subr.mxu0 %v9082_v6 }
0x1d46   :  { %7326 = vmatpush3.msra.mxu0 %v9082_v6 }
0x1d47   :  { %7352 = vmatprep.subr.mxu0 %v8377_v0 }
0x1dff   :  { %v2873_v21 = vpop.f32.mrf.mxu0 }
0x1e00   :  { %v9262_v27 = vadd.f32 %v9025_v45, %v2873_v21  ;;  %v9264_v44 = vpop.f32.mrf.mxu1 }
0x1e01   :  { %v7313_v46 = vpop.f32.mrf.mxu0 }
0x1e02   :  { %v7302_v52 = vpop.f32.mrf.mxu1  ;;  %7314 = vmatprep.subr.msk.mxu1 %vm2104_vm3, %v9262_v27 }
0x1e03   :  { %7315 = vmatpush3.msk.msra.mxu1 %vm2104_vm3, %v9262_v27 }
0x1e04   :  { %7317 = vmatmul.mubr.msk.f32.vlgmr.msra.gmra.mxu1 %vm2325_vm6, %v9052_v43  ;;  %7330 = vmatprep.subr.mxu1 %v8377_v0 }
0x1e05   :  { %7334 = vmatprep.mubr.msk.f32.mxu1 %vm8378_vm0, %v8377_v0 }
0x1ec4   :  { %v7318_v3 = vpop.f32.mrf.mxu1 }
0x1ec5   :  { %v2956_v41 = vadd.f32 %v7318_v3, %v9088_v56 }
0x1ec6   :  { %v2946_v53 = vpop.f32.mrf.mxu1 }
0x1ec7   :  { %v2955_v55 = vadd.f32 %v2946_v53, %v9090_v11  ;;  %v2958_v17 = vmax.f32 %v2956_v41, 0.0 }
0x1ec9   :  { %v2957_v8 = vmax.f32 %v2955_v55, 0.0 }
0x1ecb   :  { %7327 = vmatprep.mubr.msk.f32.mxu0 %vm420_vm2, %v2957_v8 }
0x1ecc   :  { %7328 = vmatmul.mubr.msk.f32.vlgmr.msra.gmra.mxu0 %vm420_vm2, %v2958_v17  ;;  %v9325_v17 = vld [vmem:[#allocation20] ss:$0 sm:$0xff] }
0x1ecd   :  { %7353 = vmatpush3.msra.mxu0 %v9188_v16  ;;  %7368 = vmatprep.mubr.msk.f32.mxu0 %vm8378_vm0, %v8377_v0 }
0x1ece   :  { %7354 = vmatprep.subr.mxu0 %v8377_v0 }
0x1ecf   :  { %7355 = vmatpush3.msra.mxu0 %v9193_v19 }
0x1ed0   :  { %7356 = vmatprep.subr.mxu0 %v8377_v0 }
0x1ed1   :  { %7357 = vmatpush3.msra.mxu0 %v9200_v20 }
0x1ed2   :  { %7358 = vmatprep.subr.mxu0 %v8377_v0 }
0x1ed3   :  { %7359 = vmatpush3.msra.mxu0 %v9207_v22 }
0x1ed4   :  { %7360 = vmatprep.subr.mxu0 %v8377_v0 }
0x1ed5   :  { %7361 = vmatpush3.msra.mxu0 %v9214_v24 }
0x1ed6   :  { %7362 = vmatprep.subr.mxu0 %v8377_v0 }
0x1ed7   :  { %7363 = vmatpush3.msra.mxu0 %v9221_v39 }
0x1ed8   :  { %7364 = vmatprep.subr.mxu0 %v8377_v0 }
0x1ed9   :  { %7365 = vmatpush3.msra.mxu0 %v9229_v26 }
0x1eda   :  { %7366 = vmatprep.subr.mxu0 %v8377_v0 }
0x1edb   :  { %7367 = vmatpush3.msra.mxu0 %v9239_v28 }
0x1f8c   :  { %v7329_v18 = vpop.f32.mrf.mxu0 }
0x1f8d   :  { %v3041_v63 = vsel %vm2495_vm7, %v7329_v18, -inf }
0x1f8e   :  { %v3031_v12 = vpop.f32.mrf.mxu0 }
0x1f8f   :  { %v3040_v13 = vsel %vm2495_vm7, %v3031_v12, -inf }
0x1f90   :  { %v3042_v4 = vmax.f32 %v3040_v13, %v3041_v63 }
0x1f92   :  { %v3043_v5 = vrot.slane %v3042_v4, 4 }
0x1f94   :  { %v3044_v7 = vmax.f32 %v3042_v4, %v3043_v5 }
0x1f96   :  { %v3045_v9 = vrot.slane %v3044_v7, 2 }
0x1f98   :  { %v3046_v10 = vmax.f32 %v3044_v7, %v3045_v9 }
0x1f9a   :  { %v3047_v15 = vrot.slane %v3046_v10, 1 }
0x1f9c   :  { %v3048_v25 = vmax.f32 %v3046_v10, %v3047_v15 }
0x1f9e   :  { %v3049_v29 = vsub.f32 %v3031_v12, %v3048_v25  ;;  %v3050_v30 = vsub.f32 %v7329_v18, %v3048_v25  ;;  %v9329_v18 = vadd.f32 %v9325_v17, %v9264_v44 }
0x1fa0   :  { %v3051_v2 = vmul.f32 1.442695, %v3049_v29  ;;  %v3053_v23 = vmul.f32 1.442695, %v3050_v30 }
0x1fa2   :  { %7929 = vpow2.f32 %v3051_v2 }
0x1fa3   :  { %7931 = vpow2.f32 %v3053_v23 }
0x1faf   :  { %v7930_v31 = vpop.eup %7929 }
0x1fb0   :  { %v7932_v60 = vpop.eup %7931  ;;  %3057 = vperm.xlu1 %7807, %v7930_v31  }
0x1fb1   :  { %3062 = vperm.xlu0 %7805, %v7932_v60  }
0x1fb5   :  { %7808 = vset.pattern.permute.xlu0 %v8382_v38 }
0x202b   :  { %v3058_v21 = vpop.permute.xlu1 %3057 }
0x202c   :  { %v3063_v40 = vpop.permute.xlu0 %3062  ;;  %v3065_v52 = vmul.f32 %v3058_v21, %v9111_v35 }
0x202d   :  { %v3066_v46 = vmul.f32 %v3063_v40, %v9106_v32 }
0x202f   :  { %7331 = vmatpush3.msra.mxu1 %v3066_v46 }
0x2030   :  { %7332 = vmatprep.subr.mxu1 %v8377_v0 }
0x2031   :  { %7333 = vmatpush3.msra.mxu1 %v3065_v52 }
0x2032   :  { %7335 = vmatmul.mubr.msk.f32.vlgmr.msra.gmra.mxu1 %vm238_vm1, %v9114_v36  ;;  %7337 = vmatprep.subr.mxu1 %v8377_v0 }
0x2033   :  { %7338 = vmatpush3.msra.mxu1 %v9126_v54  ;;  %7349 = vmatprep.mubr.msk.f32.mxu1 %vm8378_vm0, %v8377_v0 }
0x2034   :  { %7339 = vmatprep.subr.mxu1 %v8377_v0 }
0x2035   :  { %7340 = vmatpush3.msra.mxu1 %v9131_v1 }
0x2036   :  { %7341 = vmatprep.subr.mxu1 %v8377_v0 }
0x2037   :  { %7342 = vmatpush3.msra.mxu1 %v9138_v33 }
0x2038   :  { %7343 = vmatprep.subr.mxu1 %v8377_v0 }
0x2039   :  { %7344 = vmatpush3.msra.mxu1 %v9146_v58 }
0x203a   :  { %7345 = vmatprep.subr.mxu1 %v8377_v0 }
0x203b   :  { %7346 = vmatpush3.msra.mxu1 %v9153_v47 }
0x203c   :  { %7347 = vmatprep.subr.mxu1 %v8377_v0 }
0x203d   :  { %7348 = vmatpush3.msra.mxu1 %v9162_v48 }
0x203e   :  { %7371 = vmatprep.subr.mxu1 %v8377_v0 }
0x20f2   :  { %v3133_v3 = vpop.f32.mrf.mxu1 }
0x20f3   :  { %7933 = vrcp.f32 %v3133_v3 }
0x20f4   :  { %v7336_v41 = vpop.f32.mrf.mxu1 }
0x2100   :  { %v7934_v53 = vpop.eup %7933 }
0x2101   :  { %3140 = vperm.xlu0 %7808, %v7934_v53  }
0x2105   :  { %3232 = vrot.lane.b32.xlu0 %v9262_v27, %s8384_s3 }
0x2106   :  { %7809 = vset.pattern.permute.xlu0 %v8381_v14 }
0x217c   :  { %v3141_v55 = vpop.permute.xlu0 %3140 }
0x217d   :  { %v3143_v8 = vmul.f32 %v3141_v55, %v3133_v3 }
0x217f   :  { %3145 = vrot.lane.b32.xlu1 %v3143_v8, %s8383_s17 }
0x2180   :  { %v3233_v25 = vpop.permute.xlu0 %3232 }
0x2183   :  { %3222 = vrot.lane.b32.xlu1 %v9262_v27, %s8380_s30 }
0x21f1   :  { %v3146_v12 = vpop.permute.xlu1 %3145 }
0x21f2   :  { %v3148_v63 = vsel %vm238_vm1, %v9329_v18, %v3146_v12 }
0x21f3   :  { %7350 = vmatmul.mubr.msk.f32.vlgmr.msra.gmra.mxu1 %vm2614_vm8, %v3148_v63 }
0x21f4   :  { %7372 = vmatpush3.msra.mxu1 %v8962_v57  ;;  %7379 = vmatprep.mubr.msk.f32.mxu1 %vm8378_vm0, %v8377_v0 }
0x21f5   :  { %7373 = vmatprep.subr.mxu1 %v8377_v0  ;;  %v3223_v13 = vpop.permute.xlu1 %3222 }
0x21f6   :  { %7374 = vmatpush3.msra.mxu1 %v8964_v61 }
0x21f7   :  { %7375 = vmatprep.subr.mxu1 %v8377_v0 }
0x21f8   :  { %7376 = vmatpush3.msra.mxu1 %v8968_v59 }
0x21f9   :  { %7377 = vmatprep.subr.mxu1 %v8377_v0 }
0x21fa   :  { %7378 = vmatpush3.msra.mxu1 %v8972_v62 }
0x21fb   :  { %7387 = vmatprep.subr.mxu1 %v9062_v50 }
0x22b3   :  { %v3218_v27 = vpop.f32.mrf.mxu1 }
0x22b4   :  { %v3219_v44 = vadd.f32 %v9181_v42, %v3218_v27 }
0x22b5   :  { %v7351_v4 = vpop.f32.mrf.mxu1 }
0x22b6   :  { %v3225_v5 = vadd.f32 %v3223_v13, %v3219_v44 }
0x22b8   :  { %v6614_v7 = vmul.f32 -1.442695, %v3225_v5 }
0x22ba   :  { %7935 = vpow2.f32 %v6614_v7 }
0x22c7   :  { %v7936_v9 = vpop.eup %7935 }
0x22c8   :  { %v3229_v10 = vadd.f32 1.0, %v7936_v9 }
0x22ca   :  { %7937 = vrcp.f32 %v3229_v10 }
0x22d7   :  { %v7938_v15 = vpop.eup %7937 }
0x22d8   :  { %v3235_v29 = vmul.f32 %v7938_v15, %v3233_v25  ;;  %v3242_v31 = vsub.f32 1.0, %v7938_v15  ;;  %v3248_v40 = vmul.f32 %v7938_v15, %v9244_v34 }
0x22da   :  { %3237 = vrot.lane.b32.xlu1 %v3235_v29, %s8379_s7 }
0x234c   :  { %v3238_v30 = vpop.permute.xlu1 %3237 }
0x234d   :  { %v3240_v2 = vadd.f32 %v3238_v30, %v3219_v44 }
0x234f   :  { %7939 = vtanh.f32 %v3240_v2 }
0x235c   :  { %v7940_v23 = vpop.eup %7939 }
0x235d   :  { %3244 = vrot.lane.b32.xlu0 %v7940_v23, %s8380_s30 }
0x2361   :  { %3254 = vrot.lane.b32.xlu0 %v3143_v8, %s8384_s3 }
0x23cf   :  { %v3245_v60 = vpop.permute.xlu0 %3244 }
0x23d0   :  { %v3247_v21 = vmul.f32 %v3245_v60, %v3242_v31 }
0x23d2   :  { %v9349_v46 = vadd.f32 %v3248_v40, %v3247_v21 }
0x23d3   :  { %v3255_v52 = vpop.permute.xlu0 %3254 }
0x23d4   :  { %3251 = vrot.lane.b32.xlu1 %v9349_v46, %s8380_s30 }
0x2446   :  { %v3252_v3 = vpop.permute.xlu1 %3251 }
0x2447   :  { %v3257_v41 = vsel %vm420_vm2, %v3252_v3, %v3255_v52  ;;  %7380 = vmatmul.mubr.msk.f32.vlgmr.msra.gmra.mxu1 %vm420_vm2, %v3252_v3 }
0x2448   :  { %7369 = vmatmul.mubr.msk.f32.vlgmr.msra.gmra.mxu0 %vm2731_vm9, %v3257_v41  ;;  %7388 = vmatpush3.msra.mxu1 %v9062_v50 }
0x2449   :  { %7384 = vmatprep.mubr.msk.f32.mxu0 %vm2325_vm6, %v9037_v37  ;;  %7389 = vmatprep.subr.mxu1 %v9069_v49 }
0x244a   :  { %7390 = vmatpush3.msra.mxu1 %v9069_v49 }
0x244b   :  { %7391 = vmatprep.subr.mxu1 %v9076_v51 }
0x244c   :  { %7392 = vmatpush3.msra.mxu1 %v9076_v51 }
0x244d   :  { %7393 = vmatprep.subr.mxu1 %v9082_v6 }
0x244e   :  { %7394 = vmatpush3.msra.mxu1 %v9082_v6 }
0x244f   :  { %7420 = vmatprep.subr.mxu1 %v8377_v0 }
0x2507   :  { %v3399_v34 = vpop.f32.mrf.mxu1 }
0x2508   :  { %v9367_v53 = vadd.f32 %v9025_v45, %v3399_v34  ;;  %v9369_v55 = vpop.f32.mrf.mxu0 }
0x2509   :  { %v7381_v8 = vpop.f32.mrf.mxu1 }
0x250a   :  { %v7370_v12 = vpop.f32.mrf.mxu0  ;;  %7382 = vmatprep.subr.msk.mxu0 %vm2104_vm3, %v9367_v53 }
0x250b   :  { %7383 = vmatpush3.msk.msra.mxu0 %vm2104_vm3, %v9367_v53 }
0x250c   :  { %7385 = vmatmul.mubr.msk.f32.vlgmr.msra.gmra.mxu0 %vm2325_vm6, %v9052_v43  ;;  %7398 = vmatprep.subr.mxu0 %v8377_v0 }
0x250d   :  { %7402 = vmatprep.mubr.msk.f32.mxu0 %vm8378_vm0, %v8377_v0 }
0x25cc   :  { %v7386_v63 = vpop.f32.mrf.mxu0 }
0x25cd   :  { %v3482_v27 = vadd.f32 %v7386_v63, %v9088_v56 }
0x25ce   :  { %v3472_v44 = vpop.f32.mrf.mxu0 }
0x25cf   :  { %v3481_v13 = vadd.f32 %v3472_v44, %v9090_v11  ;;  %v3484_v5 = vmax.f32 %v3482_v27, 0.0 }
0x25d1   :  { %v3483_v4 = vmax.f32 %v3481_v13, 0.0 }
0x25d3   :  { %7395 = vmatprep.mubr.msk.f32.mxu1 %vm420_vm2, %v3483_v4 }
0x25d4   :  { %7396 = vmatmul.mubr.msk.f32.vlgmr.msra.gmra.mxu1 %vm420_vm2, %v3484_v5 }
0x25d5   :  { %7421 = vmatpush3.msra.mxu1 %v9188_v16  ;;  %7436 = vmatprep.mubr.msk.f32.mxu1 %vm8378_vm0, %v8377_v0 }
0x25d6   :  { %7422 = vmatprep.subr.mxu1 %v8377_v0 }
0x25d7   :  { %7423 = vmatpush3.msra.mxu1 %v9193_v19 }
0x25d8   :  { %7424 = vmatprep.subr.mxu1 %v8377_v0 }
0x25d9   :  { %7425 = vmatpush3.msra.mxu1 %v9200_v20 }
0x25da   :  { %7426 = vmatprep.subr.mxu1 %v8377_v0 }
0x25db   :  { %7427 = vmatpush3.msra.mxu1 %v9207_v22 }
0x25dc   :  { %7428 = vmatprep.subr.mxu1 %v8377_v0 }
0x25dd   :  { %7429 = vmatpush3.msra.mxu1 %v9214_v24 }
0x25de   :  { %7430 = vmatprep.subr.mxu1 %v8377_v0 }
0x25df   :  { %7431 = vmatpush3.msra.mxu1 %v9221_v39 }
0x25e0   :  { %7432 = vmatprep.subr.mxu1 %v8377_v0 }
0x25e1   :  { %7433 = vmatpush3.msra.mxu1 %v9229_v26 }
0x25e2   :  { %7434 = vmatprep.subr.mxu1 %v8377_v0 }
0x25e3   :  { %7435 = vmatpush3.msra.mxu1 %v9239_v28 }
0x2694   :  { %v7397_v7 = vpop.f32.mrf.mxu1 }
0x2695   :  { %v3567_v10 = vsel %vm2495_vm7, %v7397_v7, -inf }
0x2696   :  { %v3557_v9 = vpop.f32.mrf.mxu1 }
0x2697   :  { %v3566_v15 = vsel %vm2495_vm7, %v3557_v9, -inf }
0x2698   :  { %v3568_v25 = vmax.f32 %v3566_v15, %v3567_v10 }
0x269a   :  { %v3569_v29 = vrot.slane %v3568_v25, 4 }
0x269c   :  { %v3570_v30 = vmax.f32 %v3568_v25, %v3569_v29 }
0x269e   :  { %v3571_v2 = vrot.slane %v3570_v30, 2 }
0x26a0   :  { %v3572_v23 = vmax.f32 %v3570_v30, %v3571_v2 }
0x26a2   :  { %v3573_v31 = vrot.slane %v3572_v23, 1 }
0x26a4   :  { %v3574_v60 = vmax.f32 %v3572_v23, %v3573_v31 }
0x26a6   :  { %v3575_v40 = vsub.f32 %v3557_v9, %v3574_v60  ;;  %v3576_v21 = vsub.f32 %v7397_v7, %v3574_v60  ;;  %v9432_v9 = vadd.f32 %v9325_v17, %v9369_v55 }
0x26a8   :  { %v3577_v52 = vmul.f32 1.442695, %v3575_v40  ;;  %v3579_v3 = vmul.f32 1.442695, %v3576_v21 }
0x26aa   :  { %7941 = vpow2.f32 %v3577_v52 }
0x26ab   :  { %7943 = vpow2.f32 %v3579_v3 }
0x26b7   :  { %v7942_v41 = vpop.eup %7941 }
0x26b8   :  { %v7944_v34 = vpop.eup %7943  ;;  %3583 = vperm.xlu0 %7809, %v7942_v41  }
0x26b9   :  { %3588 = vperm.xlu1 %7807, %v7944_v34  }
0x26bc   :  { %3748 = vrot.lane.b32.xlu0 %v9367_v53, %s8380_s30 }
0x26bd   :  { %7810 = vset.pattern.permute.xlu1 %v8382_v38 }
0x2733   :  { %v3584_v12 = vpop.permute.xlu0 %3583 }
0x2734   :  { %v3589_v8 = vpop.permute.xlu1 %3588  ;;  %v3591_v27 = vmul.f32 %v3584_v12, %v9111_v35 }
0x2735   :  { %v3592_v63 = vmul.f32 %v3589_v8, %v9106_v32 }
0x2737   :  { %7399 = vmatpush3.msra.mxu0 %v3592_v63  ;;  %v3749_v55 = vpop.permute.xlu0 %3748 }
0x2738   :  { %7400 = vmatprep.subr.mxu0 %v8377_v0 }
0x2739   :  { %7401 = vmatpush3.msra.mxu0 %v3591_v27 }
0x273a   :  { %7403 = vmatmul.mubr.msk.f32.vlgmr.msra.gmra.mxu0 %vm238_vm1, %v9114_v36  ;;  %7405 = vmatprep.subr.mxu0 %v8377_v0 }
0x273b   :  { %7406 = vmatpush3.msra.mxu0 %v9126_v54  ;;  %7417 = vmatprep.mubr.msk.f32.mxu0 %vm8378_vm0, %v8377_v0 }
0x273c   :  { %7407 = vmatprep.subr.mxu0 %v8377_v0 }
0x273d   :  { %7408 = vmatpush3.msra.mxu0 %v9131_v1 }
0x273e   :  { %7409 = vmatprep.subr.mxu0 %v8377_v0 }
0x273f   :  { %7410 = vmatpush3.msra.mxu0 %v9138_v33 }
0x2740   :  { %7411 = vmatprep.subr.mxu0 %v8377_v0 }
0x2741   :  { %7412 = vmatpush3.msra.mxu0 %v9146_v58 }
0x2742   :  { %7413 = vmatprep.subr.mxu0 %v8377_v0 }
0x2743   :  { %7414 = vmatpush3.msra.mxu0 %v9153_v47 }
0x2744   :  { %7415 = vmatprep.subr.mxu0 %v8377_v0 }
0x2745   :  { %7416 = vmatpush3.msra.mxu0 %v9162_v48 }
0x2746   :  { %7439 = vmatprep.subr.mxu0 %v8377_v0 }
0x27fa   :  { %v3659_v44 = vpop.f32.mrf.mxu0 }
0x27fb   :  { %7945 = vrcp.f32 %v3659_v44 }
0x27fc   :  { %v7404_v13 = vpop.f32.mrf.mxu0 }
0x2808   :  { %v7946_v4 = vpop.eup %7945 }
0x2809   :  { %3666 = vperm.xlu1 %7810, %v7946_v4  }
0x280d   :  { %7811 = vset.pattern.permute.xlu1 %v8381_v14 }
0x2884   :  { %v3667_v5 = vpop.permute.xlu1 %3666 }
0x2885   :  { %v3669_v7 = vmul.f32 %v3667_v5, %v3659_v44 }
0x2887   :  { %3671 = vrot.lane.b32.xlu1 %v3669_v7, %s8383_s17 }
0x288b   :  { %3758 = vrot.lane.b32.xlu1 %v9367_v53, %s8384_s3 }
0x28f9   :  { %v3672_v10 = vpop.permute.xlu1 %3671 }
0x28fa   :  { %v3674_v15 = vsel %vm238_vm1, %v9432_v9, %v3672_v10 }
0x28fb   :  { %7418 = vmatmul.mubr.msk.f32.vlgmr.msra.gmra.mxu0 %vm2614_vm8, %v3674_v15 }
0x28fc   :  { %7440 = vmatpush3.msra.mxu0 %v8962_v57  ;;  %7447 = vmatprep.mubr.msk.f32.mxu0 %vm8378_vm0, %v8377_v0 }
0x28fd   :  { %7441 = vmatprep.subr.mxu0 %v8377_v0  ;;  %v3759_v31 = vpop.permute.xlu1 %3758 }
0x28fe   :  { %7442 = vmatpush3.msra.mxu0 %v8964_v61 }
0x28ff   :  { %7443 = vmatprep.subr.mxu0 %v8377_v0 }
0x2900   :  { %7444 = vmatpush3.msra.mxu0 %v8968_v59 }
0x2901   :  { %7445 = vmatprep.subr.mxu0 %v8377_v0 }
0x2902   :  { %7446 = vmatpush3.msra.mxu0 %v8972_v62 }
0x2903   :  { %7455 = vmatprep.subr.mxu0 %v9062_v50 }
0x29bb   :  { %v3744_v53 = vpop.f32.mrf.mxu0 }
0x29bc   :  { %v3745_v57 = vadd.f32 %v9181_v42, %v3744_v53 }
0x29bd   :  { %v7419_v25 = vpop.f32.mrf.mxu0 }
0x29be   :  { %v3751_v29 = vadd.f32 %v3749_v55, %v3745_v57 }
0x29c0   :  { %v6624_v30 = vmul.f32 -1.442695, %v3751_v29 }
0x29c2   :  { %7947 = vpow2.f32 %v6624_v30 }
0x29cf   :  { %v7948_v2 = vpop.eup %7947 }
0x29d0   :  { %v3755_v61 = vadd.f32 1.0, %v7948_v2 }
0x29d2   :  { %7949 = vrcp.f32 %v3755_v61 }
0x29df   :  { %v7950_v23 = vpop.eup %7949 }
0x29e0   :  { %v3761_v59 = vmul.f32 %v7950_v23, %v3759_v31  ;;  %v3768_v21 = vsub.f32 1.0, %v7950_v23  ;;  %v3774_v3 = vmul.f32 %v7950_v23, %v9349_v46 }
0x29e2   :  { %3763 = vrot.lane.b32.xlu0 %v3761_v59, %s8379_s7 }
0x2a54   :  { %v3764_v60 = vpop.permute.xlu0 %3763 }
0x2a55   :  { %v3766_v62 = vadd.f32 %v3764_v60, %v3745_v57 }
0x2a57   :  { %7951 = vtanh.f32 %v3766_v62 }
0x2a64   :  { %v7952_v40 = vpop.eup %7951 }
0x2a65   :  { %3770 = vrot.lane.b32.xlu1 %v7952_v40, %s8380_s30 }
0x2a69   :  { %3780 = vrot.lane.b32.xlu1 %v3669_v7, %s8384_s3 }
0x2ad7   :  { %v3771_v52 = vpop.permute.xlu1 %3770 }
0x2ad8   :  { %v3773_v41 = vmul.f32 %v3771_v52, %v3768_v21 }
0x2ada   :  { %v9452_v34 = vadd.f32 %v3774_v3, %v3773_v41  ;;  %v9540_v41 = vld [vmem:[#allocation16 + $0x18] sm:$0xff] }
0x2adb   :  { %v3781_v8 = vpop.permute.xlu1 %3780 }
0x2adc   :  { %3777 = vrot.lane.b32.xlu0 %v9452_v34, %s8380_s30 }
0x2b4e   :  { %v3778_v12 = vpop.permute.xlu0 %3777 }
0x2b4f   :  { %v3783_v63 = vsel %vm420_vm2, %v3778_v12, %v3781_v8  ;;  %7448 = vmatmul.mubr.msk.f32.vlgmr.msra.gmra.mxu0 %vm420_vm2, %v3778_v12  ;;  %v9546_v8 = vld [vmem:[#allocation16 + $0x10] sm:$0xff]  ;;  %v9550_v12 = vld [vmem:[#allocation16 + $0x8] sm:$0xff] }
0x2b50   :  { %7437 = vmatmul.mubr.msk.f32.vlgmr.msra.gmra.mxu1 %vm2731_vm9, %v3783_v63  ;;  %7456 = vmatpush3.msra.mxu0 %v9062_v50  ;;  %v9554_v63 = vld [vmem:[#allocation16] sm:$0xff] }
0x2b51   :  { %7452 = vmatprep.mubr.msk.f32.mxu1 %vm2325_vm6, %v9037_v37  ;;  %7457 = vmatprep.subr.mxu0 %v9069_v49 }
0x2b52   :  { %7458 = vmatpush3.msra.mxu0 %v9069_v49 }
0x2b53   :  { %7459 = vmatprep.subr.mxu0 %v9076_v51 }
0x2b54   :  { %7460 = vmatpush3.msra.mxu0 %v9076_v51 }
0x2b55   :  { %7461 = vmatprep.subr.mxu0 %v9082_v6 }
0x2b56   :  { %7462 = vmatpush3.msra.mxu0 %v9082_v6 }
0x2b57   :  { %7488 = vmatprep.subr.mxu0 %v8377_v0 }
0x2c0f   :  { %v3925_v46 = vpop.f32.mrf.mxu0 }
0x2c10   :  { %v9470_v50 = vadd.f32 %v9025_v45, %v3925_v46  ;;  %v9472_v27 = vpop.f32.mrf.mxu1  ;;  %v9560_v46 = vld [vmem:[%s10106_s11 + $0x18] sm:$0xff] }
0x2c11   :  { %v7449_v37 = vpop.f32.mrf.mxu0 }
0x2c12   :  { %v7438_v44 = vpop.f32.mrf.mxu1  ;;  %7450 = vmatprep.subr.msk.mxu1 %vm2104_vm3, %v9470_v50 }
0x2c13   :  { %7451 = vmatpush3.msk.msra.mxu1 %vm2104_vm3, %v9470_v50 }
0x2c14   :  { %7453 = vmatmul.mubr.msk.f32.vlgmr.msra.gmra.mxu1 %vm2325_vm6, %v9052_v43  ;;  %7466 = vmatprep.subr.mxu1 %v8377_v0 }
0x2c15   :  { %7470 = vmatprep.mubr.msk.f32.mxu1 %vm8378_vm0, %v8377_v0 }
0x2cd4   :  { %v7454_v45 = vpop.f32.mrf.mxu1 }
0x2cd5   :  { %v4008_v49 = vadd.f32 %v7454_v45, %v9088_v56 }
0x2cd6   :  { %v3998_v51 = vpop.f32.mrf.mxu1 }
0x2cd7   :  { %v4007_v6 = vadd.f32 %v3998_v51, %v9090_v11  ;;  %v4010_v4 = vmax.f32 %v4008_v49, 0.0 }
0x2cd9   :  { %v4009_v13 = vmax.f32 %v4007_v6, 0.0 }
0x2cdb   :  { %7463 = vmatprep.mubr.msk.f32.mxu0 %vm420_vm2, %v4009_v13 }
0x2cdc   :  { %7464 = vmatmul.mubr.msk.f32.vlgmr.msra.gmra.mxu0 %vm420_vm2, %v4010_v4 }
0x2cdd   :  { %7489 = vmatpush3.msra.mxu0 %v9188_v16  ;;  %7504 = vmatprep.mubr.msk.f32.mxu0 %vm8378_vm0, %v8377_v0 }
0x2cde   :  { %7490 = vmatprep.subr.mxu0 %v8377_v0 }
0x2cdf   :  { %7491 = vmatpush3.msra.mxu0 %v9193_v19 }
0x2ce0   :  { %7492 = vmatprep.subr.mxu0 %v8377_v0 }
0x2ce1   :  { %7493 = vmatpush3.msra.mxu0 %v9200_v20 }
0x2ce2   :  { %7494 = vmatprep.subr.mxu0 %v8377_v0 }
0x2ce3   :  { %7495 = vmatpush3.msra.mxu0 %v9207_v22 }
0x2ce4   :  { %7496 = vmatprep.subr.mxu0 %v8377_v0 }
0x2ce5   :  { %7497 = vmatpush3.msra.mxu0 %v9214_v24 }
0x2ce6   :  { %7498 = vmatprep.subr.mxu0 %v8377_v0 }
0x2ce7   :  { %7499 = vmatpush3.msra.mxu0 %v9221_v39 }
0x2ce8   :  { %7500 = vmatprep.subr.mxu0 %v8377_v0 }
0x2ce9   :  { %7501 = vmatpush3.msra.mxu0 %v9229_v26 }
0x2cea   :  { %7502 = vmatprep.subr.mxu0 %v8377_v0 }
0x2ceb   :  { %7503 = vmatpush3.msra.mxu0 %v9239_v28 }
0x2d9c   :  { %v7465_v43 = vpop.f32.mrf.mxu0 }
0x2d9d   :  { %v4093_v7 = vsel %vm2495_vm7, %v7465_v43, -inf }
0x2d9e   :  { %v4083_v5 = vpop.f32.mrf.mxu0 }
0x2d9f   :  { %v4092_v10 = vsel %vm2495_vm7, %v4083_v5, -inf }
0x2da0   :  { %v4094_v15 = vmax.f32 %v4092_v10, %v4093_v7 }
0x2da2   :  { %v4095_v53 = vrot.slane %v4094_v15, 4 }
0x2da4   :  { %v4096_v57 = vmax.f32 %v4094_v15, %v4095_v53 }
0x2da6   :  { %v4097_v55 = vrot.slane %v4096_v57, 2 }
0x2da8   :  { %v4098_v25 = vmax.f32 %v4096_v57, %v4097_v55 }
0x2daa   :  { %v4099_v29 = vrot.slane %v4098_v25, 1 }
0x2dac   :  { %v4100_v30 = vmax.f32 %v4098_v25, %v4099_v29 }
0x2dae   :  { %v4101_v2 = vsub.f32 %v4083_v5, %v4100_v30  ;;  %v4102_v61 = vsub.f32 %v7465_v43, %v4100_v30 }
0x2db0   :  { %v4103_v23 = vmul.f32 1.442695, %v4101_v2  ;;  %v4105_v31 = vmul.f32 1.442695, %v4102_v61  ;;  %v9586_v2 = vld [vmem:[%s10106_s11 + $0x10] sm:$0xff]  ;;  %v9593_v61 = vld [vmem:[%s10106_s11 + $0x8] sm:$0xff] }
0x2db2   :  { %7953 = vpow2.f32 %v4103_v23  ;;  %v9600_v23 = vld [vmem:[%s10106_s11] sm:$0xff] }
0x2db3   :  { %7955 = vpow2.f32 %v4105_v31  ;;  %v6488_v31 = vrot.slane %v9432_v9, 6 }
0x2db5   :  { %v6505_v9 = vsel %vm2104_vm3, %v9329_v18, %v6488_v31  ;;  %v9709_v31 = vld [vmem:[%s10109_s14] sm:$0xff] }
0x2dbf   :  { %v7954_v59 = vpop.eup %7953 }
0x2dc0   :  { %v7956_v60 = vpop.eup %7955  ;;  %4109 = vperm.xlu1 %7811, %v7954_v59  }
0x2dc1   :  { %4114 = vperm.xlu0 %7809, %v7956_v60  }
0x2dc5   :  { %7812 = vset.pattern.permute.xlu0 %v8382_v38 }
0x2e3b   :  { %v4110_v40 = vpop.permute.xlu1 %4109 }
0x2e3c   :  { %v4115_v62 = vpop.permute.xlu0 %4114  ;;  %v4117_v52 = vmul.f32 %v4110_v40, %v9111_v35 }
0x2e3d   :  { %v4118_v21 = vmul.f32 %v4115_v62, %v9106_v32  ;;  %v9607_v62 = vld [vmem:[#allocation17] ss:$0 sm:$0xff] }
0x2e3f   :  { %7467 = vmatpush3.msra.mxu1 %v4118_v21 }
0x2e40   :  { %7468 = vmatprep.subr.mxu1 %v8377_v0 }
0x2e41   :  { %7469 = vmatpush3.msra.mxu1 %v4117_v52 }
0x2e42   :  { %7471 = vmatmul.mubr.msk.f32.vlgmr.msra.gmra.mxu1 %vm238_vm1, %v9114_v36  ;;  %7473 = vmatprep.subr.mxu1 %v8377_v0 }
0x2e43   :  { %7474 = vmatpush3.msra.mxu1 %v9126_v54  ;;  %7485 = vmatprep.mubr.msk.f32.mxu1 %vm8378_vm0, %v8377_v0 }
0x2e44   :  { %7475 = vmatprep.subr.mxu1 %v8377_v0 }
0x2e45   :  { %7476 = vmatpush3.msra.mxu1 %v9131_v1 }
0x2e46   :  { %7477 = vmatprep.subr.mxu1 %v8377_v0 }
0x2e47   :  { %7478 = vmatpush3.msra.mxu1 %v9138_v33 }
0x2e48   :  { %7479 = vmatprep.subr.mxu1 %v8377_v0 }
0x2e49   :  { %7480 = vmatpush3.msra.mxu1 %v9146_v58 }
0x2e4a   :  { %7481 = vmatprep.subr.mxu1 %v8377_v0 }
0x2e4b   :  { %7482 = vmatpush3.msra.mxu1 %v9153_v47  ;;  %v9535_v47 = vadd.f32 %v9325_v17, %v9472_v27 }
0x2e4c   :  { %7483 = vmatprep.subr.mxu1 %v8377_v0 }
0x2e4d   :  { %7484 = vmatpush3.msra.mxu1 %v9162_v48  ;;  %v6491_v60 = vrot.slane %v9535_v47, 4 }
0x2e4e   :  { %7507 = vmatprep.subr.mxu1 %v8377_v0 }
0x2f02   :  { %v4185_v36 = vpop.f32.mrf.mxu1 }
0x2f03   :  { %7957 = vrcp.f32 %v4185_v36 }
0x2f04   :  { %v7472_v54 = vpop.f32.mrf.mxu1 }
0x2f10   :  { %v7958_v1 = vpop.eup %7957 }
0x2f11   :  { %4192 = vperm.xlu0 %7812, %v7958_v1  }
0x2f15   :  { %4284 = vrot.lane.b32.xlu0 %v9470_v50, %s8384_s3 }
0x2f16   :  { %7813 = vset.pattern.permute.xlu0 %v8381_v14 }
0x2f8c   :  { %v4193_v33 = vpop.permute.xlu0 %4192 }
0x2f8d   :  { %v4195_v58 = vmul.f32 %v4193_v33, %v4185_v36  ;;  %v6506_v33 = vsel %vm2106_vm4, %v6505_v9, %v6491_v60 }
0x2f8f   :  { %4197 = vrot.lane.b32.xlu1 %v4195_v58, %s8383_s17 }
0x2f90   :  { %v4285_v4 = vpop.permute.xlu0 %4284 }
0x2f93   :  { %4274 = vrot.lane.b32.xlu1 %v9470_v50, %s8380_s30 }
0x3001   :  { %v4198_v48 = vpop.permute.xlu1 %4197 }
0x3002   :  { %v4200_v3 = vsel %vm238_vm1, %v9535_v47, %v4198_v48 }
0x3003   :  { %7486 = vmatmul.mubr.msk.f32.vlgmr.msra.gmra.mxu1 %vm2614_vm8, %v4200_v3 }
0x3004   :  { %7508 = vmatpush3.msra.mxu1 %v9540_v41  ;;  %7515 = vmatprep.mubr.msk.f32.mxu1 %vm8378_vm0, %v8377_v0 }
0x3005   :  { %7509 = vmatprep.subr.mxu1 %v8377_v0  ;;  %v4275_v37 = vpop.permute.xlu1 %4274 }
0x3006   :  { %7510 = vmatpush3.msra.mxu1 %v9546_v8 }
0x3007   :  { %7511 = vmatprep.subr.mxu1 %v8377_v0 }
0x3008   :  { %7512 = vmatpush3.msra.mxu1 %v9550_v12 }
0x3009   :  { %7513 = vmatprep.subr.mxu1 %v8377_v0 }
0x300a   :  { %7514 = vmatpush3.msra.mxu1 %v9554_v63 }
0x300b   :  { %7523 = vmatprep.subr.mxu1 %v9560_v46 }
0x30c3   :  { %v4270_v50 = vpop.f32.mrf.mxu1 }
0x30c4   :  { %v4271_v27 = vadd.f32 %v9181_v42, %v4270_v50 }
0x30c5   :  { %v7487_v44 = vpop.f32.mrf.mxu1 }
0x30c6   :  { %v4277_v45 = vadd.f32 %v4275_v37, %v4271_v27 }
0x30c8   :  { %v6634_v49 = vmul.f32 -1.442695, %v4277_v45 }
0x30ca   :  { %7959 = vpow2.f32 %v6634_v49 }
0x30d7   :  { %v7960_v51 = vpop.eup %7959 }
0x30d8   :  { %v4281_v6 = vadd.f32 1.0, %v7960_v51 }
0x30da   :  { %7961 = vrcp.f32 %v4281_v6 }
0x30e7   :  { %v7962_v13 = vpop.eup %7961 }
0x30e8   :  { %v4287_v43 = vmul.f32 %v7962_v13, %v4285_v4  ;;  %v4294_v42 = vsub.f32 1.0, %v7962_v13  ;;  %v4300_v53 = vmul.f32 %v7962_v13, %v9452_v34  ;;  %v9579_v34 = vld [vmem:[%s10114_s19] sm:$0xff] }
0x30ea   :  { %4289 = vrot.lane.b32.xlu1 %v4287_v43, %s8379_s7 }
0x315c   :  { %v4290_v5 = vpop.permute.xlu1 %4289 }
0x315d   :  { %v4292_v7 = vadd.f32 %v4290_v5, %v4271_v27 }
0x315f   :  { %7963 = vtanh.f32 %v4292_v7 }
0x316c   :  { %v7964_v10 = vpop.eup %7963 }
0x316d   :  { %4296 = vrot.lane.b32.xlu0 %v7964_v10, %s8380_s30 }
0x3171   :  { %4306 = vrot.lane.b32.xlu0 %v4195_v58, %s8384_s3 }
0x31df   :  { %v4297_v15 = vpop.permute.xlu0 %4296 }
0x31e0   :  { %v4299_v57 = vmul.f32 %v4297_v15, %v4294_v42  ;;  %v9664_v15 = vld [vmem:[#allocation22] sm:$0x3] }
0x31e2   :  { %v9568_v55 = vadd.f32 %v4300_v53, %v4299_v57  ;;  %v9672_v53 = vld [vmem:[%s10109_s14 + $0x28] sm:$0xff]  ;;  %v9681_v57 = vld [vmem:[%s10109_s14 + $0x20] sm:$0xff] }
0x31e3   :  { %v4307_v25 = vpop.permute.xlu0 %4306 }
0x31e4   :  { %4303 = vrot.lane.b32.xlu1 %v9568_v55, %s8380_s30 }
0x3256   :  { %v4304_v29 = vpop.permute.xlu1 %4303 }
0x3257   :  { %v4309_v30 = vsel %vm420_vm2, %v4304_v29, %v4307_v25  ;;  %7516 = vmatmul.mubr.msk.f32.vlgmr.msra.gmra.mxu1 %vm420_vm2, %v4304_v29  ;;  %v9688_v25 = vld [vmem:[%s10109_s14 + $0x18] sm:$0xff]  ;;  %v9695_v29 = vld [vmem:[%s10109_s14 + $0x10] sm:$0xff] }
0x3258   :  { %7505 = vmatmul.mubr.msk.f32.vlgmr.msra.gmra.mxu0 %vm2731_vm9, %v4309_v30  ;;  %7524 = vmatpush3.msra.mxu1 %v9560_v46  ;;  %v9702_v30 = vld [vmem:[%s10109_s14 + $0x8] sm:$0xff] }
0x3259   :  { %7520 = vmatprep.mubr.msk.f32.mxu0 %vm2325_vm6, %v9579_v34  ;;  %7525 = vmatprep.subr.mxu1 %v9586_v2 }
0x325a   :  { %7526 = vmatpush3.msra.mxu1 %v9586_v2 }
0x325b   :  { %7527 = vmatprep.subr.mxu1 %v9593_v61 }
0x325c   :  { %7528 = vmatpush3.msra.mxu1 %v9593_v61 }
0x325d   :  { %7529 = vmatprep.subr.mxu1 %v9600_v23 }
0x325e   :  { %7530 = vmatpush3.msra.mxu1 %v9600_v23 }
0x325f   :  { %7556 = vmatprep.subr.mxu1 %v8377_v0 }
0x3317   :  { %v4451_v59 = vpop.f32.mrf.mxu1 }
0x3318   :  { %v9610_v40 = vadd.f32 %v9607_v62, %v4451_v59  ;;  %v4379_v21 = vpop.f32.mrf.mxu0 }
0x3319   :  { %v9613_v52 = vadd.f32 %v9325_v17, %v4379_v21  ;;  %v7517_v36 = vpop.f32.mrf.mxu1  ;;  %v9626_v17 = vld [vmem:[%s10114_s19 + $0x8] sm:$0xff] }
0x331a   :  { %v7506_v54 = vpop.f32.mrf.mxu0  ;;  %7518 = vmatprep.subr.msk.mxu0 %vm2104_vm3, %v9610_v40 }
0x331b   :  { %v6494_v1 = vrot.slane %v9613_v52, 2  ;;  %7519 = vmatpush3.msk.msra.mxu0 %vm2104_vm3, %v9610_v40 }
0x331c   :  { %7521 = vmatmul.mubr.msk.f32.vlgmr.msra.gmra.mxu0 %vm2325_vm6, %v9626_v17  ;;  %7534 = vmatprep.subr.mxu0 %v8377_v0 }
0x331d   :  { %7538 = vmatprep.mubr.msk.f32.mxu0 %vm8378_vm0, %v8377_v0  ;;  %v6507_v18 = vsel %vm2108_vm5, %v6506_v33, %v6494_v1 }
0x331e   :  { %6511 = vst.msk [vmem:[#allocation23] sm:$0xff] %vm238_vm1, %v6507_v18 }
0x33dc   :  { %v7522_v58 = vpop.f32.mrf.mxu0 }
0x33dd   :  { %v4534_v47 = vadd.f32 %v7522_v58, %v9088_v56 }
0x33de   :  { %v4524_v48 = vpop.f32.mrf.mxu0 }
0x33df   :  { %v4533_v3 = vadd.f32 %v4524_v48, %v9090_v11  ;;  %v4536_v27 = vmax.f32 %v4534_v47, 0.0 }
0x33e1   :  { %v4535_v50 = vmax.f32 %v4533_v3, 0.0 }
0x33e3   :  { %7531 = vmatprep.mubr.msk.f32.mxu1 %vm420_vm2, %v4535_v50 }
0x33e4   :  { %7532 = vmatmul.mubr.msk.f32.vlgmr.msra.gmra.mxu1 %vm420_vm2, %v4536_v27 }
0x33e5   :  { %7557 = vmatpush3.msra.mxu1 %v9188_v16  ;;  %7572 = vmatprep.mubr.msk.f32.mxu1 %vm8378_vm0, %v8377_v0 }
0x33e6   :  { %7558 = vmatprep.subr.mxu1 %v8377_v0 }
0x33e7   :  { %7559 = vmatpush3.msra.mxu1 %v9193_v19 }
0x33e8   :  { %7560 = vmatprep.subr.mxu1 %v8377_v0 }
0x33e9   :  { %7561 = vmatpush3.msra.mxu1 %v9200_v20 }
0x33ea   :  { %7562 = vmatprep.subr.mxu1 %v8377_v0 }
0x33eb   :  { %7563 = vmatpush3.msra.mxu1 %v9207_v22 }
0x33ec   :  { %7564 = vmatprep.subr.mxu1 %v8377_v0 }
0x33ed   :  { %7565 = vmatpush3.msra.mxu1 %v9214_v24 }
0x33ee   :  { %7566 = vmatprep.subr.mxu1 %v8377_v0 }
0x33ef   :  { %7567 = vmatpush3.msra.mxu1 %v9221_v39 }
0x33f0   :  { %7568 = vmatprep.subr.mxu1 %v8377_v0 }
0x33f1   :  { %7569 = vmatpush3.msra.mxu1 %v9229_v26 }
0x33f2   :  { %7570 = vmatprep.subr.mxu1 %v8377_v0 }
0x33f3   :  { %7571 = vmatpush3.msra.mxu1 %v9239_v28 }
0x34a4   :  { %v7533_v16 = vpop.f32.mrf.mxu1 }
0x34a5   :  { %v4619_v20 = vsel %vm2495_vm7, %v7533_v16, -inf }
0x34a6   :  { %v4609_v19 = vpop.f32.mrf.mxu1 }
0x34a7   :  { %v4618_v22 = vsel %vm2495_vm7, %v4609_v19, -inf }
0x34a8   :  { %v4620_v37 = vmax.f32 %v4618_v22, %v4619_v20 }
0x34aa   :  { %v4621_v24 = vrot.slane %v4620_v37, 4 }
0x34ac   :  { %v4622_v44 = vmax.f32 %v4620_v37, %v4621_v24 }
0x34ae   :  { %v4623_v45 = vrot.slane %v4622_v44, 2 }
0x34b0   :  { %v4624_v49 = vmax.f32 %v4622_v44, %v4623_v45 }
0x34b2   :  { %v4625_v39 = vrot.slane %v4624_v49, 1 }
0x34b4   :  { %v4626_v51 = vmax.f32 %v4624_v49, %v4625_v39 }
0x34b6   :  { %v4627_v6 = vsub.f32 %v4609_v19, %v4626_v51  ;;  %v4628_v13 = vsub.f32 %v7533_v16, %v4626_v51 }
0x34b8   :  { %v4629_v26 = vmul.f32 1.442695, %v4627_v6  ;;  %v4631_v4 = vmul.f32 1.442695, %v4628_v13 }
0x34ba   :  { %7965 = vpow2.f32 %v4629_v26 }
0x34bb   :  { %7967 = vpow2.f32 %v4631_v4 }
0x34c7   :  { %v7966_v28 = vpop.eup %7965 }
0x34c8   :  { %v7968_v43 = vpop.eup %7967  ;;  %4635 = vperm.xlu0 %7813, %v7966_v28  }
0x34c9   :  { %4640 = vperm.xlu1 %7811, %v7968_v43  }
0x34cc   :  { %4800 = vrot.lane.b32.xlu0 %v9610_v40, %s8380_s30 }
0x34cd   :  { %7814 = vset.pattern.permute.xlu1 %v8382_v38 }
0x3543   :  { %v4636_v7 = vpop.permute.xlu0 %4635 }
0x3544   :  { %v4641_v5 = vpop.permute.xlu1 %4640  ;;  %v4643_v42 = vmul.f32 %v4636_v7, %v9111_v35 }
0x3545   :  { %v4644_v10 = vmul.f32 %v4641_v5, %v9106_v32 }
0x3547   :  { %7535 = vmatpush3.msra.mxu0 %v4644_v10  ;;  %v4801_v18 = vpop.permute.xlu0 %4800 }
0x3548   :  { %7536 = vmatprep.subr.mxu0 %v8377_v0 }
0x3549   :  { %7537 = vmatpush3.msra.mxu0 %v4643_v42 }
0x354a   :  { %7539 = vmatmul.mubr.msk.f32.vlgmr.msra.gmra.mxu0 %vm238_vm1, %v9664_v15  ;;  %7541 = vmatprep.subr.mxu0 %v8377_v0 }
0x354b   :  { %7542 = vmatpush3.msra.mxu0 %v9672_v53  ;;  %7553 = vmatprep.mubr.msk.f32.mxu0 %vm8378_vm0, %v8377_v0 }
0x354c   :  { %7543 = vmatprep.subr.mxu0 %v8377_v0 }
0x354d   :  { %7544 = vmatpush3.msra.mxu0 %v9681_v57 }
0x354e   :  { %7545 = vmatprep.subr.mxu0 %v8377_v0 }
0x354f   :  { %7546 = vmatpush3.msra.mxu0 %v9688_v25 }
0x3550   :  { %7547 = vmatprep.subr.mxu0 %v8377_v0 }
0x3551   :  { %7548 = vmatpush3.msra.mxu0 %v9695_v29 }
0x3552   :  { %7549 = vmatprep.subr.mxu0 %v8377_v0 }
0x3553   :  { %7550 = vmatpush3.msra.mxu0 %v9702_v30 }
0x3554   :  { %7551 = vmatprep.subr.mxu0 %v8377_v0 }
0x3555   :  { %7552 = vmatpush3.msra.mxu0 %v9709_v31 }
0x3556   :  { %7575 = vmatprep.subr.mxu0 %v8377_v0 }
0x360a   :  { %v4711_v59 = vpop.f32.mrf.mxu0 }
0x360b   :  { %7969 = vrcp.f32 %v4711_v59 }
0x360c   :  { %v7540_v60 = vpop.f32.mrf.mxu0 }
0x3618   :  { %v7970_v21 = vpop.eup %7969 }
0x3619   :  { %4718 = vperm.xlu1 %7814, %v7970_v21   ;;  %v9775_v21 = vld [vmem:[%s10111_s16 + $0x38] sm:$0xff] }
0x361d   :  { %7815 = vset.pattern.permute.xlu1 %v8381_v14 }
0x3694   :  { %v4719_v36 = vpop.permute.xlu1 %4718 }
0x3695   :  { %v4721_v54 = vmul.f32 %v4719_v36, %v4711_v59  ;;  %v9784_v36 = vld [vmem:[%s10111_s16 + $0x30] sm:$0xff] }
0x3697   :  { %4723 = vrot.lane.b32.xlu1 %v4721_v54, %s8383_s17 }
0x369b   :  { %4810 = vrot.lane.b32.xlu1 %v9610_v40, %s8384_s3 }
0x3709   :  { %v4724_v9 = vpop.permute.xlu1 %4723 }
0x370a   :  { %v4726_v1 = vsel %vm238_vm1, %v9613_v52, %v4724_v9  ;;  %v9730_v52 = vld [vmem:[#allocation19] ss:$0 sm:$0xff]  ;;  %v9798_v9 = vld [vmem:[%s10111_s16 + $0x20] sm:$0xff] }
0x370b   :  { %7554 = vmatmul.mubr.msk.f32.vlgmr.msra.gmra.mxu0 %vm2614_vm8, %v4726_v1  ;;  %v9805_v1 = vld [vmem:[%s10111_s16 + $0x18] sm:$0xff] }
0x370c   :  { %7576 = vmatpush3.msra.mxu0 %v9540_v41  ;;  %7583 = vmatprep.mubr.msk.f32.mxu0 %vm8378_vm0, %v8377_v0 }
0x370d   :  { %7577 = vmatprep.subr.mxu0 %v8377_v0  ;;  %v4811_v16 = vpop.permute.xlu1 %4810 }
0x370e   :  { %7578 = vmatpush3.msra.mxu0 %v9546_v8 }
0x370f   :  { %7579 = vmatprep.subr.mxu0 %v8377_v0 }
0x3710   :  { %7580 = vmatpush3.msra.mxu0 %v9550_v12 }
0x3711   :  { %7581 = vmatprep.subr.mxu0 %v8377_v0 }
0x3712   :  { %7582 = vmatpush3.msra.mxu0 %v9554_v63 }
0x3713   :  { %7591 = vmatprep.subr.mxu0 %v9560_v46 }
0x37cb   :  { %v4796_v40 = vpop.f32.mrf.mxu0 }
0x37cc   :  { %v4797_v33 = vadd.f32 %v9730_v52, %v4796_v40  ;;  %v9812_v40 = vld [vmem:[%s10111_s16 + $0x10] sm:$0xff] }
0x37cd   :  { %v7555_v58 = vpop.f32.mrf.mxu0 }
0x37ce   :  { %v4803_v47 = vadd.f32 %v4801_v18, %v4797_v33  ;;  %v9826_v18 = vld [vmem:[%s10111_s16] sm:$0xff] }
0x37d0   :  { %v6644_v48 = vmul.f32 -1.442695, %v4803_v47 }
0x37d2   :  { %7971 = vpow2.f32 %v6644_v48 }
0x37df   :  { %v7972_v3 = vpop.eup %7971 }
0x37e0   :  { %v4807_v50 = vadd.f32 1.0, %v7972_v3 }
0x37e2   :  { %7973 = vrcp.f32 %v4807_v50 }
0x37ef   :  { %v7974_v27 = vpop.eup %7973 }
0x37f0   :  { %v4813_v19 = vmul.f32 %v7974_v27, %v4811_v16  ;;  %v4820_v24 = vsub.f32 1.0, %v7974_v27  ;;  %v4826_v45 = vmul.f32 %v7974_v27, %v9568_v55 }
0x37f2   :  { %4815 = vrot.lane.b32.xlu0 %v4813_v19, %s8379_s7 }
0x3864   :  { %v4816_v20 = vpop.permute.xlu0 %4815 }
0x3865   :  { %v4818_v22 = vadd.f32 %v4816_v20, %v4797_v33  ;;  %v9819_v33 = vld [vmem:[%s10111_s16 + $0x8] sm:$0xff] }
0x3867   :  { %7975 = vtanh.f32 %v4818_v22 }
0x3874   :  { %v7976_v37 = vpop.eup %7975 }
0x3875   :  { %4822 = vrot.lane.b32.xlu1 %v7976_v37, %s8380_s30 }
0x3879   :  { %4832 = vrot.lane.b32.xlu1 %v4721_v54, %s8384_s3  ;;  %v9791_v54 = vld [vmem:[%s10111_s16 + $0x28] sm:$0xff]  ;;  %s8385_s16 = smov [#allocation24]  }
0x38e7   :  { %v4823_v44 = vpop.permute.xlu1 %4822 }
0x38e8   :  { %v4825_v49 = vmul.f32 %v4823_v44, %v4820_v24 }
0x38ea   :  { %v9737_v39 = vadd.f32 %v4826_v45, %v4825_v49 }
0x38eb   :  { %v4833_v51 = vpop.permute.xlu1 %4832 }
0x38ec   :  { %4829 = vrot.lane.b32.xlu0 %v9737_v39, %s8380_s30 }
0x395e   :  { %v4830_v6 = vpop.permute.xlu0 %4829 }
0x395f   :  { %v4835_v13 = vsel %vm420_vm2, %v4830_v6, %v4833_v51  ;;  %7584 = vmatmul.mubr.msk.f32.vlgmr.msra.gmra.mxu0 %vm420_vm2, %v4830_v6 }
0x3960   :  { %7573 = vmatmul.mubr.msk.f32.vlgmr.msra.gmra.mxu1 %vm2731_vm9, %v4835_v13  ;;  %7592 = vmatpush3.msra.mxu0 %v9560_v46 }
0x3961   :  { %7588 = vmatprep.mubr.msk.f32.mxu1 %vm2325_vm6, %v9579_v34  ;;  %7593 = vmatprep.subr.mxu0 %v9586_v2 }
0x3962   :  { %7594 = vmatpush3.msra.mxu0 %v9586_v2 }
0x3963   :  { %7595 = vmatprep.subr.mxu0 %v9593_v61 }
0x3964   :  { %7596 = vmatpush3.msra.mxu0 %v9593_v61 }
0x3965   :  { %7597 = vmatprep.subr.mxu0 %v9600_v23 }
0x3966   :  { %7598 = vmatpush3.msra.mxu0 %v9600_v23 }
0x3967   :  { %7624 = vmatprep.subr.mxu0 %v8377_v0 }
0x3a1f   :  { %v4977_v55 = vpop.f32.mrf.mxu0 }
0x3a20   :  { %v9755_v26 = vadd.f32 %v9607_v62, %v4977_v55  ;;  %v9757_v4 = vpop.f32.mrf.mxu1 }
0x3a21   :  { %v7585_v28 = vpop.f32.mrf.mxu0 }
0x3a22   :  { %v7574_v43 = vpop.f32.mrf.mxu1  ;;  %7586 = vmatprep.subr.msk.mxu1 %vm2104_vm3, %v9755_v26 }
0x3a23   :  { %7587 = vmatpush3.msk.msra.mxu1 %vm2104_vm3, %v9755_v26 }
0x3a24   :  { %7589 = vmatmul.mubr.msk.f32.vlgmr.msra.gmra.mxu1 %vm2325_vm6, %v9626_v17  ;;  %7602 = vmatprep.subr.mxu1 %v8377_v0 }
0x3a25   :  { %7606 = vmatprep.mubr.msk.f32.mxu1 %vm8378_vm0, %v8377_v0 }
0x3ae4   :  { %v7590_v5 = vpop.f32.mrf.mxu1 }
0x3ae5   :  { %v5060_v7 = vadd.f32 %v7590_v5, %v9088_v56 }
0x3ae6   :  { %v5050_v10 = vpop.f32.mrf.mxu1 }
0x3ae7   :  { %v5059_v42 = vadd.f32 %v5050_v10, %v9090_v11  ;;  %v5062_v60 = vmax.f32 %v5060_v7, 0.0 }
0x3ae9   :  { %v5061_v59 = vmax.f32 %v5059_v42, 0.0 }
0x3aeb   :  { %7599 = vmatprep.mubr.msk.f32.mxu0 %vm420_vm2, %v5061_v59 }
0x3aec   :  { %7600 = vmatmul.mubr.msk.f32.vlgmr.msra.gmra.mxu0 %vm420_vm2, %v5062_v60  ;;  %v9858_v60 = vld [vmem:[#allocation20] ss:$0 sm:$0xff] }
0x3aed   :  { %7625 = vmatpush3.msra.mxu0 %v9775_v21  ;;  %7640 = vmatprep.mubr.msk.f32.mxu0 %vm8378_vm0, %v8377_v0 }
0x3aee   :  { %7626 = vmatprep.subr.mxu0 %v8377_v0 }
0x3aef   :  { %7627 = vmatpush3.msra.mxu0 %v9784_v36 }
0x3af0   :  { %7628 = vmatprep.subr.mxu0 %v8377_v0 }
0x3af1   :  { %7629 = vmatpush3.msra.mxu0 %v9791_v54 }
0x3af2   :  { %7630 = vmatprep.subr.mxu0 %v8377_v0 }
0x3af3   :  { %7631 = vmatpush3.msra.mxu0 %v9798_v9 }
0x3af4   :  { %7632 = vmatprep.subr.mxu0 %v8377_v0 }
0x3af5   :  { %7633 = vmatpush3.msra.mxu0 %v9805_v1 }
0x3af6   :  { %7634 = vmatprep.subr.mxu0 %v8377_v0 }
0x3af7   :  { %7635 = vmatpush3.msra.mxu0 %v9812_v40 }
0x3af8   :  { %7636 = vmatprep.subr.mxu0 %v8377_v0 }
0x3af9   :  { %7637 = vmatpush3.msra.mxu0 %v9819_v33 }
0x3afa   :  { %7638 = vmatprep.subr.mxu0 %v8377_v0 }
0x3afb   :  { %7639 = vmatpush3.msra.mxu0 %v9826_v18 }
0x3bac   :  { %v7601_v58 = vpop.f32.mrf.mxu0 }
0x3bad   :  { %v5145_v48 = vsel %vm2495_vm7, %v7601_v58, -inf }
0x3bae   :  { %v5135_v47 = vpop.f32.mrf.mxu0 }
0x3baf   :  { %v5144_v3 = vsel %vm2495_vm7, %v5135_v47, -inf }
0x3bb0   :  { %v5146_v50 = vmax.f32 %v5144_v3, %v5145_v48 }
0x3bb2   :  { %v5147_v27 = vrot.slane %v5146_v50, 4 }
0x3bb4   :  { %v5148_v16 = vmax.f32 %v5146_v50, %v5147_v27 }
0x3bb6   :  { %v5149_v19 = vrot.slane %v5148_v16, 2 }
0x3bb8   :  { %v5150_v20 = vmax.f32 %v5148_v16, %v5149_v19 }
0x3bba   :  { %v5151_v22 = vrot.slane %v5150_v20, 1 }
0x3bbc   :  { %v5152_v37 = vmax.f32 %v5150_v20, %v5151_v22 }
0x3bbe   :  { %v5153_v24 = vsub.f32 %v5135_v47, %v5152_v37  ;;  %v5154_v44 = vsub.f32 %v7601_v58, %v5152_v37  ;;  %v9862_v58 = vadd.f32 %v9858_v60, %v9757_v4 }
0x3bc0   :  { %v5155_v45 = vmul.f32 1.442695, %v5153_v24  ;;  %v5157_v49 = vmul.f32 1.442695, %v5154_v44 }
0x3bc2   :  { %7977 = vpow2.f32 %v5155_v45 }
0x3bc3   :  { %7979 = vpow2.f32 %v5157_v49 }
0x3bcf   :  { %v7978_v51 = vpop.eup %7977 }
0x3bd0   :  { %v7980_v6 = vpop.eup %7979  ;;  %5161 = vperm.xlu1 %7815, %v7978_v51  }
0x3bd1   :  { %5166 = vperm.xlu0 %7813, %v7980_v6  }
0x3bd5   :  { %7816 = vset.pattern.permute.xlu0 %v8382_v38 }
0x3c4b   :  { %v5162_v55 = vpop.permute.xlu1 %5161 }
0x3c4c   :  { %v5167_v13 = vpop.permute.xlu0 %5166  ;;  %v5169_v43 = vmul.f32 %v5162_v55, %v9111_v35 }
0x3c4d   :  { %v5170_v28 = vmul.f32 %v5167_v13, %v9106_v32 }
0x3c4f   :  { %7603 = vmatpush3.msra.mxu1 %v5170_v28 }
0x3c50   :  { %7604 = vmatprep.subr.mxu1 %v8377_v0 }
0x3c51   :  { %7605 = vmatpush3.msra.mxu1 %v5169_v43 }
0x3c52   :  { %7607 = vmatmul.mubr.msk.f32.vlgmr.msra.gmra.mxu1 %vm238_vm1, %v9664_v15  ;;  %7609 = vmatprep.subr.mxu1 %v8377_v0 }
0x3c53   :  { %7610 = vmatpush3.msra.mxu1 %v9672_v53  ;;  %7621 = vmatprep.mubr.msk.f32.mxu1 %vm8378_vm0, %v8377_v0 }
0x3c54   :  { %7611 = vmatprep.subr.mxu1 %v8377_v0 }
0x3c55   :  { %7612 = vmatpush3.msra.mxu1 %v9681_v57 }
0x3c56   :  { %7613 = vmatprep.subr.mxu1 %v8377_v0 }
0x3c57   :  { %7614 = vmatpush3.msra.mxu1 %v9688_v25 }
0x3c58   :  { %7615 = vmatprep.subr.mxu1 %v8377_v0 }
0x3c59   :  { %7616 = vmatpush3.msra.mxu1 %v9695_v29 }
0x3c5a   :  { %7617 = vmatprep.subr.mxu1 %v8377_v0 }
0x3c5b   :  { %7618 = vmatpush3.msra.mxu1 %v9702_v30 }
0x3c5c   :  { %7619 = vmatprep.subr.mxu1 %v8377_v0 }
0x3c5d   :  { %7620 = vmatpush3.msra.mxu1 %v9709_v31 }
0x3c5e   :  { %7643 = vmatprep.subr.mxu1 %v8377_v0 }
0x3d12   :  { %v5237_v5 = vpop.f32.mrf.mxu1 }
0x3d13   :  { %7981 = vrcp.f32 %v5237_v5 }
0x3d14   :  { %v7608_v7 = vpop.f32.mrf.mxu1 }
0x3d20   :  { %v7982_v10 = vpop.eup %7981 }
0x3d21   :  { %5244 = vperm.xlu0 %7816, %v7982_v10  }
0x3d25   :  { %5336 = vrot.lane.b32.xlu0 %v9755_v26, %s8384_s3 }
0x3d26   :  { %7817 = vset.pattern.permute.xlu0 %v8381_v14 }
0x3d9c   :  { %v5245_v42 = vpop.permute.xlu0 %5244 }
0x3d9d   :  { %v5247_v59 = vmul.f32 %v5245_v42, %v5237_v5 }
0x3d9f   :  { %5249 = vrot.lane.b32.xlu1 %v5247_v59, %s8383_s17 }
0x3da0   :  { %v5337_v37 = vpop.permute.xlu0 %5336 }
0x3da3   :  { %5326 = vrot.lane.b32.xlu1 %v9755_v26, %s8380_s30 }
0x3e11   :  { %v5250_v47 = vpop.permute.xlu1 %5249 }
0x3e12   :  { %v5252_v48 = vsel %vm238_vm1, %v9862_v58, %v5250_v47 }
0x3e13   :  { %7622 = vmatmul.mubr.msk.f32.vlgmr.msra.gmra.mxu1 %vm2614_vm8, %v5252_v48 }
0x3e14   :  { %7644 = vmatpush3.msra.mxu1 %v9540_v41  ;;  %7651 = vmatprep.mubr.msk.f32.mxu1 %vm8378_vm0, %v8377_v0 }
0x3e15   :  { %7645 = vmatprep.subr.mxu1 %v8377_v0  ;;  %v5327_v3 = vpop.permute.xlu1 %5326 }
0x3e16   :  { %7646 = vmatpush3.msra.mxu1 %v9546_v8 }
0x3e17   :  { %7647 = vmatprep.subr.mxu1 %v8377_v0 }
0x3e18   :  { %7648 = vmatpush3.msra.mxu1 %v9550_v12 }
0x3e19   :  { %7649 = vmatprep.subr.mxu1 %v8377_v0 }
0x3e1a   :  { %7650 = vmatpush3.msra.mxu1 %v9554_v63 }
0x3e1b   :  { %7659 = vmatprep.subr.mxu1 %v9560_v46 }
0x3ed3   :  { %v5322_v26 = vpop.f32.mrf.mxu1 }
0x3ed4   :  { %v5323_v4 = vadd.f32 %v9730_v52, %v5322_v26 }
0x3ed5   :  { %v7623_v50 = vpop.f32.mrf.mxu1 }
0x3ed6   :  { %v5329_v27 = vadd.f32 %v5327_v3, %v5323_v4 }
0x3ed8   :  { %v6654_v16 = vmul.f32 -1.442695, %v5329_v27 }
0x3eda   :  { %7983 = vpow2.f32 %v6654_v16 }
0x3ee7   :  { %v7984_v19 = vpop.eup %7983 }
0x3ee8   :  { %v5333_v20 = vadd.f32 1.0, %v7984_v19 }
0x3eea   :  { %7985 = vrcp.f32 %v5333_v20 }
0x3ef7   :  { %v7986_v22 = vpop.eup %7985 }
0x3ef8   :  { %v5339_v24 = vmul.f32 %v7986_v22, %v5337_v37  ;;  %v5346_v51 = vsub.f32 1.0, %v7986_v22  ;;  %v5352_v13 = vmul.f32 %v7986_v22, %v9737_v39 }
0x3efa   :  { %5341 = vrot.lane.b32.xlu1 %v5339_v24, %s8379_s7 }
0x3f6c   :  { %v5342_v44 = vpop.permute.xlu1 %5341 }
0x3f6d   :  { %v5344_v45 = vadd.f32 %v5342_v44, %v5323_v4 }
0x3f6f   :  { %7987 = vtanh.f32 %v5344_v45 }
0x3f7c   :  { %v7988_v49 = vpop.eup %7987 }
0x3f7d   :  { %5348 = vrot.lane.b32.xlu0 %v7988_v49, %s8380_s30 }
0x3f81   :  { %5358 = vrot.lane.b32.xlu0 %v5247_v59, %s8384_s3 }
0x3fef   :  { %v5349_v6 = vpop.permute.xlu0 %5348 }
0x3ff0   :  { %v5351_v55 = vmul.f32 %v5349_v6, %v5346_v51 }
0x3ff2   :  { %v9882_v28 = vadd.f32 %v5352_v13, %v5351_v55 }
0x3ff3   :  { %v5359_v43 = vpop.permute.xlu0 %5358 }
0x3ff4   :  { %5355 = vrot.lane.b32.xlu1 %v9882_v28, %s8380_s30 }
0x4066   :  { %v5356_v5 = vpop.permute.xlu1 %5355 }
0x4067   :  { %v5361_v7 = vsel %vm420_vm2, %v5356_v5, %v5359_v43  ;;  %7652 = vmatmul.mubr.msk.f32.vlgmr.msra.gmra.mxu1 %vm420_vm2, %v5356_v5 }
0x4068   :  { %7641 = vmatmul.mubr.msk.f32.vlgmr.msra.gmra.mxu0 %vm2731_vm9, %v5361_v7  ;;  %7660 = vmatpush3.msra.mxu1 %v9560_v46 }
0x4069   :  { %7656 = vmatprep.mubr.msk.f32.mxu0 %vm2325_vm6, %v9579_v34  ;;  %7661 = vmatprep.subr.mxu1 %v9586_v2 }
0x406a   :  { %7662 = vmatpush3.msra.mxu1 %v9586_v2 }
0x406b   :  { %7663 = vmatprep.subr.mxu1 %v9593_v61 }
0x406c   :  { %7664 = vmatpush3.msra.mxu1 %v9593_v61 }
0x406d   :  { %7665 = vmatprep.subr.mxu1 %v9600_v23 }
0x406e   :  { %7666 = vmatpush3.msra.mxu1 %v9600_v23 }
0x406f   :  { %7692 = vmatprep.subr.mxu1 %v8377_v0 }
0x4127   :  { %v5503_v39 = vpop.f32.mrf.mxu1 }
0x4128   :  { %v9900_v10 = vadd.f32 %v9607_v62, %v5503_v39  ;;  %v9902_v42 = vpop.f32.mrf.mxu0 }
0x4129   :  { %v7653_v59 = vpop.f32.mrf.mxu1 }
0x412a   :  { %v7642_v47 = vpop.f32.mrf.mxu0  ;;  %7654 = vmatprep.subr.msk.mxu0 %vm2104_vm3, %v9900_v10 }
0x412b   :  { %7655 = vmatpush3.msk.msra.mxu0 %vm2104_vm3, %v9900_v10 }
0x412c   :  { %7657 = vmatmul.mubr.msk.f32.vlgmr.msra.gmra.mxu0 %vm2325_vm6, %v9626_v17  ;;  %7670 = vmatprep.subr.mxu0 %v8377_v0 }
0x412d   :  { %7674 = vmatprep.mubr.msk.f32.mxu0 %vm8378_vm0, %v8377_v0 }
0x41ec   :  { %v7658_v48 = vpop.f32.mrf.mxu0 }
0x41ed   :  { %v5586_v26 = vadd.f32 %v7658_v48, %v9088_v56 }
0x41ee   :  { %v5576_v4 = vpop.f32.mrf.mxu0 }
0x41ef   :  { %v5585_v3 = vadd.f32 %v5576_v4, %v9090_v11  ;;  %v5588_v27 = vmax.f32 %v5586_v26, 0.0 }
0x41f1   :  { %v5587_v50 = vmax.f32 %v5585_v3, 0.0 }
0x41f3   :  { %7667 = vmatprep.mubr.msk.f32.mxu1 %vm420_vm2, %v5587_v50 }
0x41f4   :  { %7668 = vmatmul.mubr.msk.f32.vlgmr.msra.gmra.mxu1 %vm420_vm2, %v5588_v27 }
0x41f5   :  { %7693 = vmatpush3.msra.mxu1 %v9775_v21  ;;  %7708 = vmatprep.mubr.msk.f32.mxu1 %vm8378_vm0, %v8377_v0 }
0x41f6   :  { %7694 = vmatprep.subr.mxu1 %v8377_v0 }
0x41f7   :  { %7695 = vmatpush3.msra.mxu1 %v9784_v36 }
0x41f8   :  { %7696 = vmatprep.subr.mxu1 %v8377_v0 }
0x41f9   :  { %7697 = vmatpush3.msra.mxu1 %v9791_v54 }
0x41fa   :  { %7698 = vmatprep.subr.mxu1 %v8377_v0 }
0x41fb   :  { %7699 = vmatpush3.msra.mxu1 %v9798_v9 }
0x41fc   :  { %7700 = vmatprep.subr.mxu1 %v8377_v0 }
0x41fd   :  { %7701 = vmatpush3.msra.mxu1 %v9805_v1 }
0x41fe   :  { %7702 = vmatprep.subr.mxu1 %v8377_v0 }
0x41ff   :  { %7703 = vmatpush3.msra.mxu1 %v9812_v40 }
0x4200   :  { %7704 = vmatprep.subr.mxu1 %v8377_v0 }
0x4201   :  { %7705 = vmatpush3.msra.mxu1 %v9819_v33 }
0x4202   :  { %7706 = vmatprep.subr.mxu1 %v8377_v0 }
0x4203   :  { %7707 = vmatpush3.msra.mxu1 %v9826_v18 }
0x42b4   :  { %v7669_v16 = vpop.f32.mrf.mxu1 }
0x42b5   :  { %v5671_v20 = vsel %vm2495_vm7, %v7669_v16, -inf }
0x42b6   :  { %v5661_v19 = vpop.f32.mrf.mxu1 }
0x42b7   :  { %v5670_v22 = vsel %vm2495_vm7, %v5661_v19, -inf }
0x42b8   :  { %v5672_v37 = vmax.f32 %v5670_v22, %v5671_v20 }
0x42ba   :  { %v5673_v24 = vrot.slane %v5672_v37, 4 }
0x42bc   :  { %v5674_v44 = vmax.f32 %v5672_v37, %v5673_v24 }
0x42be   :  { %v5675_v45 = vrot.slane %v5674_v44, 2 }
0x42c0   :  { %v5676_v49 = vmax.f32 %v5674_v44, %v5675_v45 }
0x42c2   :  { %v5677_v51 = vrot.slane %v5676_v49, 1 }
0x42c4   :  { %v5678_v6 = vmax.f32 %v5676_v49, %v5677_v51 }
0x42c6   :  { %v5679_v13 = vsub.f32 %v5661_v19, %v5678_v6  ;;  %v5680_v55 = vsub.f32 %v7669_v16, %v5678_v6  ;;  %v9965_v19 = vadd.f32 %v9858_v60, %v9902_v42 }
0x42c8   :  { %v5681_v43 = vmul.f32 1.442695, %v5679_v13  ;;  %v5683_v5 = vmul.f32 1.442695, %v5680_v55 }
0x42ca   :  { %7989 = vpow2.f32 %v5681_v43 }
0x42cb   :  { %7991 = vpow2.f32 %v5683_v5 }
0x42d7   :  { %v7990_v7 = vpop.eup %7989 }
0x42d8   :  { %v7992_v39 = vpop.eup %7991  ;;  %5687 = vperm.xlu0 %7817, %v7990_v7  }
0x42d9   :  { %5692 = vperm.xlu1 %7815, %v7992_v39  }
0x42dc   :  { %5852 = vrot.lane.b32.xlu0 %v9900_v10, %s8380_s30 }
0x42dd   :  { %7818 = vset.pattern.permute.xlu1 %v8382_v38 }
0x4353   :  { %v5688_v47 = vpop.permute.xlu0 %5687 }
0x4354   :  { %v5693_v59 = vpop.permute.xlu1 %5692  ;;  %v5695_v26 = vmul.f32 %v5688_v47, %v9111_v35 }
0x4355   :  { %v5696_v48 = vmul.f32 %v5693_v59, %v9106_v32 }
0x4357   :  { %7671 = vmatpush3.msra.mxu0 %v5696_v48 }
0x4358   :  { %7672 = vmatprep.subr.mxu0 %v8377_v0 }
0x4359   :  { %7673 = vmatpush3.msra.mxu0 %v5695_v26 }
0x435a   :  { %7675 = vmatmul.mubr.msk.f32.vlgmr.msra.gmra.mxu0 %vm238_vm1, %v9664_v15  ;;  %7677 = vmatprep.subr.mxu0 %v8377_v0 }
0x435b   :  { %7678 = vmatpush3.msra.mxu0 %v9672_v53  ;;  %7689 = vmatprep.mubr.msk.f32.mxu0 %vm8378_vm0, %v8377_v0 }
0x435c   :  { %7679 = vmatprep.subr.mxu0 %v8377_v0 }
0x435d   :  { %7680 = vmatpush3.msra.mxu0 %v9681_v57 }
0x435e   :  { %7681 = vmatprep.subr.mxu0 %v8377_v0 }
0x435f   :  { %7682 = vmatpush3.msra.mxu0 %v9688_v25 }
0x4360   :  { %7683 = vmatprep.subr.mxu0 %v8377_v0 }
0x4361   :  { %7684 = vmatpush3.msra.mxu0 %v9695_v29 }
0x4362   :  { %7685 = vmatprep.subr.mxu0 %v8377_v0 }
0x4363   :  { %7686 = vmatpush3.msra.mxu0 %v9702_v30 }
0x4364   :  { %7687 = vmatprep.subr.mxu0 %v8377_v0 }
0x4365   :  { %7688 = vmatpush3.msra.mxu0 %v9709_v31 }
0x4366   :  { %7711 = vmatprep.subr.mxu0 %v8377_v0 }
0x441a   :  { %v5763_v4 = vpop.f32.mrf.mxu0 }
0x441b   :  { %7993 = vrcp.f32 %v5763_v4 }
0x441c   :  { %v7676_v3 = vpop.f32.mrf.mxu0 }
0x4428   :  { %v7994_v50 = vpop.eup %7993 }
0x4429   :  { %5770 = vperm.xlu1 %7818, %v7994_v50  }
0x442d   :  { %7819 = vset.pattern.permute.xlu1 %v8381_v14 }
0x44a4   :  { %v5771_v27 = vpop.permute.xlu1 %5770 }
0x44a5   :  { %v5773_v16 = vmul.f32 %v5771_v27, %v5763_v4 }
0x44a7   :  { %5775 = vrot.lane.b32.xlu1 %v5773_v16, %s8383_s17 }
0x44ab   :  { %5862 = vrot.lane.b32.xlu1 %v9900_v10, %s8384_s3  ;;  %v5853_v10 = vpop.permute.xlu0 %5852 }
0x4519   :  { %v5776_v20 = vpop.permute.xlu1 %5775 }
0x451a   :  { %v5778_v22 = vsel %vm238_vm1, %v9965_v19, %v5776_v20 }
0x451b   :  { %7690 = vmatmul.mubr.msk.f32.vlgmr.msra.gmra.mxu0 %vm2614_vm8, %v5778_v22 }
0x451c   :  { %7712 = vmatpush3.msra.mxu0 %v9540_v41  ;;  %7719 = vmatprep.mubr.msk.f32.mxu0 %vm8378_vm0, %v8377_v0 }
0x451d   :  { %7713 = vmatprep.subr.mxu0 %v8377_v0  ;;  %v5863_v49 = vpop.permute.xlu1 %5862 }
0x451e   :  { %7714 = vmatpush3.msra.mxu0 %v9546_v8 }
0x451f   :  { %7715 = vmatprep.subr.mxu0 %v8377_v0 }
0x4520   :  { %7716 = vmatpush3.msra.mxu0 %v9550_v12 }
0x4521   :  { %7717 = vmatprep.subr.mxu0 %v8377_v0 }
0x4522   :  { %7718 = vmatpush3.msra.mxu0 %v9554_v63 }
0x4523   :  { %7727 = vmatprep.subr.mxu0 %v9560_v46 }
0x45db   :  { %v5848_v14 = vpop.f32.mrf.mxu0 }
0x45dc   :  { %v5849_v41 = vadd.f32 %v9730_v52, %v5848_v14 }
0x45dd   :  { %v7691_v42 = vpop.f32.mrf.mxu0 }
0x45de   :  { %v5855_v37 = vadd.f32 %v5853_v10, %v5849_v41 }
0x45e0   :  { %v6664_v24 = vmul.f32 -1.442695, %v5855_v37 }
0x45e2   :  { %7995 = vpow2.f32 %v6664_v24 }
0x45ef   :  { %v7996_v44 = vpop.eup %7995 }
0x45f0   :  { %v5859_v8 = vadd.f32 1.0, %v7996_v44 }
0x45f2   :  { %7997 = vrcp.f32 %v5859_v8 }
0x45ff   :  { %v7998_v45 = vpop.eup %7997 }
0x4600   :  { %v5865_v12 = vmul.f32 %v7998_v45, %v5863_v49  ;;  %v5872_v13 = vsub.f32 1.0, %v7998_v45  ;;  %v5878_v43 = vmul.f32 %v7998_v45, %v9882_v28 }
0x4602   :  { %5867 = vrot.lane.b32.xlu0 %v5865_v12, %s8379_s7 }
0x4674   :  { %v5868_v51 = vpop.permute.xlu0 %5867 }
0x4675   :  { %v5870_v63 = vadd.f32 %v5868_v51, %v5849_v41 }
0x4677   :  { %7999 = vtanh.f32 %v5870_v63 }
0x4684   :  { %v8000_v6 = vpop.eup %7999 }
0x4685   :  { %5874 = vrot.lane.b32.xlu1 %v8000_v6, %s8380_s30 }
0x4689   :  { %5884 = vrot.lane.b32.xlu1 %v5773_v16, %s8384_s3 }
0x46f7   :  { %v5875_v55 = vpop.permute.xlu1 %5874 }
0x46f8   :  { %v5877_v5 = vmul.f32 %v5875_v55, %v5872_v13 }
0x46fa   :  { %v9985_v7 = vadd.f32 %v5878_v43, %v5877_v5 }
0x46fb   :  { %v5885_v39 = vpop.permute.xlu1 %5884 }
0x46fc   :  { %5881 = vrot.lane.b32.xlu0 %v9985_v7, %s8380_s30 }
0x476e   :  { %v5882_v59 = vpop.permute.xlu0 %5881 }
0x476f   :  { %v5887_v47 = vsel %vm420_vm2, %v5882_v59, %v5885_v39  ;;  %7720 = vmatmul.mubr.msk.f32.vlgmr.msra.gmra.mxu0 %vm420_vm2, %v5882_v59 }
0x4770   :  { %7709 = vmatmul.mubr.msk.f32.vlgmr.msra.gmra.mxu1 %vm2731_vm9, %v5887_v47  ;;  %7728 = vmatpush3.msra.mxu0 %v9560_v46 }
0x4771   :  { %7724 = vmatprep.mubr.msk.f32.mxu1 %vm2325_vm6, %v9579_v34  ;;  %7729 = vmatprep.subr.mxu0 %v9586_v2 }
0x4772   :  { %7730 = vmatpush3.msra.mxu0 %v9586_v2 }
0x4773   :  { %7731 = vmatprep.subr.mxu0 %v9593_v61 }
0x4774   :  { %7732 = vmatpush3.msra.mxu0 %v9593_v61 }
0x4775   :  { %7733 = vmatprep.subr.mxu0 %v9600_v23 }
0x4776   :  { %7734 = vmatpush3.msra.mxu0 %v9600_v23 }
0x4777   :  { %7760 = vmatprep.subr.mxu0 %v8377_v0 }
0x482f   :  { %v6029_v28 = vpop.f32.mrf.mxu0 }
0x4830   :  { %v10003_v46 = vadd.f32 %v9607_v62, %v6029_v28  ;;  %v10005_v48 = vpop.f32.mrf.mxu1 }
0x4831   :  { %v7721_v34 = vpop.f32.mrf.mxu0 }
0x4832   :  { %v7710_v26 = vpop.f32.mrf.mxu1  ;;  %7722 = vmatprep.subr.msk.mxu1 %vm2104_vm3, %v10003_v46 }
0x4833   :  { %7723 = vmatpush3.msk.msra.mxu1 %vm2104_vm3, %v10003_v46 }
0x4834   :  { %7725 = vmatmul.mubr.msk.f32.vlgmr.msra.gmra.mxu1 %vm2325_vm6, %v9626_v17  ;;  %7738 = vmatprep.subr.mxu1 %v8377_v0 }
0x4835   :  { %7742 = vmatprep.mubr.msk.f32.mxu1 %vm8378_vm0, %v8377_v0 }
0x48f4   :  { %v7726_v2 = vpop.f32.mrf.mxu1 }
0x48f5   :  { %v6112_v61 = vadd.f32 %v7726_v2, %v9088_v56 }
0x48f6   :  { %v6102_v23 = vpop.f32.mrf.mxu1 }
0x48f7   :  { %v6111_v62 = vadd.f32 %v6102_v23, %v9090_v11  ;;  %v6114_v3 = vmax.f32 %v6112_v61, 0.0 }
0x48f9   :  { %v6113_v4 = vmax.f32 %v6111_v62, 0.0 }
0x48fb   :  { %7735 = vmatprep.mubr.msk.f32.mxu0 %vm420_vm2, %v6113_v4 }
0x48fc   :  { %7736 = vmatmul.mubr.msk.f32.vlgmr.msra.gmra.mxu0 %vm420_vm2, %v6114_v3 }
0x48fd   :  { %7761 = vmatpush3.msra.mxu0 %v9775_v21  ;;  %7776 = vmatprep.mubr.msk.f32.mxu0 %vm8378_vm0, %v8377_v0 }
0x48fe   :  { %7762 = vmatprep.subr.mxu0 %v8377_v0 }
0x48ff   :  { %7763 = vmatpush3.msra.mxu0 %v9784_v36 }
0x4900   :  { %7764 = vmatprep.subr.mxu0 %v8377_v0 }
0x4901   :  { %7765 = vmatpush3.msra.mxu0 %v9791_v54 }
0x4902   :  { %7766 = vmatprep.subr.mxu0 %v8377_v0 }
0x4903   :  { %7767 = vmatpush3.msra.mxu0 %v9798_v9 }
0x4904   :  { %7768 = vmatprep.subr.mxu0 %v8377_v0 }
0x4905   :  { %7769 = vmatpush3.msra.mxu0 %v9805_v1 }
0x4906   :  { %7770 = vmatprep.subr.mxu0 %v8377_v0 }
0x4907   :  { %7771 = vmatpush3.msra.mxu0 %v9812_v40 }
0x4908   :  { %7772 = vmatprep.subr.mxu0 %v8377_v0 }
0x4909   :  { %7773 = vmatpush3.msra.mxu0 %v9819_v33 }
0x490a   :  { %7774 = vmatprep.subr.mxu0 %v8377_v0 }
0x490b   :  { %7775 = vmatpush3.msra.mxu0 %v9826_v18 }
0x49bc   :  { %v7737_v56 = vpop.f32.mrf.mxu0 }
0x49bd   :  { %v6197_v17 = vsel %vm2495_vm7, %v7737_v56, -inf }
0x49be   :  { %v6187_v11 = vpop.f32.mrf.mxu0 }
0x49bf   :  { %v6196_v21 = vsel %vm2495_vm7, %v6187_v11, -inf }
0x49c0   :  { %v6198_v36 = vmax.f32 %v6196_v21, %v6197_v17 }
0x49c2   :  { %v6199_v54 = vrot.slane %v6198_v36, 4 }
0x49c4   :  { %v6200_v9 = vmax.f32 %v6198_v36, %v6199_v54 }
0x49c6   :  { %v6201_v1 = vrot.slane %v6200_v9, 2 }
0x49c8   :  { %v6202_v50 = vmax.f32 %v6200_v9, %v6201_v1 }
0x49ca   :  { %v6203_v40 = vrot.slane %v6202_v50, 1 }
0x49cc   :  { %v6204_v27 = vmax.f32 %v6202_v50, %v6203_v40 }
0x49ce   :  { %v6205_v16 = vsub.f32 %v6187_v11, %v6204_v27  ;;  %v6206_v20 = vsub.f32 %v7737_v56, %v6204_v27 }
0x49d0   :  { %v6207_v33 = vmul.f32 1.442695, %v6205_v16  ;;  %v6209_v22 = vmul.f32 1.442695, %v6206_v20 }
0x49d2   :  { %8001 = vpow2.f32 %v6207_v33 }
0x49d3   :  { %8003 = vpow2.f32 %v6209_v22 }
0x49df   :  { %v8002_v18 = vpop.eup %8001 }
0x49e0   :  { %v8004_v14 = vpop.eup %8003  ;;  %6213 = vperm.xlu1 %7819, %v8002_v18  }
0x49e1   :  { %6218 = vperm.xlu0 %7817, %v8004_v14  }
0x49e5   :  { %7820 = vset.pattern.permute.xlu0 %v8382_v38 }
0x4a5b   :  { %v6214_v10 = vpop.permute.xlu1 %6213 }
0x4a5c   :  { %v6219_v41 = vpop.permute.xlu0 %6218  ;;  %v6221_v37 = vmul.f32 %v6214_v10, %v9111_v35 }
0x4a5d   :  { %v6222_v42 = vmul.f32 %v6219_v41, %v9106_v32 }
0x4a5f   :  { %7739 = vmatpush3.msra.mxu1 %v6222_v42 }
0x4a60   :  { %7740 = vmatprep.subr.mxu1 %v8377_v0 }
0x4a61   :  { %7741 = vmatpush3.msra.mxu1 %v6221_v37 }
0x4a62   :  { %7743 = vmatmul.mubr.msk.f32.vlgmr.msra.gmra.mxu1 %vm238_vm1, %v9664_v15  ;;  %7745 = vmatprep.subr.mxu1 %v8377_v0 }
0x4a63   :  { %7746 = vmatpush3.msra.mxu1 %v9672_v53  ;;  %7757 = vmatprep.mubr.msk.f32.mxu1 %vm8378_vm0, %v8377_v0 }
0x4a64   :  { %7747 = vmatprep.subr.mxu1 %v8377_v0 }
0x4a65   :  { %7748 = vmatpush3.msra.mxu1 %v9681_v57 }
0x4a66   :  { %7749 = vmatprep.subr.mxu1 %v8377_v0 }
0x4a67   :  { %7750 = vmatpush3.msra.mxu1 %v9688_v25 }
0x4a68   :  { %7751 = vmatprep.subr.mxu1 %v8377_v0 }
0x4a69   :  { %7752 = vmatpush3.msra.mxu1 %v9695_v29 }
0x4a6a   :  { %7753 = vmatprep.subr.mxu1 %v8377_v0 }
0x4a6b   :  { %7754 = vmatpush3.msra.mxu1 %v9702_v30 }
0x4a6c   :  { %7755 = vmatprep.subr.mxu1 %v8377_v0  ;;  %v5958_v0 = vadd.f32 %v9858_v60, %v10005_v48 }
0x4a6d   :  { %7756 = vmatpush3.msra.mxu1 %v9709_v31 }
0x4b22   :  { %v6289_v32 = vpop.f32.mrf.mxu1 }
0x4b23   :  { %8005 = vrcp.f32 %v6289_v32 }
0x4b24   :  { %v7744_v35 = vpop.f32.mrf.mxu1 }
0x4b30   :  { %v8006_v38 = vpop.eup %8005 }
0x4b31   :  { %6296 = vperm.xlu0 %7820, %v8006_v38  }
0x4b35   :  { %6388 = vrot.lane.b32.xlu0 %v10003_v46, %s8384_s3 }
0x4bac   :  { %v6297_v15 = vpop.permute.xlu0 %6296 }
0x4bad   :  { %v6299_v53 = vmul.f32 %v6297_v15, %v6289_v32 }
0x4baf   :  { %6301 = vrot.lane.b32.xlu1 %v6299_v53, %s8383_s17 }
0x4bb0   :  { %v6389_v51 = vpop.permute.xlu0 %6388 }
0x4bb3   :  { %6378 = vrot.lane.b32.xlu1 %v10003_v46, %s8380_s30 }
0x4c21   :  { %v6302_v57 = vpop.permute.xlu1 %6301 }
0x4c22   :  { %v6304_v25 = vsel %vm238_vm1, %v5958_v0, %v6302_v57 }
0x4c23   :  { %7758 = vmatmul.mubr.msk.f32.vlgmr.msra.gmra.mxu1 %vm2614_vm8, %v6304_v25 }
0x4c25   :  { %v6379_v31 = vpop.permute.xlu1 %6378 }
0x4ce3   :  { %v6374_v29 = vpop.f32.mrf.mxu1 }
0x4ce4   :  { %v6375_v30 = vadd.f32 %v9730_v52, %v6374_v29 }
0x4ce5   :  { %v7759_v24 = vpop.f32.mrf.mxu1 }
0x4ce6   :  { %v6381_v44 = vadd.f32 %v6379_v31, %v6375_v30 }
0x4ce8   :  { %v6674_v8 = vmul.f32 -1.442695, %v6381_v44 }
0x4cea   :  { %8007 = vpow2.f32 %v6674_v8 }
0x4cf7   :  { %v8008_v45 = vpop.eup %8007 }
0x4cf8   :  { %v6385_v49 = vadd.f32 1.0, %v8008_v45 }
0x4cfa   :  { %8009 = vrcp.f32 %v6385_v49 }
0x4d07   :  { %v8010_v12 = vpop.eup %8009 }
0x4d08   :  { %v6391_v63 = vmul.f32 %v8010_v12, %v6389_v51  ;;  %v6398_v52 = vsub.f32 1.0, %v8010_v12  ;;  %v6404_v5 = vmul.f32 %v8010_v12, %v9985_v7 }
0x4d0a   :  { %6393 = vrot.lane.b32.xlu1 %v6391_v63, %s8379_s7  ;;  %s6530_s7 = sshll.u32 %s8385_s16, 4  ;;  %s6531_s7 = int_to_ptr.vmem [resolvable:$true] %s6530_s7 }
0x4d0b   :  { %s8304_s17 = scalar_lea.vmem %s6531_s7, 256  ;;  %p8309_p10 = scmp.lt.s32.totalorder %s6531_s7, %s6531_s7 }
0x4d0c   :  { %p8305_p9 = scmp.ne.s32.totalorder %s6531_s7, %s8304_s17  ;;  %p8310_p11 = scmp.lt.s32.totalorder %s8304_s17, %s8304_s17 }
0x4d0e   :  { %p8311_p12 = por %p8310_p11, %p8309_p10 }
0x4d10   :  { %p8312_p13 = pnand %p8311_p12, %p8305_p9 }
0x4d7c   :  { %v6394_v6 = vpop.permute.xlu1 %6393 }
0x4d7d   :  { %v6396_v13 = vadd.f32 %v6394_v6, %v6375_v30 }
0x4d7f   :  { %8011 = vtanh.f32 %v6396_v13 }
0x4d8c   :  { %v8012_v55 = vpop.eup %8011 }
0x4d8d   :  { %6400 = vrot.lane.b32.xlu0 %v8012_v55, %s8380_s30 }
0x4d91   :  { %6410 = vrot.lane.b32.xlu0 %v6299_v53, %s8384_s3 }
0x4dff   :  { %v6401_v43 = vpop.permute.xlu0 %6400 }
0x4e00   :  { %v6403_v39 = vmul.f32 %v6401_v43, %v6398_v52 }
0x4e02   :  { %v6405_v59 = vadd.f32 %v6404_v5, %v6403_v39 }
0x4e03   :  { %v6411_v47 = vpop.permute.xlu0 %6410 }
0x4e04   :  { %6407 = vrot.lane.b32.xlu1 %v6405_v59, %s8380_s30 }
0x4e76   :  { %v6408_v28 = vpop.permute.xlu1 %6407 }
0x4e77   :  { %v6413_v46 = vsel %vm420_vm2, %v6408_v28, %v6411_v47 }
0x4e78   :  { %7777 = vmatmul.mubr.msk.f32.vlgmr.msra.gmra.mxu0 %vm2731_vm9, %v6413_v46 }
0x4e79   :  { %8315 = shalt.err (!%p8312_p13)
}
0x4e7a   :  { %6536 = dma.vmem_to_hbm [thread:$0]  %s6531_s7, 256, %s10116_s21, [#allocation25], %s8364_s28, %s8364_s28, %s8365_s29   ;;  %v6497_v7 = vrot.slane %v9965_v19, 6  ;;  %v6500_v48 = vrot.slane %v5958_v0, 4 }
0x4e7b   :  { %s8386_s22 = smov [#allocation23]  }
0x4e7c   :  { %s6518_s15 = sshll.u32 %s8386_s22, 4  ;;  %v6508_v61 = vsel %vm2104_vm3, %v9862_v58, %v6497_v7  ;;  %s6519_s15 = int_to_ptr.vmem [resolvable:$true] %s6518_s15 }
0x4e7d   :  { %v6509_v62 = vsel %vm2106_vm4, %v6508_v61, %v6500_v48  ;;  %s8324_s21 = scalar_lea.vmem %s6519_s15, 256  ;;  %p8329_p1 = scmp.lt.s32.totalorder %s6519_s15, %s6519_s15 }
0x4e7e   :  { %p8325_p0 = scmp.ne.s32.totalorder %s6519_s15, %s8324_s21  ;;  %p8330_p2 = scmp.lt.s32.totalorder %s8324_s21, %s8324_s21 }
0x4e80   :  { %p8331_p3 = por %p8330_p2, %p8329_p1 }
0x4e82   :  { %p8332_p4 = pnand %p8331_p3, %p8325_p0 }
0x4f38   :  { %v6483_v34 = vpop.f32.mrf.mxu0 }
0x4f39   :  { %v6484_v26 = vadd.f32 %v9858_v60, %v6483_v34 }
0x4f3a   :  { %v7778_v2 = vpop.f32.mrf.mxu0 }
0x4f3b   :  { %v6503_v23 = vrot.slane %v6484_v26, 2 }
0x4f3d   :  { %v6510_v4 = vsel %vm2108_vm5, %v6509_v62, %v6503_v23 }
0x4f3e   :  { %6512 = vst.msk [vmem:[#allocation23 + $0x8] sm:$0xff] %vm238_vm1, %v6510_v4 }
0x4f3f   :  { %8335 = shalt.err (!%p8332_p4)
}
0x4f40   :  { %s10131_s1 = sld [smem:[#allocation41_spill]] }
0x4f46   :  { %6524 = dma.vmem_to_hbm [thread:$0]  %s6519_s15, 256, %s10131_s1, [#allocation4], %s8364_s28, %s8364_s28, %s8365_s29  }
0x4f47   :  { %8358 = dma.done.wait [#allocation4], 256  }
0x4f48   :  { %8359 = vsyncadd [#allocation4], 4294967040 }
0x4f49   :  { %8360 = dma.done.wait [#allocation25], 256  }
0x4f4a   :  { %8361 = vsyncadd [#allocation25], 4294967040 }
0x4f4b   :  { %6543 = vsyncpa [#allocation3], 1 }
0x4f4c   :  { %6544 = vsyncpa [#allocation6], 1 }
0x4f4d   :  { %6545 = vsyncpa [#allocation9], 1 }
0x4f4e   :  { %6546 = vsyncpa [#allocation12], 1 }
0x4f4f   :  { %6547 = vsyncpa [#allocation15], 1 }
0x4f50   :  { %6548 = vsyncpa [#allocation18], 1 }
0x4f51   :  { %6549 = vsyncpa [#allocation21], 1 }
0x4f52   :  { %6550 = vsyncpa [#allocation4], 1 }
0x4f53   :  { %6551 = vsyncpa [#allocation25], 1 }

</bundles_post_ra>
